<compile_context>
chip_gen: v7x
topology: tpu7x:2x2x1
jax: 0.10.0
libtpu: 0.0.40
codegen_flags: <defaults>
</compile_context>

<pallas_src>
import functools

import jax
import jax.numpy as jnp
from jax.experimental import pallas as pl
from jax.experimental.pallas import tpu as pltpu

CPAD = 128          # lane-dense channel width carried through the whole network
_EPS = 1e-5         # PyTorch InstanceNorm2d default eps


def _round_up(x, m):
    return (x + m - 1) // m * m


@functools.lru_cache(maxsize=1)
def _vmem_limit_bytes():
    # ~half of physical VMEM: 64 MiB on v5e/v6e (128 MiB phys), 32 MiB on v7x (64 MiB).
    try:
        cap = pltpu.get_tpu_info().vmem_capacity_bytes
        return int(min(cap // 2, 96 * 1024 * 1024))
    except Exception:
        return 64 * 1024 * 1024


# ----------------------------------------------------------------------------
# Pallas kernels
# ----------------------------------------------------------------------------
def _matmul_kernel(a_ref, w_ref, o_ref, acc_ref):
    # a: (TM, TK) bf16, w: (TK, TN) bf16, acc/o: (TM, TN) f32.  K is grid axis 2.
    @pl.when(pl.program_id(2) == 0)
    def _init():
        acc_ref[...] = jnp.zeros_like(acc_ref)

    acc_ref[...] += jnp.dot(a_ref[...], w_ref[...],
                            preferred_element_type=jnp.float32)

    @pl.when(pl.program_id(2) == pl.num_programs(2) - 1)
    def _store():
        o_ref[...] = acc_ref[...].astype(o_ref.dtype)


def _instnorm_kernel(x_ref, g_ref, b_ref, *rest, relu, has_res):
    # x: (1, HW, C) f32; g, b: (1, 1, C); optional residual r: (1, HW, C).
    # Per-(n, c) stats reduce over the spatial (sublane) axis; C sits on lanes.
    if has_res:
        r_ref, o_ref = rest
    else:
        (o_ref,) = rest
    x = x_ref[...]
    mean = jnp.mean(x, axis=1, keepdims=True)
    var = jnp.mean(jnp.square(x - mean), axis=1, keepdims=True)
    y = (x - mean) * jax.lax.rsqrt(var + _EPS)
    y = y * g_ref[...] + b_ref[...]
    if has_res:
        y = y + r_ref[...]
    if relu:
        y = jnp.maximum(y, 0.0)
    o_ref[...] = y


# ----------------------------------------------------------------------------
# Pallas wrappers
# ----------------------------------------------------------------------------
def matmul_tiled(a, b):
    """a: (M, K), b: (K, N) with K % 128 == 0 and N % 128 == 0.  Returns (M, N) f32."""
    M, K = a.shape
    _, Nc = b.shape

    TN = 128
    TK = 256 if K % 256 == 0 else 128
    TM = 256 if M >= 256 else _round_up(M, 8)
    Mp = _round_up(M, TM)
    if Mp != M:
        a = jnp.pad(a, ((0, Mp - M), (0, 0)))

    # Feed the MXU bf16; accumulate in f32.
    a = a.astype(jnp.bfloat16)
    b = b.astype(jnp.bfloat16)

    grid = (Mp // TM, Nc // TN, K // TK)
    out = pl.pallas_call(
        _matmul_kernel,
        out_shape=jax.ShapeDtypeStruct((Mp, Nc), jnp.float32),
        grid_spec=pltpu.PrefetchScalarGridSpec(
            num_scalar_prefetch=0,
            grid=grid,
            in_specs=[
                pl.BlockSpec((TM, TK), lambda i, j, k: (i, k)),
                pl.BlockSpec((TK, TN), lambda i, j, k: (k, j)),
            ],
            out_specs=pl.BlockSpec((TM, TN), lambda i, j, k: (i, j)),
            scratch_shapes=[pltpu.VMEM((TM, TN), jnp.float32)],
        ),
        compiler_params=pltpu.CompilerParams(
            dimension_semantics=("parallel", "parallel", "arbitrary"),
            vmem_limit_bytes=_vmem_limit_bytes(),
        ),
    )(a, b)
    if Mp != M:
        out = out[:M]
    return out


def instance_norm(x_nhwc, gamma, beta, *, relu, residual=None):
    """Fused InstanceNorm2d(affine) + optional residual add + optional ReLU.

    x_nhwc: (N, H, W, C) with C == CPAD (real channels first, padded channels zero).
    gamma/beta: (c_real,).  Padded channels get gamma=beta=0 so they stay zero.
    """
    N, H, W, C = x_nhwc.shape
    HW = H * W
    x = x_nhwc.reshape(N, HW, C).astype(jnp.float32)
    g = jnp.zeros((1, 1, C), jnp.float32).at[0, 0, : gamma.shape[0]].set(gamma)
    b = jnp.zeros((1, 1, C), jnp.float32).at[0, 0, : beta.shape[0]].set(beta)

    kernel = functools.partial(_instnorm_kernel, relu=relu,
                               has_res=residual is not None)
    in_specs = [
        pl.BlockSpec((1, HW, C), lambda n: (n, 0, 0)),
        pl.BlockSpec((1, 1, C), lambda n: (0, 0, 0)),
        pl.BlockSpec((1, 1, C), lambda n: (0, 0, 0)),
    ]
    args = [x, g, b]
    if residual is not None:
        in_specs.append(pl.BlockSpec((1, HW, C), lambda n: (n, 0, 0)))
        args.append(residual.reshape(N, HW, C).astype(jnp.float32))

    out = pl.pallas_call(
        kernel,
        out_shape=jax.ShapeDtypeStruct((N, HW, C), jnp.float32),
        grid=(N,),
        in_specs=in_specs,
        out_specs=pl.BlockSpec((1, HW, C), lambda n: (n, 0, 0)),
        compiler_params=pltpu.CompilerParams(
            dimension_semantics=("parallel",),
            vmem_limit_bytes=_vmem_limit_bytes(),
        ),
    )(*args)
    return out.reshape(N, H, W, C)


# ----------------------------------------------------------------------------
# Conv layer = reflection pad + channels-last im2col (glue) + tiled Pallas matmul
# ----------------------------------------------------------------------------
# TODO(synk): implicit in-kernel im2col (haloed BlockSpecs / manual DMA) would
# remove the k^2 HBM read amplification of the host-side im2col, especially for
# the 9x9 conv1; kept host-side here for robustness.
def _im2col_nhwc(xp, k, stride):
    N, Hp, Wp, C = xp.shape
    Ho = (Hp - k) // stride + 1
    Wo = (Wp - k) // stride + 1
    cols = []
    for di in range(k):
        for dj in range(k):
            cols.append(
                xp[:, di:di + stride * Ho:stride, dj:dj + stride * Wo:stride, :]
            )
    p = jnp.stack(cols, axis=3)                  # (N, Ho, Wo, k*k, C)
    p = p.reshape(N * Ho * Wo, k * k * C)        # col index = (di*k + dj)*C + c
    return p, Ho, Wo


def conv_layer(x_nhwc, weight, *, stride):
    """ReflectionPad2d(k//2) + Conv2d(k, stride), channels-last.

    x_nhwc: (N, H, W, Cin_store); only the first weight.shape[1] channels are real
    (remaining stored channels are zero-padding).  weight: (Cout, Cin_real, k, k)
    in PyTorch layout.  Returns (N, Ho, Wo, CPAD) with the first Cout channels
    real and the rest exactly zero.  Conv bias is intentionally omitted: it is
    cancelled exactly by the InstanceNorm that follows every conv in forward().
    """
    Cout, cin_real, k, _ = weight.shape
    N, H, W, cin_store = x_nhwc.shape
    pad = k // 2

    xp = jnp.pad(x_nhwc, ((0, 0), (pad, pad), (pad, pad), (0, 0)), mode="reflect")
    patches, Ho, Wo = _im2col_nhwc(xp, k, stride)          # (M, k*k*cin_store)
    K0 = k * k * cin_store

    # Weight -> (k, k, cin, cout) to match the (di, dj, c) patch column order,
    # embedded into the stored (zero-padded) channel count, then zero-pad
    # K up to a multiple of 128 and Cout up to the lane-dense CPAD.
    w = jnp.transpose(weight, (2, 3, 1, 0)).astype(jnp.float32)
    if cin_store > cin_real:
        w = jnp.pad(w, ((0, 0), (0, 0), (0, cin_store - cin_real), (0, 0)))
    wmat = w.reshape(K0, Cout)
    Kp = _round_up(K0, 128)
    wmat = jnp.pad(wmat, ((0, Kp - K0), (0, CPAD - Cout)))
    patches = jnp.pad(patches.astype(jnp.float32), ((0, 0), (0, Kp - K0)))

    out = matmul_tiled(patches, wmat)                      # (M, CPAD) f32
    return out.reshape(N, Ho, Wo, CPAD)


# ----------------------------------------------------------------------------
# Model: parameters + forward
# ----------------------------------------------------------------------------
def _conv_params(key, cout, cin, k):
    # Conv bias is omitted: it is mathematically cancelled by the following
    # InstanceNorm (per-channel constant removed by the mean subtraction).
    scale = 1.0 / jnp.sqrt(cin * k * k)
    return jax.random.normal(key, (cout, cin, k, k), jnp.float32) * scale


def _in_params(key, c):
    kg, kb = jax.random.split(key)
    g = 1.0 + 0.1 * jax.random.normal(kg, (c,), jnp.float32)
    b = 0.1 * jax.random.normal(kb, (c,), jnp.float32)
    return g, b


def init_params(key):
    keys = jax.random.split(key, 16)
    p = {}
    p["conv1_w"] = _conv_params(keys[0], 32, 3, 9)
    p["in1_g"], p["in1_b"] = _in_params(keys[1], 32)
    p["conv2_w"] = _conv_params(keys[2], 64, 32, 3)
    p["in2_g"], p["in2_b"] = _in_params(keys[3], 64)
    p["conv3_w"] = _conv_params(keys[4], 128, 64, 3)
    p["in3_g"], p["in3_b"] = _in_params(keys[5], 128)
    for i in range(5):
        kk = jax.random.split(keys[6 + i], 4)
        rp = {}
        rp["conv1_w"] = _conv_params(kk[0], 128, 128, 3)
        rp["in1_g"], rp["in1_b"] = _in_params(kk[1], 128)
        rp["conv2_w"] = _conv_params(kk[2], 128, 128, 3)
        rp["in2_g"], rp["in2_b"] = _in_params(kk[3], 128)
        p[f"res{i + 1}"] = rp
    return p


def residual_block(x, rp):
    out = conv_layer(x, rp["conv1_w"], stride=1)
    out = instance_norm(out, rp["in1_g"], rp["in1_b"], relu=True)
    out = conv_layer(out, rp["conv2_w"], stride=1)
    out = instance_norm(out, rp["in2_g"], rp["in2_b"], relu=False, residual=x)
    return out


def forward(params, X):
    """X: (N, 3, H, W) float32, NCHW.  Returns (y_res3, y_res4, y_res5) in NCHW."""
    x = jnp.transpose(X, (0, 2, 3, 1)).astype(jnp.float32)       # -> NHWC once
    y = conv_layer(x, params["conv1_w"], stride=1)               # (N,H,W,128*) 32 real
    y = instance_norm(y, params["in1_g"], params["in1_b"], relu=True)
    y = conv_layer(y, params["conv2_w"], stride=2)               # (N,H/2,W/2,128*) 64 real
    y = instance_norm(y, params["in2_g"], params["in2_b"], relu=True)
    y = conv_layer(y, params["conv3_w"], stride=2)               # (N,H/4,W/4,128)
    y = instance_norm(y, params["in3_g"], params["in3_b"], relu=True)
    y = residual_block(y, params["res1"])
    y = residual_block(y, params["res2"])
    y_res3 = residual_block(y, params["res3"])
    y_res4 = residual_block(y_res3, params["res4"])
    y_res5 = residual_block(y_res4, params["res5"])
    to_nchw = lambda t: jnp.transpose(t, (0, 3, 1, 2))
    return to_nchw(y_res3), to_nchw(y_res4), to_nchw(y_res5)
    # TODO(synk): the deconv/upsample path (UpsampleConvLayer) is only used by
    # _forward(stroke_factor) in the reference module and is not implemented.


if __name__ == "__main__":
    key = jax.random.PRNGKey(0)
    kp, kx = jax.random.split(key)
    params = init_params(kp)
    X = jax.random.normal(kx, (2, 3, 16, 16), jnp.float32)   # N=2, C=3, 16x16

    y3, y4, y5 = jax.jit(forward)(params, X)
    jax.block_until_ready((y3, y4, y5))

    assert y3.shape == (2, 128, 4, 4)
    assert y4.shape == (2, 128, 4, 4)
    assert y5.shape == (2, 128, 4, 4)
    print("KERNEL_OK")
</pallas_src>

<mosaic_0001>
module attributes {stable_mosaic.version = 11 : i64} {
  func.func @_matmul_kernel(%arg0: i32, %arg1: i32, %arg2: i32, %arg3: memref<256x256xbf16, #tpu.memory_space<vmem>>, %arg4: memref<256x128xbf16, #tpu.memory_space<vmem>>, %arg5: memref<256x128xf32, #tpu.memory_space<vmem>>, %arg6: memref<256x128xf32, #tpu.memory_space<vmem>>) attributes {dimension_semantics = [#tpu.dimension_semantics<parallel>, #tpu.dimension_semantics<parallel>, #tpu.dimension_semantics<arbitrary>], iteration_bounds = array<i64: 2, 1, 1>, scalar_prefetch = 0 : i64, scratch_operands = 1 : i64, tpu.core_type = #tpu.core_type<tc>, window_params = [{transform_indices = @transform_0, window_bounds = array<i64: 256, 256>}, {transform_indices = @transform_1, window_bounds = array<i64: 256, 128>}, {transform_indices = @transform_2, window_bounds = array<i64: 256, 128>}]} {
    %c0_i32 = arith.constant 0 : i32
    %0 = arith.cmpi eq, %arg2, %c0_i32 : i32
    %1 = arith.extui %0 : i1 to i32
    %c0_i32_0 = arith.constant 0 : i32
    %2 = arith.cmpi ne, %1, %c0_i32_0 : i32
    scf.if %2 {
      %cst_10 = arith.constant 0.000000e+00 : f32
      %12 = vector.broadcast %cst_10 : f32 to vector<256x128xf32>
      %c0_11 = arith.constant 0 : index
      %c0_12 = arith.constant 0 : index
      %13 = vector.load %arg6[%c0_11, %c0_12] : memref<256x128xf32, #tpu.memory_space<vmem>>, vector<256x128xf32>
      tpu.vector_store %arg6[%c0_11, %c0_12], %12 {strides = array<i32>} : memref<256x128xf32, #tpu.memory_space<vmem>>, vector<256x128xf32>,
    } else {
    }
    %c0 = arith.constant 0 : index
    %c0_1 = arith.constant 0 : index
    %3 = vector.load %arg6[%c0, %c0_1] : memref<256x128xf32, #tpu.memory_space<vmem>>, vector<256x128xf32>
    %c0_2 = arith.constant 0 : index
    %c0_3 = arith.constant 0 : index
    %4 = vector.load %arg3[%c0_2, %c0_3] : memref<256x256xbf16, #tpu.memory_space<vmem>>, vector<256x256xbf16>
    %c0_4 = arith.constant 0 : index
    %c0_5 = arith.constant 0 : index
    %5 = vector.load %arg4[%c0_4, %c0_5] : memref<256x128xbf16, #tpu.memory_space<vmem>>, vector<256x128xbf16>
    %cst = arith.constant dense<0.000000e+00> : vector<256x128xf32>
    %6 = tpu.matmul %4, %5, %cst {dimension_numbers = #tpu.dot_dimension_numbers<[1], [0], [0], [1], [0, 0, 1, 1], [], []>} : vector<256x256xbf16>, vector<256x128xbf16>, vector<256x128xf32> -> vector<256x128xf32>
    %7 = arith.addf %3, %6 : vector<256x128xf32>
    %c0_6 = arith.constant 0 : index
    %c0_7 = arith.constant 0 : index
    %8 = vector.load %arg6[%c0_6, %c0_7] : memref<256x128xf32, #tpu.memory_space<vmem>>, vector<256x128xf32>
    tpu.vector_store %arg6[%c0_6, %c0_7], %7 {strides = array<i32>} : memref<256x128xf32, #tpu.memory_space<vmem>>, vector<256x128xf32>,
    %c0_i32_8 = arith.constant 0 : i32
    %9 = arith.cmpi eq, %arg2, %c0_i32_8 : i32
    %10 = arith.extui %9 : i1 to i32
    %c0_i32_9 = arith.constant 0 : i32
    %11 = arith.cmpi ne, %10, %c0_i32_9 : i32
    scf.if %11 {
      %c0_10 = arith.constant 0 : index
      %c0_11 = arith.constant 0 : index
      %12 = vector.load %arg6[%c0_10, %c0_11] : memref<256x128xf32, #tpu.memory_space<vmem>>, vector<256x128xf32>
      %c0_12 = arith.constant 0 : index
      %c0_13 = arith.constant 0 : index
      %13 = vector.load %arg5[%c0_12, %c0_13] : memref<256x128xf32, #tpu.memory_space<vmem>>, vector<256x128xf32>
      tpu.vector_store %arg5[%c0_12, %c0_13], %12 {strides = array<i32>} : memref<256x128xf32, #tpu.memory_space<vmem>>, vector<256x128xf32>,
    } else {
    }
    return
  }
  func.func @transform_0(%arg0: i32, %arg1: i32, %arg2: i32) -> (i32, i32) {
    %c0_i32 = arith.constant 0 : i32
    return %arg0, %arg2 : i32, i32
  }
  func.func @transform_1(%arg0: i32, %arg1: i32, %arg2: i32) -> (i32, i32) {
    %c0_i32 = arith.constant 0 : i32
    return %arg2, %arg1 : i32, i32
  }
  func.func @transform_2(%arg0: i32, %arg1: i32, %arg2: i32) -> (i32, i32) {
    %c0_i32 = arith.constant 0 : i32
    return %arg0, %arg1 : i32, i32
  }
}

module attributes {stable_mosaic.version = 11 : i64} {
  func.func @_instnorm_kernel(%arg0: i32, %arg1: memref<1x256x128xf32, #tpu.memory_space<vmem>>, %arg2: memref<1x1x128xf32, #tpu.memory_space<vmem>>, %arg3: memref<1x1x128xf32, #tpu.memory_space<vmem>>, %arg4: memref<1x256x128xf32, #tpu.memory_space<vmem>>) attributes {dimension_semantics = [#tpu.dimension_semantics<parallel>], iteration_bounds = array<i64: 2>, scalar_prefetch = 0 : i64, scratch_operands = 0 : i64, tpu.core_type = #tpu.core_type<tc>, window_params = [{transform_indices = @transform_0, window_bounds = array<i64: 1, 256, 128>}, {pipeline_mode = #tpu.pipeline_mode<synchronous>, transform_indices = @transform_1, window_bounds = array<i64: 1, 1, 128>}, {pipeline_mode = #tpu.pipeline_mode<synchronous>, transform_indices = @transform_2, window_bounds = array<i64: 1, 1, 128>}, {transform_indices = @transform_3, window_bounds = array<i64: 1, 256, 128>}]} {
    %c0 = arith.constant 0 : index
    %c0_0 = arith.constant 0 : index
    %c0_1 = arith.constant 0 : index
    %0 = vector.load %arg1[%c0, %c0_0, %c0_1] : memref<1x256x128xf32, #tpu.memory_space<vmem>>, vector<1x256x128xf32>
    %cst = arith.constant dense<0.000000e+00> : vector<1x128xf32>
    %1 = vector.multi_reduction <add>, %0, %cst [1] : vector<1x256x128xf32> to vector<1x128xf32>
    %2 = vector.shape_cast %1 : vector<1x128xf32> to vector<1x1x128xf32>
    %cst_2 = arith.constant 2.560000e+02 : f32
    %3 = vector.broadcast %cst_2 : f32 to vector<1x1x128xf32>
    %4 = arith.divf %2, %3 : vector<1x1x128xf32>
    %5 = vector.broadcast %4 : vector<1x1x128xf32> to vector<1x256x128xf32>
    %6 = arith.subf %0, %5 : vector<1x256x128xf32>
    %7 = arith.mulf %6, %6 : vector<1x256x128xf32>
    %cst_3 = arith.constant dense<0.000000e+00> : vector<1x128xf32>
    %8 = vector.multi_reduction <add>, %7, %cst_3 [1] : vector<1x256x128xf32> to vector<1x128xf32>
    %9 = vector.shape_cast %8 : vector<1x128xf32> to vector<1x1x128xf32>
    %cst_4 = arith.constant 2.560000e+02 : f32
    %10 = vector.broadcast %cst_4 : f32 to vector<1x1x128xf32>
    %11 = arith.divf %9, %10 : vector<1x1x128xf32>
    %12 = vector.broadcast %4 : vector<1x1x128xf32> to vector<1x256x128xf32>
    %13 = arith.subf %0, %12 : vector<1x256x128xf32>
    %cst_5 = arith.constant 9.99999974E-6 : f32
    %14 = vector.broadcast %cst_5 : f32 to vector<1x1x128xf32>
    %15 = arith.addf %11, %14 : vector<1x1x128xf32>
    %16 = math.rsqrt %15 : vector<1x1x128xf32>
    %17 = vector.broadcast %16 : vector<1x1x128xf32> to vector<1x256x128xf32>
    %18 = arith.mulf %13, %17 : vector<1x256x128xf32>
    %c0_6 = arith.constant 0 : index
    %c0_7 = arith.constant 0 : index
    %c0_8 = arith.constant 0 : index
    %19 = vector.load %arg2[%c0_6, %c0_7, %c0_8] : memref<1x1x128xf32, #tpu.memory_space<vmem>>, vector<1x1x128xf32>
    %20 = vector.broadcast %19 : vector<1x1x128xf32> to vector<1x256x128xf32>
    %21 = arith.mulf %18, %20 : vector<1x256x128xf32>
    %c0_9 = arith.constant 0 : index
    %c0_10 = arith.constant 0 : index
    %c0_11 = arith.constant 0 : index
    %22 = vector.load %arg3[%c0_9, %c0_10, %c0_11] : memref<1x1x128xf32, #tpu.memory_space<vmem>>, vector<1x1x128xf32>
    %23 = vector.broadcast %22 : vector<1x1x128xf32> to vector<1x256x128xf32>
    %24 = arith.addf %21, %23 : vector<1x256x128xf32>
    %cst_12 = arith.constant 0.000000e+00 : f32
    %25 = vector.broadcast %cst_12 : f32 to vector<1x256x128xf32>
    %26 = arith.maximumf %24, %25 : vector<1x256x128xf32>
    %c0_13 = arith.constant 0 : index
    %c0_14 = arith.constant 0 : index
    %c0_15 = arith.constant 0 : index
    %27 = vector.load %arg4[%c0_13, %c0_14, %c0_15] : memref<1x256x128xf32, #tpu.memory_space<vmem>>, vector<1x256x128xf32>
    tpu.vector_store %arg4[%c0_13, %c0_14, %c0_15], %26 {strides = array<i32>} : memref<1x256x128xf32, #tpu.memory_space<vmem>>, vector<1x256x128xf32>,
    return
  }
  func.func @transform_0(%arg0: i32) -> (i32, i32, i32) {
    %c0_i32 = arith.constant 0 : i32
    %c0_i32_0 = arith.constant 0 : i32
    %c0_i32_1 = arith.constant 0 : i32
    return %arg0, %c0_i32, %c0_i32_0 : i32, i32, i32
  }
  func.func @transform_1(%arg0: i32) -> (i32, i32, i32) {
    %c0_i32 = arith.constant 0 : i32
    %c0_i32_0 = arith.constant 0 : i32
    %c0_i32_1 = arith.constant 0 : i32
    %c0_i32_2 = arith.constant 0 : i32
    return %c0_i32, %c0_i32_0, %c0_i32_1 : i32, i32, i32
  }
  func.func @transform_2(%arg0: i32) -> (i32, i32, i32) {
    %c0_i32 = arith.constant 0 : i32
    %c0_i32_0 = arith.constant 0 : i32
    %c0_i32_1 = arith.constant 0 : i32
    %c0_i32_2 = arith.constant 0 : i32
    return %c0_i32, %c0_i32_0, %c0_i32_1 : i32, i32, i32
  }
  func.func @transform_3(%arg0: i32) -> (i32, i32, i32) {
    %c0_i32 = arith.constant 0 : i32
    %c0_i32_0 = arith.constant 0 : i32
    %c0_i32_1 = arith.constant 0 : i32
    return %arg0, %c0_i32, %c0_i32_0 : i32, i32, i32
  }
}

module attributes {stable_mosaic.version = 11 : i64} {
  func.func @_instnorm_kernel(%arg0: i32, %arg1: memref<1x64x128xf32, #tpu.memory_space<vmem>>, %arg2: memref<1x1x128xf32, #tpu.memory_space<vmem>>, %arg3: memref<1x1x128xf32, #tpu.memory_space<vmem>>, %arg4: memref<1x64x128xf32, #tpu.memory_space<vmem>>) attributes {dimension_semantics = [#tpu.dimension_semantics<parallel>], iteration_bounds = array<i64: 2>, scalar_prefetch = 0 : i64, scratch_operands = 0 : i64, tpu.core_type = #tpu.core_type<tc>, window_params = [{transform_indices = @transform_0, window_bounds = array<i64: 1, 64, 128>}, {pipeline_mode = #tpu.pipeline_mode<synchronous>, transform_indices = @transform_1, window_bounds = array<i64: 1, 1, 128>}, {pipeline_mode = #tpu.pipeline_mode<synchronous>, transform_indices = @transform_2, window_bounds = array<i64: 1, 1, 128>}, {transform_indices = @transform_3, window_bounds = array<i64: 1, 64, 128>}]} {
    %c0 = arith.constant 0 : index
    %c0_0 = arith.constant 0 : index
    %c0_1 = arith.constant 0 : index
    %0 = vector.load %arg1[%c0, %c0_0, %c0_1] : memref<1x64x128xf32, #tpu.memory_space<vmem>>, vector<1x64x128xf32>
    %cst = arith.constant dense<0.000000e+00> : vector<1x128xf32>
    %1 = vector.multi_reduction <add>, %0, %cst [1] : vector<1x64x128xf32> to vector<1x128xf32>
    %2 = vector.shape_cast %1 : vector<1x128xf32> to vector<1x1x128xf32>
    %cst_2 = arith.constant 6.400000e+01 : f32
    %3 = vector.broadcast %cst_2 : f32 to vector<1x1x128xf32>
    %4 = arith.divf %2, %3 : vector<1x1x128xf32>
    %5 = vector.broadcast %4 : vector<1x1x128xf32> to vector<1x64x128xf32>
    %6 = arith.subf %0, %5 : vector<1x64x128xf32>
    %7 = arith.mulf %6, %6 : vector<1x64x128xf32>
    %cst_3 = arith.constant dense<0.000000e+00> : vector<1x128xf32>
    %8 = vector.multi_reduction <add>, %7, %cst_3 [1] : vector<1x64x128xf32> to vector<1x128xf32>
    %9 = vector.shape_cast %8 : vector<1x128xf32> to vector<1x1x128xf32>
    %cst_4 = arith.constant 6.400000e+01 : f32
    %10 = vector.broadcast %cst_4 : f32 to vector<1x1x128xf32>
    %11 = arith.divf %9, %10 : vector<1x1x128xf32>
    %12 = vector.broadcast %4 : vector<1x1x128xf32> to vector<1x64x128xf32>
    %13 = arith.subf %0, %12 : vector<1x64x128xf32>
    %cst_5 = arith.constant 9.99999974E-6 : f32
    %14 = vector.broadcast %cst_5 : f32 to vector<1x1x128xf32>
    %15 = arith.addf %11, %14 : vector<1x1x128xf32>
    %16 = math.rsqrt %15 : vector<1x1x128xf32>
    %17 = vector.broadcast %16 : vector<1x1x128xf32> to vector<1x64x128xf32>
    %18 = arith.mulf %13, %17 : vector<1x64x128xf32>
    %c0_6 = arith.constant 0 : index
    %c0_7 = arith.constant 0 : index
    %c0_8 = arith.constant 0 : index
    %19 = vector.load %arg2[%c0_6, %c0_7, %c0_8] : memref<1x1x128xf32, #tpu.memory_space<vmem>>, vector<1x1x128xf32>
    %20 = vector.broadcast %19 : vector<1x1x128xf32> to vector<1x64x128xf32>
    %21 = arith.mulf %18, %20 : vector<1x64x128xf32>
    %c0_9 = arith.constant 0 : index
    %c0_10 = arith.constant 0 : index
    %c0_11 = arith.constant 0 : index
    %22 = vector.load %arg3[%c0_9, %c0_10, %c0_11] : memref<1x1x128xf32, #tpu.memory_space<vmem>>, vector<1x1x128xf32>
    %23 = vector.broadcast %22 : vector<1x1x128xf32> to vector<1x64x128xf32>
    %24 = arith.addf %21, %23 : vector<1x64x128xf32>
    %cst_12 = arith.constant 0.000000e+00 : f32
    %25 = vector.broadcast %cst_12 : f32 to vector<1x64x128xf32>
    %26 = arith.maximumf %24, %25 : vector<1x64x128xf32>
    %c0_13 = arith.constant 0 : index
    %c0_14 = arith.constant 0 : index
    %c0_15 = arith.constant 0 : index
    %27 = vector.load %arg4[%c0_13, %c0_14, %c0_15] : memref<1x64x128xf32, #tpu.memory_space<vmem>>, vector<1x64x128xf32>
    tpu.vector_store %arg4[%c0_13, %c0_14, %c0_15], %26 {strides = array<i32>} : memref<1x64x128xf32, #tpu.memory_space<vmem>>, vector<1x64x128xf32>,
    return
  }
  func.func @transform_0(%arg0: i32) -> (i32, i32, i32) {
    %c0_i32 = arith.constant 0 : i32
    %c0_i32_0 = arith.constant 0 : i32
    %c0_i32_1 = arith.constant 0 : i32
    return %arg0, %c0_i32, %c0_i32_0 : i32, i32, i32
  }
  func.func @transform_1(%arg0: i32) -> (i32, i32, i32) {
    %c0_i32 = arith.constant 0 : i32
    %c0_i32_0 = arith.constant 0 : i32
    %c0_i32_1 = arith.constant 0 : i32
    %c0_i32_2 = arith.constant 0 : i32
    return %c0_i32, %c0_i32_0, %c0_i32_1 : i32, i32, i32
  }
  func.func @transform_2(%arg0: i32) -> (i32, i32, i32) {
    %c0_i32 = arith.constant 0 : i32
    %c0_i32_0 = arith.constant 0 : i32
    %c0_i32_1 = arith.constant 0 : i32
    %c0_i32_2 = arith.constant 0 : i32
    return %c0_i32, %c0_i32_0, %c0_i32_1 : i32, i32, i32
  }
  func.func @transform_3(%arg0: i32) -> (i32, i32, i32) {
    %c0_i32 = arith.constant 0 : i32
    %c0_i32_0 = arith.constant 0 : i32
    %c0_i32_1 = arith.constant 0 : i32
    return %arg0, %c0_i32, %c0_i32_0 : i32, i32, i32
  }
}

module attributes {stable_mosaic.version = 11 : i64} {
  func.func @_matmul_kernel(%arg0: i32, %arg1: i32, %arg2: i32, %arg3: memref<128x128xbf16, #tpu.memory_space<vmem>>, %arg4: memref<128x128xbf16, #tpu.memory_space<vmem>>, %arg5: memref<128x128xf32, #tpu.memory_space<vmem>>, %arg6: memref<128x128xf32, #tpu.memory_space<vmem>>) attributes {dimension_semantics = [#tpu.dimension_semantics<parallel>, #tpu.dimension_semantics<parallel>, #tpu.dimension_semantics<arbitrary>], iteration_bounds = array<i64: 1, 1, 9>, scalar_prefetch = 0 : i64, scratch_operands = 1 : i64, tpu.core_type = #tpu.core_type<tc>, window_params = [{transform_indices = @transform_0, window_bounds = array<i64: 128, 128>}, {transform_indices = @transform_1, window_bounds = array<i64: 128, 128>}, {transform_indices = @transform_2, window_bounds = array<i64: 128, 128>}]} {
    %c0_i32 = arith.constant 0 : i32
    %0 = arith.cmpi eq, %arg2, %c0_i32 : i32
    %1 = arith.extui %0 : i1 to i32
    %c0_i32_0 = arith.constant 0 : i32
    %2 = arith.cmpi ne, %1, %c0_i32_0 : i32
    scf.if %2 {
      %cst_9 = arith.constant 0.000000e+00 : f32
      %12 = vector.broadcast %cst_9 : f32 to vector<128x128xf32>
      %c0_10 = arith.constant 0 : index
      %c0_11 = arith.constant 0 : index
      %13 = vector.load %arg6[%c0_10, %c0_11] : memref<128x128xf32, #tpu.memory_space<vmem>>, vector<128x128xf32>
      tpu.vector_store %arg6[%c0_10, %c0_11], %12 {strides = array<i32>} : memref<128x128xf32, #tpu.memory_space<vmem>>, vector<128x128xf32>,
    } else {
    }
    %c0 = arith.constant 0 : index
    %c0_1 = arith.constant 0 : index
    %3 = vector.load %arg6[%c0, %c0_1] : memref<128x128xf32, #tpu.memory_space<vmem>>, vector<128x128xf32>
    %c0_2 = arith.constant 0 : index
    %c0_3 = arith.constant 0 : index
    %4 = vector.load %arg3[%c0_2, %c0_3] : memref<128x128xbf16, #tpu.memory_space<vmem>>, vector<128x128xbf16>
    %c0_4 = arith.constant 0 : index
    %c0_5 = arith.constant 0 : index
    %5 = vector.load %arg4[%c0_4, %c0_5] : memref<128x128xbf16, #tpu.memory_space<vmem>>, vector<128x128xbf16>
    %cst = arith.constant dense<0.000000e+00> : vector<128x128xf32>
    %6 = tpu.matmul %4, %5, %cst {dimension_numbers = #tpu.dot_dimension_numbers<[1], [0], [0], [1], [0, 0, 1, 1], [], []>} : vector<128x128xbf16>, vector<128x128xbf16>, vector<128x128xf32> -> vector<128x128xf32>
    %7 = arith.addf %3, %6 : vector<128x128xf32>
    %c0_6 = arith.constant 0 : index
    %c0_7 = arith.constant 0 : index
    %8 = vector.load %arg6[%c0_6, %c0_7] : memref<128x128xf32, #tpu.memory_space<vmem>>, vector<128x128xf32>
    tpu.vector_store %arg6[%c0_6, %c0_7], %7 {strides = array<i32>} : memref<128x128xf32, #tpu.memory_space<vmem>>, vector<128x128xf32>,
    %c8_i32 = arith.constant 8 : i32
    %9 = arith.cmpi eq, %arg2, %c8_i32 : i32
    %10 = arith.extui %9 : i1 to i32
    %c0_i32_8 = arith.constant 0 : i32
    %11 = arith.cmpi ne, %10, %c0_i32_8 : i32
    scf.if %11 {
      %c0_9 = arith.constant 0 : index
      %c0_10 = arith.constant 0 : index
      %12 = vector.load %arg6[%c0_9, %c0_10] : memref<128x128xf32, #tpu.memory_space<vmem>>, vector<128x128xf32>
      %c0_11 = arith.constant 0 : index
      %c0_12 = arith.constant 0 : index
      %13 = vector.load %arg5[%c0_11, %c0_12] : memref<128x128xf32, #tpu.memory_space<vmem>>, vector<128x128xf32>
      tpu.vector_store %arg5[%c0_11, %c0_12], %12 {strides = array<i32>} : memref<128x128xf32, #tpu.memory_space<vmem>>, vector<128x128xf32>,
    } else {
    }
    return
  }
  func.func @transform_0(%arg0: i32, %arg1: i32, %arg2: i32) -> (i32, i32) {
    %c0_i32 = arith.constant 0 : i32
    return %arg0, %arg2 : i32, i32
  }
  func.func @transform_1(%arg0: i32, %arg1: i32, %arg2: i32) -> (i32, i32) {
    %c0_i32 = arith.constant 0 : i32
    return %arg2, %arg1 : i32, i32
  }
  func.func @transform_2(%arg0: i32, %arg1: i32, %arg2: i32) -> (i32, i32) {
    %c0_i32 = arith.constant 0 : i32
    return %arg0, %arg1 : i32, i32
  }
}

module attributes {stable_mosaic.version = 11 : i64} {
  func.func @_instnorm_kernel(%arg0: i32, %arg1: memref<1x16x128xf32, #tpu.memory_space<vmem>>, %arg2: memref<1x1x128xf32, #tpu.memory_space<vmem>>, %arg3: memref<1x1x128xf32, #tpu.memory_space<vmem>>, %arg4: memref<1x16x128xf32, #tpu.memory_space<vmem>>) attributes {dimension_semantics = [#tpu.dimension_semantics<parallel>], iteration_bounds = array<i64: 2>, scalar_prefetch = 0 : i64, scratch_operands = 0 : i64, tpu.core_type = #tpu.core_type<tc>, window_params = [{transform_indices = @transform_0, window_bounds = array<i64: 1, 16, 128>}, {pipeline_mode = #tpu.pipeline_mode<synchronous>, transform_indices = @transform_1, window_bounds = array<i64: 1, 1, 128>}, {pipeline_mode = #tpu.pipeline_mode<synchronous>, transform_indices = @transform_2, window_bounds = array<i64: 1, 1, 128>}, {transform_indices = @transform_3, window_bounds = array<i64: 1, 16, 128>}]} {
    %c0 = arith.constant 0 : index
    %c0_0 = arith.constant 0 : index
    %c0_1 = arith.constant 0 : index
    %0 = vector.load %arg1[%c0, %c0_0, %c0_1] : memref<1x16x128xf32, #tpu.memory_space<vmem>>, vector<1x16x128xf32>
    %cst = arith.constant dense<0.000000e+00> : vector<1x128xf32>
    %1 = vector.multi_reduction <add>, %0, %cst [1] : vector<1x16x128xf32> to vector<1x128xf32>
    %2 = vector.shape_cast %1 : vector<1x128xf32> to vector<1x1x128xf32>
    %cst_2 = arith.constant 1.600000e+01 : f32
    %3 = vector.broadcast %cst_2 : f32 to vector<1x1x128xf32>
    %4 = arith.divf %2, %3 : vector<1x1x128xf32>
    %5 = vector.broadcast %4 : vector<1x1x128xf32> to vector<1x16x128xf32>
    %6 = arith.subf %0, %5 : vector<1x16x128xf32>
    %7 = arith.mulf %6, %6 : vector<1x16x128xf32>
    %cst_3 = arith.constant dense<0.000000e+00> : vector<1x128xf32>
    %8 = vector.multi_reduction <add>, %7, %cst_3 [1] : vector<1x16x128xf32> to vector<1x128xf32>
    %9 = vector.shape_cast %8 : vector<1x128xf32> to vector<1x1x128xf32>
    %cst_4 = arith.constant 1.600000e+01 : f32
    %10 = vector.broadcast %cst_4 : f32 to vector<1x1x128xf32>
    %11 = arith.divf %9, %10 : vector<1x1x128xf32>
    %12 = vector.broadcast %4 : vector<1x1x128xf32> to vector<1x16x128xf32>
    %13 = arith.subf %0, %12 : vector<1x16x128xf32>
    %cst_5 = arith.constant 9.99999974E-6 : f32
    %14 = vector.broadcast %cst_5 : f32 to vector<1x1x128xf32>
    %15 = arith.addf %11, %14 : vector<1x1x128xf32>
    %16 = math.rsqrt %15 : vector<1x1x128xf32>
    %17 = vector.broadcast %16 : vector<1x1x128xf32> to vector<1x16x128xf32>
    %18 = arith.mulf %13, %17 : vector<1x16x128xf32>
    %c0_6 = arith.constant 0 : index
    %c0_7 = arith.constant 0 : index
    %c0_8 = arith.constant 0 : index
    %19 = vector.load %arg2[%c0_6, %c0_7, %c0_8] : memref<1x1x128xf32, #tpu.memory_space<vmem>>, vector<1x1x128xf32>
    %20 = vector.broadcast %19 : vector<1x1x128xf32> to vector<1x16x128xf32>
    %21 = arith.mulf %18, %20 : vector<1x16x128xf32>
    %c0_9 = arith.constant 0 : index
    %c0_10 = arith.constant 0 : index
    %c0_11 = arith.constant 0 : index
    %22 = vector.load %arg3[%c0_9, %c0_10, %c0_11] : memref<1x1x128xf32, #tpu.memory_space<vmem>>, vector<1x1x128xf32>
    %23 = vector.broadcast %22 : vector<1x1x128xf32> to vector<1x16x128xf32>
    %24 = arith.addf %21, %23 : vector<1x16x128xf32>
    %cst_12 = arith.constant 0.000000e+00 : f32
    %25 = vector.broadcast %cst_12 : f32 to vector<1x16x128xf32>
    %26 = arith.maximumf %24, %25 : vector<1x16x128xf32>
    %c0_13 = arith.constant 0 : index
    %c0_14 = arith.constant 0 : index
    %c0_15 = arith.constant 0 : index
    %27 = vector.load %arg4[%c0_13, %c0_14, %c0_15] : memref<1x16x128xf32, #tpu.memory_space<vmem>>, vector<1x16x128xf32>
    tpu.vector_store %arg4[%c0_13, %c0_14, %c0_15], %26 {strides = array<i32>} : memref<1x16x128xf32, #tpu.memory_space<vmem>>, vector<1x16x128xf32>,
    return
  }
  func.func @transform_0(%arg0: i32) -> (i32, i32, i32) {
    %c0_i32 = arith.constant 0 : i32
    %c0_i32_0 = arith.constant 0 : i32
    %c0_i32_1 = arith.constant 0 : i32
    return %arg0, %c0_i32, %c0_i32_0 : i32, i32, i32
  }
  func.func @transform_1(%arg0: i32) -> (i32, i32, i32) {
    %c0_i32 = arith.constant 0 : i32
    %c0_i32_0 = arith.constant 0 : i32
    %c0_i32_1 = arith.constant 0 : i32
    %c0_i32_2 = arith.constant 0 : i32
    return %c0_i32, %c0_i32_0, %c0_i32_1 : i32, i32, i32
  }
  func.func @transform_2(%arg0: i32) -> (i32, i32, i32) {
    %c0_i32 = arith.constant 0 : i32
    %c0_i32_0 = arith.constant 0 : i32
    %c0_i32_1 = arith.constant 0 : i32
    %c0_i32_2 = arith.constant 0 : i32
    return %c0_i32, %c0_i32_0, %c0_i32_1 : i32, i32, i32
  }
  func.func @transform_3(%arg0: i32) -> (i32, i32, i32) {
    %c0_i32 = arith.constant 0 : i32
    %c0_i32_0 = arith.constant 0 : i32
    %c0_i32_1 = arith.constant 0 : i32
    return %arg0, %c0_i32, %c0_i32_0 : i32, i32, i32
  }
}

module attributes {stable_mosaic.version = 11 : i64} {
  func.func @_matmul_kernel(%arg0: i32, %arg1: i32, %arg2: i32, %arg3: memref<32x128xbf16, #tpu.memory_space<vmem>>, %arg4: memref<128x128xbf16, #tpu.memory_space<vmem>>, %arg5: memref<32x128xf32, #tpu.memory_space<vmem>>, %arg6: memref<32x128xf32, #tpu.memory_space<vmem>>) attributes {dimension_semantics = [#tpu.dimension_semantics<parallel>, #tpu.dimension_semantics<parallel>, #tpu.dimension_semantics<arbitrary>], iteration_bounds = array<i64: 1, 1, 9>, scalar_prefetch = 0 : i64, scratch_operands = 1 : i64, tpu.core_type = #tpu.core_type<tc>, window_params = [{transform_indices = @transform_0, window_bounds = array<i64: 32, 128>}, {transform_indices = @transform_1, window_bounds = array<i64: 128, 128>}, {transform_indices = @transform_2, window_bounds = array<i64: 32, 128>}]} {
    %c0_i32 = arith.constant 0 : i32
    %0 = arith.cmpi eq, %arg2, %c0_i32 : i32
    %1 = arith.extui %0 : i1 to i32
    %c0_i32_0 = arith.constant 0 : i32
    %2 = arith.cmpi ne, %1, %c0_i32_0 : i32
    scf.if %2 {
      %cst_9 = arith.constant 0.000000e+00 : f32
      %12 = vector.broadcast %cst_9 : f32 to vector<32x128xf32>
      %c0_10 = arith.constant 0 : index
      %c0_11 = arith.constant 0 : index
      %13 = vector.load %arg6[%c0_10, %c0_11] : memref<32x128xf32, #tpu.memory_space<vmem>>, vector<32x128xf32>
      tpu.vector_store %arg6[%c0_10, %c0_11], %12 {strides = array<i32>} : memref<32x128xf32, #tpu.memory_space<vmem>>, vector<32x128xf32>,
    } else {
    }
    %c0 = arith.constant 0 : index
    %c0_1 = arith.constant 0 : index
    %3 = vector.load %arg6[%c0, %c0_1] : memref<32x128xf32, #tpu.memory_space<vmem>>, vector<32x128xf32>
    %c0_2 = arith.constant 0 : index
    %c0_3 = arith.constant 0 : index
    %4 = vector.load %arg3[%c0_2, %c0_3] : memref<32x128xbf16, #tpu.memory_space<vmem>>, vector<32x128xbf16>
    %c0_4 = arith.constant 0 : index
    %c0_5 = arith.constant 0 : index
    %5 = vector.load %arg4[%c0_4, %c0_5] : memref<128x128xbf16, #tpu.memory_space<vmem>>, vector<128x128xbf16>
    %cst = arith.constant dense<0.000000e+00> : vector<32x128xf32>
    %6 = tpu.matmul %4, %5, %cst {dimension_numbers = #tpu.dot_dimension_numbers<[1], [0], [0], [1], [0, 0, 1, 1], [], []>} : vector<32x128xbf16>, vector<128x128xbf16>, vector<32x128xf32> -> vector<32x128xf32>
    %7 = arith.addf %3, %6 : vector<32x128xf32>
    %c0_6 = arith.constant 0 : index
    %c0_7 = arith.constant 0 : index
    %8 = vector.load %arg6[%c0_6, %c0_7] : memref<32x128xf32, #tpu.memory_space<vmem>>, vector<32x128xf32>
    tpu.vector_store %arg6[%c0_6, %c0_7], %7 {strides = array<i32>} : memref<32x128xf32, #tpu.memory_space<vmem>>, vector<32x128xf32>,
    %c8_i32 = arith.constant 8 : i32
    %9 = arith.cmpi eq, %arg2, %c8_i32 : i32
    %10 = arith.extui %9 : i1 to i32
    %c0_i32_8 = arith.constant 0 : i32
    %11 = arith.cmpi ne, %10, %c0_i32_8 : i32
    scf.if %11 {
      %c0_9 = arith.constant 0 : index
      %c0_10 = arith.constant 0 : index
      %12 = vector.load %arg6[%c0_9, %c0_10] : memref<32x128xf32, #tpu.memory_space<vmem>>, vector<32x128xf32>
      %c0_11 = arith.constant 0 : index
      %c0_12 = arith.constant 0 : index
      %13 = vector.load %arg5[%c0_11, %c0_12] : memref<32x128xf32, #tpu.memory_space<vmem>>, vector<32x128xf32>
      tpu.vector_store %arg5[%c0_11, %c0_12], %12 {strides = array<i32>} : memref<32x128xf32, #tpu.memory_space<vmem>>, vector<32x128xf32>,
    } else {
    }
    return
  }
  func.func @transform_0(%arg0: i32, %arg1: i32, %arg2: i32) -> (i32, i32) {
    %c0_i32 = arith.constant 0 : i32
    return %arg0, %arg2 : i32, i32
  }
  func.func @transform_1(%arg0: i32, %arg1: i32, %arg2: i32) -> (i32, i32) {
    %c0_i32 = arith.constant 0 : i32
    return %arg2, %arg1 : i32, i32
  }
  func.func @transform_2(%arg0: i32, %arg1: i32, %arg2: i32) -> (i32, i32) {
    %c0_i32 = arith.constant 0 : i32
    return %arg0, %arg1 : i32, i32
  }
}

module attributes {stable_mosaic.version = 11 : i64} {
  func.func @_instnorm_kernel(%arg0: i32, %arg1: memref<1x16x128xf32, #tpu.memory_space<vmem>>, %arg2: memref<1x1x128xf32, #tpu.memory_space<vmem>>, %arg3: memref<1x1x128xf32, #tpu.memory_space<vmem>>, %arg4: memref<1x16x128xf32, #tpu.memory_space<vmem>>, %arg5: memref<1x16x128xf32, #tpu.memory_space<vmem>>) attributes {dimension_semantics = [#tpu.dimension_semantics<parallel>], iteration_bounds = array<i64: 2>, scalar_prefetch = 0 : i64, scratch_operands = 0 : i64, tpu.core_type = #tpu.core_type<tc>, window_params = [{transform_indices = @transform_0, window_bounds = array<i64: 1, 16, 128>}, {pipeline_mode = #tpu.pipeline_mode<synchronous>, transform_indices = @transform_1, window_bounds = array<i64: 1, 1, 128>}, {pipeline_mode = #tpu.pipeline_mode<synchronous>, transform_indices = @transform_2, window_bounds = array<i64: 1, 1, 128>}, {transform_indices = @transform_3, window_bounds = array<i64: 1, 16, 128>}, {transform_indices = @transform_4, window_bounds = array<i64: 1, 16, 128>}]} {
    %c0 = arith.constant 0 : index
    %c0_0 = arith.constant 0 : index
    %c0_1 = arith.constant 0 : index
    %0 = vector.load %arg1[%c0, %c0_0, %c0_1] : memref<1x16x128xf32, #tpu.memory_space<vmem>>, vector<1x16x128xf32>
    %cst = arith.constant dense<0.000000e+00> : vector<1x128xf32>
    %1 = vector.multi_reduction <add>, %0, %cst [1] : vector<1x16x128xf32> to vector<1x128xf32>
    %2 = vector.shape_cast %1 : vector<1x128xf32> to vector<1x1x128xf32>
    %cst_2 = arith.constant 1.600000e+01 : f32
    %3 = vector.broadcast %cst_2 : f32 to vector<1x1x128xf32>
    %4 = arith.divf %2, %3 : vector<1x1x128xf32>
    %5 = vector.broadcast %4 : vector<1x1x128xf32> to vector<1x16x128xf32>
    %6 = arith.subf %0, %5 : vector<1x16x128xf32>
    %7 = arith.mulf %6, %6 : vector<1x16x128xf32>
    %cst_3 = arith.constant dense<0.000000e+00> : vector<1x128xf32>
    %8 = vector.multi_reduction <add>, %7, %cst_3 [1] : vector<1x16x128xf32> to vector<1x128xf32>
    %9 = vector.shape_cast %8 : vector<1x128xf32> to vector<1x1x128xf32>
    %cst_4 = arith.constant 1.600000e+01 : f32
    %10 = vector.broadcast %cst_4 : f32 to vector<1x1x128xf32>
    %11 = arith.divf %9, %10 : vector<1x1x128xf32>
    %12 = vector.broadcast %4 : vector<1x1x128xf32> to vector<1x16x128xf32>
    %13 = arith.subf %0, %12 : vector<1x16x128xf32>
    %cst_5 = arith.constant 9.99999974E-6 : f32
    %14 = vector.broadcast %cst_5 : f32 to vector<1x1x128xf32>
    %15 = arith.addf %11, %14 : vector<1x1x128xf32>
    %16 = math.rsqrt %15 : vector<1x1x128xf32>
    %17 = vector.broadcast %16 : vector<1x1x128xf32> to vector<1x16x128xf32>
    %18 = arith.mulf %13, %17 : vector<1x16x128xf32>
    %c0_6 = arith.constant 0 : index
    %c0_7 = arith.constant 0 : index
    %c0_8 = arith.constant 0 : index
    %19 = vector.load %arg2[%c0_6, %c0_7, %c0_8] : memref<1x1x128xf32, #tpu.memory_space<vmem>>, vector<1x1x128xf32>
    %20 = vector.broadcast %19 : vector<1x1x128xf32> to vector<1x16x128xf32>
    %21 = arith.mulf %18, %20 : vector<1x16x128xf32>
    %c0_9 = arith.constant 0 : index
    %c0_10 = arith.constant 0 : index
    %c0_11 = arith.constant 0 : index
    %22 = vector.load %arg3[%c0_9, %c0_10, %c0_11] : memref<1x1x128xf32, #tpu.memory_space<vmem>>, vector<1x1x128xf32>
    %23 = vector.broadcast %22 : vector<1x1x128xf32> to vector<1x16x128xf32>
    %24 = arith.addf %21, %23 : vector<1x16x128xf32>
    %c0_12 = arith.constant 0 : index
    %c0_13 = arith.constant 0 : index
    %c0_14 = arith.constant 0 : index
    %25 = vector.load %arg4[%c0_12, %c0_13, %c0_14] : memref<1x16x128xf32, #tpu.memory_space<vmem>>, vector<1x16x128xf32>
    %26 = arith.addf %24, %25 : vector<1x16x128xf32>
    %c0_15 = arith.constant 0 : index
    %c0_16 = arith.constant 0 : index
    %c0_17 = arith.constant 0 : index
    %27 = vector.load %arg5[%c0_15, %c0_16, %c0_17] : memref<1x16x128xf32, #tpu.memory_space<vmem>>, vector<1x16x128xf32>
    tpu.vector_store %arg5[%c0_15, %c0_16, %c0_17], %26 {strides = array<i32>} : memref<1x16x128xf32, #tpu.memory_space<vmem>>, vector<1x16x128xf32>,
    return
  }
  func.func @transform_0(%arg0: i32) -> (i32, i32, i32) {
    %c0_i32 = arith.constant 0 : i32
    %c0_i32_0 = arith.constant 0 : i32
    %c0_i32_1 = arith.constant 0 : i32
    return %arg0, %c0_i32, %c0_i32_0 : i32, i32, i32
  }
  func.func @transform_1(%arg0: i32) -> (i32, i32, i32) {
    %c0_i32 = arith.constant 0 : i32
    %c0_i32_0 = arith.constant 0 : i32
    %c0_i32_1 = arith.constant 0 : i32
    %c0_i32_2 = arith.constant 0 : i32
    return %c0_i32, %c0_i32_0, %c0_i32_1 : i32, i32, i32
  }
  func.func @transform_2(%arg0: i32) -> (i32, i32, i32) {
    %c0_i32 = arith.constant 0 : i32
    %c0_i32_0 = arith.constant 0 : i32
    %c0_i32_1 = arith.constant 0 : i32
    %c0_i32_2 = arith.constant 0 : i32
    return %c0_i32, %c0_i32_0, %c0_i32_1 : i32, i32, i32
  }
  func.func @transform_3(%arg0: i32) -> (i32, i32, i32) {
    %c0_i32 = arith.constant 0 : i32
    %c0_i32_0 = arith.constant 0 : i32
    %c0_i32_1 = arith.constant 0 : i32
    return %arg0, %c0_i32, %c0_i32_0 : i32, i32, i32
  }
  func.func @transform_4(%arg0: i32) -> (i32, i32, i32) {
    %c0_i32 = arith.constant 0 : i32
    %c0_i32_0 = arith.constant 0 : i32
    %c0_i32_1 = arith.constant 0 : i32
    return %arg0, %c0_i32, %c0_i32_0 : i32, i32, i32
  }
}

</mosaic_0001>

<bundles_post_ra>
// kernel: forward.27
= control target key start
LH: loop header
LB: loop body
LE: loop exit
PB: predicated region body
PF: predicated region fallthrough
CT: control target
= control target key end

     0   :  { %8 = vsyncpa [#allocation3], 0  ;;  %s1679_s0 = inlined_call_operand.hbm [shape: f32[2,256,128], index: 0, kind: input, shape index: {}]   ;;  %s1680_s1 = inlined_call_operand.hbm [shape: f32[1,1,128], index: 1, kind: input, shape index: {}]   ;;  %s1681_s2 = inlined_call_operand.hbm [shape: f32[1,1,128], index: 2, kind: input, shape index: {}]   ;;  %s1682_s3 = inlined_call_operand.hbm [shape: f32[2,256,128], index: 3, kind: output, shape index: {}]  }
   0x1   :  { %10 = vsyncpa [#allocation3 + $0x1], 0 }
   0x2   :  { %11 = vsyncpa [#allocation6], 0 }
   0x3   :  { %12 = vsyncpa [#allocation4], 0 }
   0x4   :  { %14 = vsyncpa [#allocation4 + $0x1], 0  ;;  %s950_s12 = smov 0   ;;  %s952_s13 = smov 0  }
   0x5   :  { %s954_s14 = smov 0   ;;  %s956_s15 = smov 0  }
   0x6 LB: > { %s971_s16 = sadd.s32 4294967295, %s920_s15   ;;  %s669_s17 = sadd.s32 4294967294, %s920_s15   ;;  %s920_s15 = sphi %s956_s15, %s1707_s15   ;;  %s916_s14 = sphi %s954_s14, %s1706_s14   ;;  %s912_s13 = sphi %s952_s13, %s1705_s13   ;;  %s908_s12 = sphi %s950_s12, %s1704_s12  }
   0x7   : > { %s975_s18 = sadd.s32 1, %s920_s15   ;;  %s27_s19 = sadd.s32 1, %s916_s14 }
   0x8   : > { %s24_s20 = ssub.s32 %s920_s15, %s975_s18  ;;  %p34_p0 = scmp.ne.s32.totalorder %s916_s14, %s912_s13 }
   0x9   : > { %p25_p1 = scmp.eq.s32.totalorder %s24_s20, 0  ;;  %p35_p2 = scmp.eq.s32.totalorder %s920_s15, 0 }
   0xa   : > { %p40_p3 = scmp.ne.s32.totalorder %s912_s13, %s908_s12  ;;  %p1683_p4 = scmp.eq.s32.totalorder %s971_s16, 0 }
   0xb   : > { %s987_s21 = scalar_select %p25_p1, %s916_s14, %s27_s19  }
   0xc   : > { %p989_p5 = por %p35_p2, %p34_p0  ;;  %p995_p6 = por %p1683_p4, %p40_p3 }
   0xd   : > { %p106_p7 = scmp.eq.s32.totalorder %s971_s16, 1  ;;  %p112_p8 = scmp.eq.s32.totalorder %s669_s17, 1 }
   0xe   : > { %s1689_s23 = scalar_select %p995_p6, 1, 0 }
   0xf   : > { %p670_p9 = scmp.ge.s32.totalorder %s920_s15, 1  ;;  %p119_p10 = scmp.lt.s32.totalorder %s920_s15, 3 }
  0x10   : > { %p1002_p11 = por %p106_p7, %p34_p0  ;;  %p1006_p12 = por %p112_p8, %p40_p3 }
  0x11   : > { %p1010_p13 = pnand %p670_p9, %p119_p10  ;;  %s922_s27 = smov [#allocation5]  }
  0x12   : > { %s1690_s24 = scalar_select %p1002_p11, 1, 0 }
  0x13   : > { %s1691_s25 = scalar_select %p1006_p12, 1, 0 }
  0x14   : > { %s1692_s26 = scalar_select %p1010_p13, 1, 0 }
  0x15   : > { %p703_p2 = pneg %p1010_p13  ;;  %s132_s28 = sshll.u32 %s922_s27, 4  ;;  %s133_s28 = int_to_ptr.vmem [resolvable:$true] %s132_s28 }
  0x16   : > { %p720_p4 = scmp.lt.s32.totalorder %s920_s15, 2  ;;  %p1693_p0 = scmp.eq.s32.totalorder %s971_s16, 0 }
  0x17   : > { %s923_s4 = smov [#allocation7]   ;;  %s764_s8 = scalar_lea.hbm %s1680_s1, 16 }
  0x18   : > { %p1020_p7 = pnand %p703_p2, %p1693_p0  ;;  %p1026_p3 = pnand %p720_p4, %p989_p5 }
  0x19   : > { %s143_s5 = sshll.u32 %s923_s4, 4  ;;  %p765_p8 = scmp.ne.s32.totalorder %s1680_s1, %s764_s8  ;;  %s1030_s5 = int_to_ptr.vmem [resolvable:$true] %s143_s5 }
  0x1a   : > { %s1695_s30 = scalar_select %p1026_p3, 1, 0 }
  0x1b   : > { %p766_p9 = pneg %p1020_p7  ;;  %p771_p10 = scmp.lt.u32.totalorder %s764_s8, %s1680_s1 }
  0x1d   : > { %p767_p4 = pnand %p766_p9, %p765_p8 }
  0x1f   : > { %p768_p5 = pneg %p767_p4 }
  0x21   : > { %p773_p2 = pnand %p771_p10, %p768_p5 }
  0x23   : > { %776 = shalt.err (!%p773_p2)
}
  0x24   : > { %s777_s19 = scalar_lea.vmem %s133_s28, 16  ;;  %s784_s20 = scalar_lea.vmem %s133_s28, 32 }
  0x25   : > { %p778_p0 = scmp.ne.s32.totalorder %s133_s28, %s777_s19  ;;  %p785_p11 = scmp.lt.s32.totalorder %s133_s28, %s133_s28 }
  0x26   : > { %p786_p6 = scmp.lt.s32.totalorder %s784_s20, %s777_s19 }
  0x27   : > { %p780_p1 = pnand %p778_p0, %p766_p9 }
  0x28   : > { %p787_p13 = por %p786_p6, %p785_p11 }
  0x29   : > { %p781_p12 = pneg %p780_p1 }
  0x2b   : > { %p788_p3 = pnand %p787_p13, %p781_p12 }
  0x2d   : > { %791 = shalt.err (!%p788_p3)
}
  0x2e   : > { %706 = dma.hbm_to_vmem [thread:$0]  (!%p1020_p7), %s1680_s1, 16, %s133_s28, [#allocation6]  }
  0x2f   : > { %s154_s4 = sand.u32 1, %s916_s14   ;;  %s792_s8 = scalar_lea.hbm %s1681_s2, 16 }
  0x30   : > { %p793_p1 = scmp.ne.s32.totalorder %s1681_s2, %s792_s8  ;;  %p799_p12 = scmp.lt.u32.totalorder %s792_s8, %s1681_s2 }
  0x32   : > { %p795_p6 = pnand %p793_p1, %p766_p9 }
  0x34   : > { %p796_p11 = pneg %p795_p6 }
  0x36   : > { %p801_p13 = pnand %p799_p12, %p796_p11 }
  0x38   : > { %804 = shalt.err (!%p801_p13)
}
  0x39   : > { %s805_s28 = scalar_lea.vmem %s1030_s5, 16  ;;  %s812_s19 = scalar_lea.vmem %s1030_s5, 32 }
  0x3a   : > { %p806_p3 = scmp.ne.s32.totalorder %s1030_s5, %s805_s28  ;;  %p813_p5 = scmp.lt.s32.totalorder %s1030_s5, %s1030_s5 }
  0x3b   : > { %p814_p10 = scmp.lt.s32.totalorder %s812_s19, %s805_s28 }
  0x3c   : > { %p808_p8 = pnand %p806_p3, %p766_p9 }
  0x3d   : > { %p815_p2 = por %p814_p10, %p813_p5 }
  0x3e   : > { %p809_p4 = pneg %p808_p8 }
  0x40   : > { %p816_p0 = pnand %p815_p2, %p809_p4 }
  0x42   : > { %819 = shalt.err (!%p816_p0)
}
  0x43   : > { %709 = dma.hbm_to_vmem [thread:$0]  (!%p1020_p7), %s1681_s2, 16, %s1030_s5, [#allocation6]  }
  0x44   : > { %s674_s27 = sshll.u32 %s154_s4, 8  ;;  %s689_s6 = sshll.u32 %s920_s15, 12 }
  0x45   : > { %s1085_s9 = scalar_lea.hbm %s1679_s0, %s689_s6  ;;  %s158_s29 = scalar_lea.vmem [#allocation2], %s674_s27 }
  0x46   : > { %s165_s10 = sshll.u32 %s158_s29, 4  ;;  %s1089_s11 = scalar_lea.sflag [#allocation3], %s154_s4  ;;  %s1087_s10 = int_to_ptr.vmem [resolvable:$true] %s165_s10 }
  0x47   : > { %s820_s17 = scalar_lea.hbm %s1085_s9, 4096  ;;  %p1696_p7 = scmp.ne.s32.totalorder %s1695_s30, 0 }
  0x48   : > { %p821_p9 = scmp.ne.s32.totalorder %s1085_s9, %s820_s17  ;;  %s825_s19 = scalar_lea.hbm %s1679_s0, 8192 }
  0x49   : > { %p822_p1 = pneg %p1696_p7  ;;  %p826_p12 = scmp.lt.u32.totalorder %s1085_s9, %s1679_s0 }
  0x4a   : > { %p827_p13 = scmp.lt.u32.totalorder %s825_s19, %s820_s17  ;;  %p829_p8 = scmp.lt.u32.totalorder %s820_s17, %s1085_s9 }
  0x4b   : > { %p823_p6 = pnand %p822_p1, %p821_p9 }
  0x4c   : > { %p828_p3 = por %p827_p13, %p826_p12 }
  0x4d   : > { %p824_p11 = pneg %p823_p6 }
  0x4e   : > { %p830_p4 = por %p829_p8, %p828_p3 }
  0x50   : > { %p831_p5 = pnand %p830_p4, %p824_p11 }
  0x52   : > { %834 = shalt.err (!%p831_p5)
}
  0x53   : > { %s835_s4 = scalar_lea.vmem %s1087_s10, 4096  ;;  %s924_s27 = smov [#allocation2]  }
  0x54   : > { %p836_p10 = scmp.ne.s32.totalorder %s1087_s10, %s835_s4  ;;  %s840_s6 = sshll.u32 %s924_s27, 4  ;;  %s841_s6 = int_to_ptr.vmem [resolvable:$false] %s840_s6 }
  0x55   : > { %s842_s7 = scalar_lea.vmem %s841_s6, 8192  ;;  %p843_p9 = scmp.lt.s32.totalorder %s1087_s10, %s841_s6 }
  0x56   : > { %p838_p2 = pnand %p836_p10, %p822_p1  ;;  %p844_p6 = scmp.lt.s32.totalorder %s842_s7, %s835_s4 }
  0x58   : > { %p839_p0 = pneg %p838_p2  ;;  %p845_p12 = por %p844_p6, %p843_p9 }
  0x5a   : > { %p846_p13 = pnand %p845_p12, %p839_p0 }
  0x5c   : > { %849 = shalt.err (!%p846_p13)
}
  0x5d   : > { %s925_s8 = smov 128   ;;  %s926_s29 = smov 8  }
  0x5e   : > { %713 = dma.hbm_to_vmem [thread:$0]  (!%p1696_p7), %s1085_s9, 4096, %s1087_s10, %s1089_s11, %s925_s8, %s925_s8, %s926_s29  }
  0x5f   : > { %p1697_p1 = scmp.ne.s32.totalorder %s1692_s26, 0 }
  0x60   : > { %s1120_s17 = sand.u32 (!%p1697_p1), 1, %s912_s13   ;;  %p1698_p11 = scmp.ne.s32.totalorder (!%p1697_p1), %s1689_s23, 0 }
  0x61   : > { %177 = sbr.rel (%p1697_p1) target bundleno = 331 (0x14b), region = 32  ;;  %s678_s5 = sshll.u32 (!%p1697_p1), %s1120_s17, 8 }
  0x62   : > { %s180_s28 = scalar_lea.sflag (!%p1697_p1), [#allocation3], %s1120_s17  ;;  %s1126_s19 = scalar_lea.vmem (!%p1697_p1), [#allocation2], %s678_s5 }
  0x68   : > { %895 = dma.done.wait (%p1698_p11), %s180_s28, 4096  }
  0x69   : > { %897 = vsyncadd (%p1698_p11), %s180_s28, 4294963200  ;;  %p1699_p7 = scmp.eq.s32.totalorder %s971_s16, 0 }
  0x6b   : > { %899 = dma.done.wait (%p1699_p7), [#allocation6], 32   ;;  %p1700_p3 = pmov %p1699_p7 }
  0x6c   : > { %v1137_v0 = vld [vmem:[%s1126_s19] sm:$0xff]  ;;  %v1140_v1 = vld [vmem:[%s1126_s19 + $0x8] sm:$0xff]  ;;  %v1143_v2 = vld [vmem:[%s1126_s19 + $0x10] sm:$0xff]  ;;  %s1498_s23 = scalar_lea.vmem [#allocation8], %s678_s5  ;;  %s690_s26 = sshll.u32 %s971_s16, 12 }
  0x6d   : > { %901 = vsyncadd (%p1700_p3), [#allocation6], 4294967264  ;;  %v246_v3 = vadd.f32 %v1140_v1, %v1137_v0  ;;  %v1148_v4 = vld [vmem:[%s1126_s19 + $0x18] sm:$0xff]  ;;  %v1152_v6 = vld [vmem:[%s1126_s19 + $0x20] sm:$0xff]  ;;  %s577_s30 = sshll.u32 %s1498_s23, 4  ;;  %s1625_s10 = scalar_lea.hbm %s1682_s3, %s690_s26  ;;  %s1627_s30 = int_to_ptr.vmem [resolvable:$true] %s577_s30 }
  0x6e   : > { %v1156_v8 = vld [vmem:[%s1126_s19 + $0x28] sm:$0xff]  ;;  %v1160_v10 = vld [vmem:[%s1126_s19 + $0x30] sm:$0xff]  ;;  %v1164_v12 = vld [vmem:[%s1126_s19 + $0x38] sm:$0xff]  ;;  %s564_s11 = scalar_lea.sflag [#allocation4], %s1120_s17  ;;  %s850_s20 = scalar_lea.vmem %s1627_s30, 4096 }
  0x6f   : > { %v247_v5 = vadd.f32 %v246_v3, %v1143_v2  ;;  %v1168_v14 = vld [vmem:[%s1126_s19 + $0x40] sm:$0xff]  ;;  %v1172_v16 = vld [vmem:[%s1126_s19 + $0x48] sm:$0xff]  ;;  %v1176_v18 = vld [vmem:[%s1126_s19 + $0x50] sm:$0xff]  ;;  %p851_p8 = scmp.ne.s32.totalorder %s1627_s30, %s850_s20  ;;  %p1701_p4 = scmp.ne.s32.totalorder %s1690_s24, 0 }
  0x70   : > { %v1180_v20 = vld [vmem:[%s1126_s19 + $0x58] sm:$0xff]  ;;  %v1184_v22 = vld [vmem:[%s1126_s19 + $0x60] sm:$0xff]  ;;  %v1188_v24 = vld [vmem:[%s1126_s19 + $0x68] sm:$0xff]  ;;  %s927_s22 = smov [#allocation8]  }
  0x71   : > { %v248_v7 = vadd.f32 %v247_v5, %v1148_v4  ;;  %v1192_v26 = vld [vmem:[%s1126_s19 + $0x70] sm:$0xff]  ;;  %v1196_v28 = vld [vmem:[%s1126_s19 + $0x78] sm:$0xff]  ;;  %v1200_v30 = vld [vmem:[%s1126_s19 + $0x80] sm:$0xff]  ;;  %p852_p5 = pnand %p851_p8, %p1701_p4  ;;  %s854_s4 = sshll.u32 %s927_s22, 4  ;;  %s855_s4 = int_to_ptr.vmem [resolvable:$false] %s854_s4 }
  0x72   : > { %v1204_v32 = vld [vmem:[%s1126_s19 + $0x88] sm:$0xff]  ;;  %v1208_v34 = vld [vmem:[%s1126_s19 + $0x90] sm:$0xff]  ;;  %v1212_v36 = vld [vmem:[%s1126_s19 + $0x98] sm:$0xff]  ;;  %s856_s27 = scalar_lea.vmem %s855_s4, 8192  ;;  %p857_p2 = scmp.lt.s32.totalorder %s1627_s30, %s855_s4 }
  0x73   : > { %v249_v9 = vadd.f32 %v248_v7, %v1152_v6  ;;  %v1216_v38 = vld [vmem:[%s1126_s19 + $0xa0] sm:$0xff]  ;;  %v1220_v40 = vld [vmem:[%s1126_s19 + $0xa8] sm:$0xff]  ;;  %v1224_v42 = vld [vmem:[%s1126_s19 + $0xb0] sm:$0xff]  ;;  %p853_p10 = pneg %p852_p5  ;;  %p858_p0 = scmp.lt.s32.totalorder %s856_s27, %s850_s20 }
  0x74   : > { %v1228_v44 = vld [vmem:[%s1126_s19 + $0xb8] sm:$0xff]  ;;  %v1232_v46 = vld [vmem:[%s1126_s19 + $0xc0] sm:$0xff]  ;;  %v1236_v48 = vld [vmem:[%s1126_s19 + $0xc8] sm:$0xff] }
  0x75   : > { %v250_v11 = vadd.f32 %v249_v9, %v1156_v8  ;;  %v1240_v50 = vld [vmem:[%s1126_s19 + $0xd0] sm:$0xff]  ;;  %v1244_v52 = vld [vmem:[%s1126_s19 + $0xd8] sm:$0xff]  ;;  %v1248_v54 = vld [vmem:[%s1126_s19 + $0xe0] sm:$0xff]  ;;  %p859_p9 = por %p858_p0, %p857_p2 }
  0x76   : > { %v1252_v56 = vld [vmem:[%s1126_s19 + $0xe8] sm:$0xff]  ;;  %v1256_v58 = vld [vmem:[%s1126_s19 + $0xf0] sm:$0xff]  ;;  %v1260_v60 = vld [vmem:[%s1126_s19 + $0xf8] sm:$0xff] }
  0x77   : > { %v251_v13 = vadd.f32 %v250_v11, %v1160_v10  ;;  %p860_p6 = pnand %p859_p9, %p853_p10 }
  0x79   : > { %v252_v15 = vadd.f32 %v251_v13, %v1164_v12 }
  0x7b   : > { %v253_v17 = vadd.f32 %v252_v15, %v1168_v14 }
  0x7d   : > { %v254_v19 = vadd.f32 %v253_v17, %v1172_v16 }
  0x7f   : > { %v255_v21 = vadd.f32 %v254_v19, %v1176_v18 }
  0x81   : > { %v256_v23 = vadd.f32 %v255_v21, %v1180_v20 }
  0x83   : > { %v257_v25 = vadd.f32 %v256_v23, %v1184_v22 }
  0x85   : > { %v258_v27 = vadd.f32 %v257_v25, %v1188_v24 }
  0x87   : > { %v259_v29 = vadd.f32 %v258_v27, %v1192_v26 }
  0x89   : > { %v260_v31 = vadd.f32 %v259_v29, %v1196_v28 }
  0x8b   : > { %v261_v33 = vadd.f32 %v260_v31, %v1200_v30 }
  0x8d   : > { %v262_v35 = vadd.f32 %v261_v33, %v1204_v32 }
  0x8f   : > { %v263_v37 = vadd.f32 %v262_v35, %v1208_v34 }
  0x91   : > { %v264_v39 = vadd.f32 %v263_v37, %v1212_v36 }
  0x93   : > { %v265_v41 = vadd.f32 %v264_v39, %v1216_v38 }
  0x95   : > { %v266_v43 = vadd.f32 %v265_v41, %v1220_v40 }
  0x97   : > { %v267_v45 = vadd.f32 %v266_v43, %v1224_v42 }
  0x99   : > { %v268_v47 = vadd.f32 %v267_v45, %v1228_v44 }
  0x9b   : > { %v269_v49 = vadd.f32 %v268_v47, %v1232_v46 }
  0x9d   : > { %v270_v51 = vadd.f32 %v269_v49, %v1236_v48 }
  0x9f   : > { %v271_v53 = vadd.f32 %v270_v51, %v1240_v50 }
  0xa1   : > { %v272_v55 = vadd.f32 %v271_v53, %v1244_v52 }
  0xa3   : > { %v273_v57 = vadd.f32 %v272_v55, %v1248_v54 }
  0xa5   : > { %v274_v59 = vadd.f32 %v273_v57, %v1252_v56 }
  0xa7   : > { %v275_v61 = vadd.f32 %v274_v59, %v1256_v58 }
  0xa9   : > { %v276_v62 = vadd.f32 %v275_v61, %v1260_v60 }
  0xab   : > { %v277_v63 = vrot.slane %v276_v62, 4 }
  0xad   : > { %v278_v3 = vadd.f32 %v277_v63, %v276_v62 }
  0xaf   : > { %v279_v5 = vrot.slane %v278_v3, 2 }
  0xb1   : > { %v280_v7 = vadd.f32 %v279_v5, %v278_v3 }
  0xb3   : > { %v281_v9 = vrot.slane %v280_v7, 1 }
  0xb5   : > { %v282_v11 = vadd.f32 %v281_v9, %v280_v7 }
  0xb7   : > { %v1264_v13 = vmul.f32 0.00390625, %v282_v11 }
  0xb9   : > { %v1268_v15 = vsub.f32 %v1137_v0, %v1264_v13  ;;  %v1272_v17 = vsub.f32 %v1140_v1, %v1264_v13  ;;  %v1276_v19 = vsub.f32 %v1143_v2, %v1264_v13  ;;  %v1280_v21 = vsub.f32 %v1148_v4, %v1264_v13 }
  0xba   : > { %v1288_v0 = vsub.f32 %v1152_v6, %v1264_v13  ;;  %v1294_v2 = vsub.f32 %v1156_v8, %v1264_v13  ;;  %v1300_v29 = vsub.f32 %v1160_v10, %v1264_v13  ;;  %v1306_v33 = vsub.f32 %v1164_v12, %v1264_v13 }
  0xbb   : > { %v317_v23 = vmul.f32 %v1268_v15, %v1268_v15  ;;  %v318_v25 = vmul.f32 %v1272_v17, %v1272_v17  ;;  %v319_v1 = vmul.f32 %v1276_v19, %v1276_v19  ;;  %v320_v4 = vmul.f32 %v1280_v21, %v1280_v21 }
  0xbc   : > { %v321_v31 = vmul.f32 %v1288_v0, %v1288_v0  ;;  %v322_v8 = vmul.f32 %v1294_v2, %v1294_v2  ;;  %v1312_v37 = vsub.f32 %v1168_v14, %v1264_v13  ;;  %v323_v10 = vmul.f32 %v1300_v29, %v1300_v29 }
  0xbd   : > { %v349_v27 = vadd.f32 %v318_v25, %v317_v23  ;;  %v1318_v41 = vsub.f32 %v1172_v16, %v1264_v13  ;;  %v324_v12 = vmul.f32 %v1306_v33, %v1306_v33  ;;  %v1324_v45 = vsub.f32 %v1176_v18, %v1264_v13 }
  0xbe   : > { %v325_v14 = vmul.f32 %v1312_v37, %v1312_v37  ;;  %v1330_v49 = vsub.f32 %v1180_v20, %v1264_v13  ;;  %v1336_v53 = vsub.f32 %v1184_v22, %v1264_v13  ;;  %v1342_v57 = vsub.f32 %v1188_v24, %v1264_v13 }
  0xbf   : > { %v350_v6 = vadd.f32 %v349_v27, %v319_v1  ;;  %v326_v16 = vmul.f32 %v1318_v41, %v1318_v41  ;;  %v327_v18 = vmul.f32 %v1324_v45, %v1324_v45  ;;  %v1348_v61 = vsub.f32 %v1192_v26, %v1264_v13 }
  0xc0   : > { %v328_v20 = vmul.f32 %v1330_v49, %v1330_v49  ;;  %v329_v22 = vmul.f32 %v1336_v53, %v1336_v53  ;;  %v1354_v63 = vsub.f32 %v1196_v28, %v1264_v13  ;;  %v330_v24 = vmul.f32 %v1342_v57, %v1342_v57 }
  0xc1   : > { %v351_v35 = vadd.f32 %v350_v6, %v320_v4  ;;  %v1360_v5 = vsub.f32 %v1200_v30, %v1264_v13  ;;  %v331_v26 = vmul.f32 %v1348_v61, %v1348_v61  ;;  %v1366_v9 = vsub.f32 %v1204_v32, %v1264_v13 }
  0xc2   : > { %v332_v28 = vmul.f32 %v1354_v63, %v1354_v63  ;;  %v1372_v23 = vsub.f32 %v1208_v34, %v1264_v13  ;;  %v1378_v1 = vsub.f32 %v1212_v36, %v1264_v13  ;;  %v1384_v27 = vsub.f32 %v1216_v38, %v1264_v13 }
  0xc3   : > { %v352_v39 = vadd.f32 %v351_v35, %v321_v31  ;;  %v333_v30 = vmul.f32 %v1360_v5, %v1360_v5  ;;  %v334_v32 = vmul.f32 %v1366_v9, %v1366_v9  ;;  %v1390_v6 = vsub.f32 %v1220_v40, %v1264_v13 }
  0xc4   : > { %v335_v34 = vmul.f32 %v1372_v23, %v1372_v23  ;;  %v336_v36 = vmul.f32 %v1378_v1, %v1378_v1  ;;  %v1396_v35 = vsub.f32 %v1224_v42, %v1264_v13  ;;  %v337_v38 = vmul.f32 %v1384_v27, %v1384_v27 }
  0xc5   : > { %v353_v43 = vadd.f32 %v352_v39, %v322_v8  ;;  %v1402_v39 = vsub.f32 %v1228_v44, %v1264_v13  ;;  %v338_v40 = vmul.f32 %v1390_v6, %v1390_v6 }
  0xc6   : > { %v339_v42 = vmul.f32 %v1396_v35, %v1396_v35 }
  0xc7   : > { %v354_v47 = vadd.f32 %v353_v43, %v323_v10  ;;  %v1408_v43 = vsub.f32 %v1232_v46, %v1264_v13  ;;  %v340_v44 = vmul.f32 %v1402_v39, %v1402_v39 }
  0xc9   : > { %v355_v51 = vadd.f32 %v354_v47, %v324_v12  ;;  %v1414_v47 = vsub.f32 %v1236_v48, %v1264_v13  ;;  %v341_v46 = vmul.f32 %v1408_v43, %v1408_v43 }
  0xcb   : > { %v356_v55 = vadd.f32 %v355_v51, %v325_v14  ;;  %v1420_v51 = vsub.f32 %v1240_v50, %v1264_v13  ;;  %v342_v48 = vmul.f32 %v1414_v47, %v1414_v47 }
  0xcd   : > { %v357_v59 = vadd.f32 %v356_v55, %v326_v16  ;;  %v1426_v55 = vsub.f32 %v1244_v52, %v1264_v13  ;;  %v343_v50 = vmul.f32 %v1420_v51, %v1420_v51 }
  0xcf   : > { %v358_v62 = vadd.f32 %v357_v59, %v327_v18  ;;  %v1432_v59 = vsub.f32 %v1248_v54, %v1264_v13  ;;  %v344_v52 = vmul.f32 %v1426_v55, %v1426_v55 }
  0xd1   : > { %v359_v3 = vadd.f32 %v358_v62, %v328_v20  ;;  %v1438_v62 = vsub.f32 %v1252_v56, %v1264_v13  ;;  %v345_v54 = vmul.f32 %v1432_v59, %v1432_v59 }
  0xd3   : > { %v360_v7 = vadd.f32 %v359_v3, %v329_v22  ;;  %v1444_v3 = vsub.f32 %v1256_v58, %v1264_v13  ;;  %v346_v56 = vmul.f32 %v1438_v62, %v1438_v62 }
  0xd5   : > { %v361_v11 = vadd.f32 %v360_v7, %v330_v24  ;;  %v1450_v7 = vsub.f32 %v1260_v60, %v1264_v13 }
  0xd7   : > { %v362_v25 = vadd.f32 %v361_v11, %v331_v26  ;;  %v347_v11 = vmul.f32 %v1444_v3, %v1444_v3  ;;  %v348_v58 = vmul.f32 %v1450_v7, %v1450_v7 }
  0xd9   : > { %v363_v4 = vadd.f32 %v362_v25, %v332_v28 }
  0xdb   : > { %v364_v31 = vadd.f32 %v363_v4, %v333_v30 }
  0xdd   : > { %v365_v8 = vadd.f32 %v364_v31, %v334_v32 }
  0xdf   : > { %v366_v10 = vadd.f32 %v365_v8, %v335_v34 }
  0xe1   : > { %v367_v12 = vadd.f32 %v366_v10, %v336_v36 }
  0xe3   : > { %v368_v14 = vadd.f32 %v367_v12, %v337_v38  ;;  %v1460_v12 = vld [vmem:[#allocation5] ss:$0 sm:$0xff] }
  0xe5   : > { %v369_v16 = vadd.f32 %v368_v14, %v338_v40 }
  0xe7   : > { %v370_v18 = vadd.f32 %v369_v16, %v339_v42 }
  0xe9   : > { %v371_v20 = vadd.f32 %v370_v18, %v340_v44 }
  0xeb   : > { %v372_v22 = vadd.f32 %v371_v20, %v341_v46  ;;  %v1470_v46 = vld [vmem:[#allocation7] ss:$0 sm:$0xff] }
  0xed   : > { %v373_v24 = vadd.f32 %v372_v22, %v342_v48 }
  0xef   : > { %v374_v26 = vadd.f32 %v373_v24, %v343_v50 }
  0xf1   : > { %v375_v28 = vadd.f32 %v374_v26, %v344_v52 }
  0xf3   : > { %v376_v30 = vadd.f32 %v375_v28, %v345_v54 }
  0xf5   : > { %v377_v25 = vadd.f32 %v376_v30, %v346_v56 }
  0xf7   : > { %v378_v32 = vadd.f32 %v377_v25, %v347_v11 }
  0xf9   : > { %v379_v4 = vadd.f32 %v378_v32, %v348_v58 }
  0xfb   : > { %v380_v34 = vrot.slane %v379_v4, 4 }
  0xfd   : > { %v381_v31 = vadd.f32 %v380_v34, %v379_v4 }
  0xff   : > { %v382_v36 = vrot.slane %v381_v31, 2 }
 0x101   : > { %v383_v8 = vadd.f32 %v382_v36, %v381_v31 }
 0x103   : > { %v384_v60 = vrot.slane %v383_v8, 1 }
 0x105   : > { %v385_v13 = vadd.f32 %v384_v60, %v383_v8 }
 0x107   : > { %v386_v38 = vmul.f32 0.00390625, %v385_v13 }
 0x109   : > { %v387_v10 = vadd.f32 1e-05, %v386_v38 }
 0x10b   : > { %762 = vrsqrt.f32 %v387_v10 }
 0x115   : > { %v1458_v40 = vpop.eup %762 }
 0x116   : > { %v389_v42 = vmul.f32 %v1458_v40, %v1268_v15  ;;  %v390_v14 = vmul.f32 %v1458_v40, %v1272_v17  ;;  %v391_v44 = vmul.f32 %v1458_v40, %v1276_v19  ;;  %v392_v16 = vmul.f32 %v1458_v40, %v1280_v21 }
 0x117   : > { %v393_v18 = vmul.f32 %v1458_v40, %v1288_v0  ;;  %v394_v48 = vmul.f32 %v1458_v40, %v1294_v2  ;;  %v395_v15 = vmul.f32 %v1458_v40, %v1300_v29  ;;  %v396_v17 = vmul.f32 %v1458_v40, %v1306_v33 }
 0x118   : > { %v428_v20 = vmul.f32 %v1460_v12, %v389_v42  ;;  %v429_v19 = vmul.f32 %v1460_v12, %v390_v14  ;;  %v430_v21 = vmul.f32 %v1460_v12, %v391_v44  ;;  %v431_v50 = vmul.f32 %v1460_v12, %v392_v16 }
 0x119   : > { %v432_v22 = vmul.f32 %v1460_v12, %v393_v18  ;;  %v433_v0 = vmul.f32 %v1460_v12, %v394_v48  ;;  %v434_v2 = vmul.f32 %v1460_v12, %v395_v15  ;;  %v435_v52 = vmul.f32 %v1460_v12, %v396_v17 }
 0x11a   : > { %v467_v29 = vadd.f32 %v1470_v46, %v428_v20  ;;  %v468_v33 = vadd.f32 %v1470_v46, %v429_v19  ;;  %v469_v24 = vadd.f32 %v1470_v46, %v430_v21  ;;  %v470_v54 = vadd.f32 %v1470_v46, %v431_v50 }
 0x11b   : > { %v471_v26 = vadd.f32 %v1470_v46, %v432_v22  ;;  %v472_v56 = vadd.f32 %v1470_v46, %v433_v0  ;;  %v473_v28 = vadd.f32 %v1470_v46, %v434_v2  ;;  %v474_v11 = vadd.f32 %v1470_v46, %v435_v52 }
 0x11c   : > { %v499_v30 = vmax.f32 %v467_v29, 0.0  ;;  %v500_v58 = vmax.f32 %v468_v33, 0.0  ;;  %v501_v25 = vmax.f32 %v469_v24, 0.0  ;;  %v502_v32 = vmax.f32 %v470_v54, 0.0 }
 0x11d   : > { %v503_v4 = vmax.f32 %v471_v26, 0.0  ;;  %v504_v34 = vmax.f32 %v472_v56, 0.0  ;;  %v505_v31 = vmax.f32 %v473_v28, 0.0  ;;  %v506_v36 = vmax.f32 %v474_v11, 0.0 }
 0x11e   : > { %531 = vst [vmem:[%s1498_s23] sm:$0xff] %v499_v30  ;;  %532 = vst [vmem:[%s1498_s23 + $0x8] sm:$0xff] %v500_v58  ;;  %v397_v8 = vmul.f32 %v1458_v40, %v1312_v37  ;;  %v398_v60 = vmul.f32 %v1458_v40, %v1318_v41  ;;  %v399_v13 = vmul.f32 %v1458_v40, %v1324_v45 }
 0x11f   : > { %533 = vst [vmem:[%s1498_s23 + $0x10] sm:$0xff] %v501_v25  ;;  %534 = vst [vmem:[%s1498_s23 + $0x18] sm:$0xff] %v502_v32  ;;  %v400_v38 = vmul.f32 %v1458_v40, %v1330_v49  ;;  %v401_v10 = vmul.f32 %v1458_v40, %v1336_v53  ;;  %v402_v42 = vmul.f32 %v1458_v40, %v1342_v57 }
 0x120   : > { %535 = vst [vmem:[%s1498_s23 + $0x20] sm:$0xff] %v503_v4  ;;  %536 = vst [vmem:[%s1498_s23 + $0x28] sm:$0xff] %v504_v34  ;;  %v403_v37 = vmul.f32 %v1458_v40, %v1348_v61  ;;  %v404_v41 = vmul.f32 %v1458_v40, %v1354_v63  ;;  %v436_v45 = vmul.f32 %v1460_v12, %v397_v8 }
 0x121   : > { %537 = vst [vmem:[%s1498_s23 + $0x30] sm:$0xff] %v505_v31  ;;  %538 = vst [vmem:[%s1498_s23 + $0x38] sm:$0xff] %v506_v36  ;;  %v437_v49 = vmul.f32 %v1460_v12, %v398_v60  ;;  %v438_v14 = vmul.f32 %v1460_v12, %v399_v13  ;;  %v439_v44 = vmul.f32 %v1460_v12, %v400_v38 }
 0x122   : > { %v440_v16 = vmul.f32 %v1460_v12, %v401_v10  ;;  %v441_v53 = vmul.f32 %v1460_v12, %v402_v42  ;;  %v442_v57 = vmul.f32 %v1460_v12, %v403_v37  ;;  %v443_v18 = vmul.f32 %v1460_v12, %v404_v41 }
 0x123   : > { %v475_v61 = vadd.f32 %v1470_v46, %v436_v45  ;;  %v476_v63 = vadd.f32 %v1470_v46, %v437_v49  ;;  %v477_v48 = vadd.f32 %v1470_v46, %v438_v14  ;;  %v478_v15 = vadd.f32 %v1470_v46, %v439_v44 }
 0x124   : > { %v479_v17 = vadd.f32 %v1470_v46, %v440_v16  ;;  %v480_v20 = vadd.f32 %v1470_v46, %v441_v53  ;;  %v481_v19 = vadd.f32 %v1470_v46, %v442_v57  ;;  %v482_v21 = vadd.f32 %v1470_v46, %v443_v18 }
 0x125   : > { %v507_v50 = vmax.f32 %v475_v61, 0.0  ;;  %v508_v22 = vmax.f32 %v476_v63, 0.0  ;;  %v509_v0 = vmax.f32 %v477_v48, 0.0  ;;  %v510_v2 = vmax.f32 %v478_v15, 0.0 }
 0x126   : > { %v511_v52 = vmax.f32 %v479_v17, 0.0  ;;  %v512_v29 = vmax.f32 %v480_v20, 0.0  ;;  %v513_v33 = vmax.f32 %v481_v19, 0.0  ;;  %v514_v24 = vmax.f32 %v482_v21, 0.0 }
 0x127   : > { %539 = vst [vmem:[%s1498_s23 + $0x40] sm:$0xff] %v507_v50  ;;  %540 = vst [vmem:[%s1498_s23 + $0x48] sm:$0xff] %v508_v22  ;;  %v405_v54 = vmul.f32 %v1458_v40, %v1360_v5  ;;  %v406_v26 = vmul.f32 %v1458_v40, %v1366_v9  ;;  %v407_v56 = vmul.f32 %v1458_v40, %v1372_v23 }
 0x128   : > { %541 = vst [vmem:[%s1498_s23 + $0x50] sm:$0xff] %v509_v0  ;;  %542 = vst [vmem:[%s1498_s23 + $0x58] sm:$0xff] %v510_v2  ;;  %v408_v28 = vmul.f32 %v1458_v40, %v1378_v1  ;;  %v409_v11 = vmul.f32 %v1458_v40, %v1384_v27  ;;  %v410_v30 = vmul.f32 %v1458_v40, %v1390_v6 }
 0x129   : > { %543 = vst [vmem:[%s1498_s23 + $0x60] sm:$0xff] %v511_v52  ;;  %544 = vst [vmem:[%s1498_s23 + $0x68] sm:$0xff] %v512_v29  ;;  %v411_v5 = vmul.f32 %v1458_v40, %v1396_v35  ;;  %v412_v9 = vmul.f32 %v1458_v40, %v1402_v39  ;;  %v444_v23 = vmul.f32 %v1460_v12, %v405_v54 }
 0x12a   : > { %545 = vst [vmem:[%s1498_s23 + $0x70] sm:$0xff] %v513_v33  ;;  %546 = vst [vmem:[%s1498_s23 + $0x78] sm:$0xff] %v514_v24  ;;  %v445_v1 = vmul.f32 %v1460_v12, %v406_v26  ;;  %v446_v58 = vmul.f32 %v1460_v12, %v407_v56  ;;  %v447_v25 = vmul.f32 %v1460_v12, %v408_v28 }
 0x12b   : > { %v448_v32 = vmul.f32 %v1460_v12, %v409_v11  ;;  %v449_v27 = vmul.f32 %v1460_v12, %v410_v30  ;;  %v450_v6 = vmul.f32 %v1460_v12, %v411_v5  ;;  %v451_v4 = vmul.f32 %v1460_v12, %v412_v9 }
 0x12c   : > { %v483_v35 = vadd.f32 %v1470_v46, %v444_v23  ;;  %v484_v39 = vadd.f32 %v1470_v46, %v445_v1  ;;  %v485_v34 = vadd.f32 %v1470_v46, %v446_v58  ;;  %v486_v31 = vadd.f32 %v1470_v46, %v447_v25 }
 0x12d   : > { %v487_v36 = vadd.f32 %v1470_v46, %v448_v32  ;;  %v488_v8 = vadd.f32 %v1470_v46, %v449_v27  ;;  %v489_v60 = vadd.f32 %v1470_v46, %v450_v6  ;;  %v490_v13 = vadd.f32 %v1470_v46, %v451_v4 }
 0x12e   : > { %v515_v38 = vmax.f32 %v483_v35, 0.0  ;;  %v516_v10 = vmax.f32 %v484_v39, 0.0  ;;  %v517_v42 = vmax.f32 %v485_v34, 0.0  ;;  %v518_v37 = vmax.f32 %v486_v31, 0.0 }
 0x12f   : > { %v519_v41 = vmax.f32 %v487_v36, 0.0  ;;  %v520_v45 = vmax.f32 %v488_v8, 0.0  ;;  %v521_v49 = vmax.f32 %v489_v60, 0.0  ;;  %v522_v14 = vmax.f32 %v490_v13, 0.0 }
 0x130   : > { %547 = vst [vmem:[%s1498_s23 + $0x80] sm:$0xff] %v515_v38  ;;  %548 = vst [vmem:[%s1498_s23 + $0x88] sm:$0xff] %v516_v10  ;;  %v413_v44 = vmul.f32 %v1458_v40, %v1408_v43  ;;  %v414_v16 = vmul.f32 %v1458_v40, %v1414_v47  ;;  %v415_v53 = vmul.f32 %v1458_v40, %v1420_v51 }
 0x131   : > { %549 = vst [vmem:[%s1498_s23 + $0x90] sm:$0xff] %v517_v42  ;;  %550 = vst [vmem:[%s1498_s23 + $0x98] sm:$0xff] %v518_v37  ;;  %v416_v57 = vmul.f32 %v1458_v40, %v1426_v55  ;;  %v417_v18 = vmul.f32 %v1458_v40, %v1432_v59  ;;  %v418_v43 = vmul.f32 %v1458_v40, %v1438_v62 }
 0x132   : > { %551 = vst [vmem:[%s1498_s23 + $0xa0] sm:$0xff] %v519_v41  ;;  %552 = vst [vmem:[%s1498_s23 + $0xa8] sm:$0xff] %v520_v45  ;;  %v419_v47 = vmul.f32 %v1458_v40, %v1444_v3  ;;  %v420_v51 = vmul.f32 %v1458_v40, %v1450_v7  ;;  %v452_v55 = vmul.f32 %v1460_v12, %v413_v44 }
 0x133   : > { %553 = vst [vmem:[%s1498_s23 + $0xb0] sm:$0xff] %v521_v49  ;;  %554 = vst [vmem:[%s1498_s23 + $0xb8] sm:$0xff] %v522_v14  ;;  %v453_v61 = vmul.f32 %v1460_v12, %v414_v16  ;;  %v454_v63 = vmul.f32 %v1460_v12, %v415_v53  ;;  %v455_v48 = vmul.f32 %v1460_v12, %v416_v57 }
 0x134   : > { %v456_v15 = vmul.f32 %v1460_v12, %v417_v18  ;;  %v457_v59 = vmul.f32 %v1460_v12, %v418_v43  ;;  %v458_v62 = vmul.f32 %v1460_v12, %v419_v47  ;;  %v459_v17 = vmul.f32 %v1460_v12, %v420_v51 }
 0x135   : > { %v491_v3 = vadd.f32 %v1470_v46, %v452_v55  ;;  %v492_v7 = vadd.f32 %v1470_v46, %v453_v61  ;;  %v493_v40 = vadd.f32 %v1470_v46, %v454_v63  ;;  %v494_v20 = vadd.f32 %v1470_v46, %v455_v48 }
 0x136   : > { %v495_v19 = vadd.f32 %v1470_v46, %v456_v15  ;;  %v496_v21 = vadd.f32 %v1470_v46, %v457_v59  ;;  %v497_v12 = vadd.f32 %v1470_v46, %v458_v62  ;;  %v498_v50 = vadd.f32 %v1470_v46, %v459_v17 }
 0x137   : > { %v523_v22 = vmax.f32 %v491_v3, 0.0  ;;  %v524_v0 = vmax.f32 %v492_v7, 0.0  ;;  %v525_v2 = vmax.f32 %v493_v40, 0.0  ;;  %v526_v52 = vmax.f32 %v494_v20, 0.0 }
 0x138   : > { %v527_v29 = vmax.f32 %v495_v19, 0.0  ;;  %v528_v46 = vmax.f32 %v496_v21, 0.0  ;;  %v529_v33 = vmax.f32 %v497_v12, 0.0  ;;  %v530_v24 = vmax.f32 %v498_v50, 0.0 }
 0x139   : > { %555 = vst [vmem:[%s1498_s23 + $0xc0] sm:$0xff] %v523_v22  ;;  %556 = vst [vmem:[%s1498_s23 + $0xc8] sm:$0xff] %v524_v0 }
 0x13a   : > { %557 = vst [vmem:[%s1498_s23 + $0xd0] sm:$0xff] %v525_v2  ;;  %558 = vst [vmem:[%s1498_s23 + $0xd8] sm:$0xff] %v526_v52 }
 0x13b   : > { %559 = vst [vmem:[%s1498_s23 + $0xe0] sm:$0xff] %v527_v29  ;;  %560 = vst [vmem:[%s1498_s23 + $0xe8] sm:$0xff] %v528_v46 }
 0x13c   : > { %561 = vst [vmem:[%s1498_s23 + $0xf0] sm:$0xff] %v529_v33  ;;  %562 = vst [vmem:[%s1498_s23 + $0xf8] sm:$0xff] %v530_v24 }
 0x13d   : > { %863 = shalt.err (!%p860_p6)
}
 0x13e   : > { %s864_s6 = scalar_lea.hbm %s1625_s10, 4096  ;;  %s868_s29 = scalar_lea.hbm %s1682_s3, 8192 }
 0x13f   : > { %p865_p12 = scmp.ne.s32.totalorder %s1625_s10, %s864_s6  ;;  %p869_p11 = scmp.lt.u32.totalorder %s1625_s10, %s1682_s3 }
 0x140   : > { %p870_p7 = scmp.lt.u32.totalorder %s868_s29, %s864_s6  ;;  %p872_p8 = scmp.lt.u32.totalorder %s864_s6, %s1625_s10 }
 0x141   : > { %p866_p13 = pnand %p865_p12, %p1701_p4 }
 0x142   : > { %p871_p3 = por %p870_p7, %p869_p11 }
 0x143   : > { %p867_p1 = pneg %p866_p13 }
 0x144   : > { %p873_p5 = por %p872_p8, %p871_p3 }
 0x146   : > { %p874_p10 = pnand %p873_p5, %p867_p1 }
 0x148   : > { %877 = shalt.err (!%p874_p10)
}
 0x149   : > { %s928_s19 = smov 128   ;;  %s929_s23 = smov 8  }
 0x14a   : > { %701 = dma.vmem_to_hbm [thread:$0]  (%p1701_p4), %s1627_s30, 4096, %s1625_s10, %s564_s11, %s928_s19, %s928_s19, %s929_s23  }
 0x14b PF: > { %s592_s26 = sand.u32 1, %s908_s12   ;;  %p1702_p2 = scmp.ne.s32.totalorder %s1691_s25, 0 }
 0x14c   : > { %p1703_p0 = scmp.ge.s32.totalorder %s920_s15, 2  ;;  %s593_s16 = scalar_lea.sflag [#allocation4], %s592_s26 }
 0x14e   : > { %p715_p9 = pnand %p1703_p0, %p1702_p2 }
 0x150   : > { %903 = dma.done.wait (!%p715_p9), %s593_s16, 4096  }
 0x151   : > { %905 = vsyncadd (!%p715_p9), %s593_s16, 4294963200  ;;  %p17_p6 = scmp.ge.s32.totalorder %s975_s18, 4   ;;  %s1704_s12 = smov %s912_s13 }
 0x152   : > { %s1705_s13 = smov %s916_s14  ;;  %s1706_s14 = smov %s987_s21 }
 0x153   : > { %s1707_s15 = smov %s975_s18  ;;  %19 = sbr.rel (!%p17_p6) target bundleno = 6 (0x6), region = 85 }
 0x15a   :  { %598 = vsyncpa [#allocation3], 1 }
 0x15b   :  { %600 = vsyncpa [#allocation3 + $0x1], 1 }
 0x15c   :  { %601 = vsyncpa [#allocation6], 1 }
 0x15d   :  { %602 = vsyncpa [#allocation4], 1 }
 0x15e   :  { %604 = vsyncpa [#allocation4 + $0x1], 1 }

// kernel: forward.26
= control target key start
LH: loop header
LB: loop body
LE: loop exit
PB: predicated region body
PF: predicated region fallthrough
CT: control target
= control target key end

     0   :  { %7 = vsyncpa [#allocation4], 0  ;;  %s1819_s0 = inlined_call_operand.hbm [shape: bf16[512,256], index: 0, kind: input, shape index: {}]   ;;  %s1820_s1 = inlined_call_operand.hbm [shape: bf16[256,128], index: 1, kind: input, shape index: {}]   ;;  %s1821_s2 = inlined_call_operand.hbm [shape: f32[512,128], index: 2, kind: output, shape index: {}]  }
   0x1   :  { %9 = vsyncpa [#allocation4 + $0x1], 0 }
   0x2   :  { %10 = vsyncpa [#allocation7], 0 }
   0x3   :  { %11 = vsyncpa [#allocation5], 0 }
   0x4   :  { %13 = vsyncpa [#allocation5 + $0x1], 0  ;;  %s1527_s9 = smov 0   ;;  %s1529_s10 = smov 0  }
   0x5   :  { %s1531_s11 = smov 0   ;;  %s1533_s12 = smov 0  }
   0x6   :  { %s1535_s13 = smov 0   ;;  %s1537_s14 = smov 0  }
   0x7 LB: > { %s1017_s15 = sadd.s32 4294967295, %s1501_s14   ;;  %s1018_s16 = sadd.s32 4294967294, %s1501_s14   ;;  %s1501_s14 = sphi %s1537_s14, %s19_s14   ;;  %s1497_s13 = sphi %s1535_s13, %s1845_s13   ;;  %s1493_s12 = sphi %s1533_s12, %s1844_s12   ;;  %s1489_s11 = sphi %s1531_s11, %s1843_s11   ;;  %s1485_s10 = sphi %s1529_s10, %s1842_s10   ;;  %s1481_s9 = sphi %s1527_s9, %s1841_s9  }
   0x8   : > { %p60_p0 = scmp.ne.s32.totalorder %s1485_s10, %s1481_s9  ;;  %p1561_p1 = scmp.eq.s32.totalorder %s1017_s15, 0 }
   0x9   : > { %p1565_p2 = scmp.eq.s32.totalorder %s1017_s15, 1  ;;  %p120_p3 = scmp.eq.s32.totalorder %s1018_s16, 1 }
   0xa   : > { %s1826_s17 = scalar_select %p1561_p1, 1, 0 }
   0xb   : > { %s1827_s18 = scalar_select %p1565_p2, 1, 0 }
   0xc   : > { %p1571_p4 = por %p1561_p1, %p60_p0  ;;  %p1019_p5 = scmp.ge.s32.totalorder %s1501_s14, 1 }
   0xd   : > { %p1576_p6 = por %p120_p3, %p60_p0  ;;  %p127_p7 = scmp.lt.s32.totalorder %s1501_s14, 3 }
   0xe   : > { %s1828_s19 = scalar_select %p1571_p4, 1, 0 }
   0xf   : > { %s1829_s20 = scalar_select %p1576_p6, 1, 0 }
  0x10   : > { %p1581_p8 = pnand %p1019_p5, %p127_p7  ;;  %s1503_s22 = smov [#allocation6]  }
  0x11   : > { %s143_s23 = sshll.u32 %s1503_s22, 4  ;;  %s38_s25 = sadd.s32 1, %s1497_s13  ;;  %s144_s23 = int_to_ptr.vmem [resolvable:$true] %s143_s23 }
  0x12   : > { %s1830_s21 = scalar_select %p1581_p8, 1, 0 }
  0x13   : > { %p1222_p9 = pneg %p1581_p8  ;;  %s1357_s28 = scalar_lea.hbm %s1820_s1, 2048 }
  0x14   : > { %p1358_p12 = scmp.ne.s32.totalorder %s1820_s1, %s1357_s28  ;;  %p1364_p5 = scmp.lt.u32.totalorder %s1357_s28, %s1820_s1 }
  0x15   : > { %p1590_p11 = pnand %p1222_p9, %p1561_p1 }
  0x17   : > { %p1359_p13 = pneg %p1590_p11 }
  0x19   : > { %p1360_p0 = pnand %p1359_p13, %p1358_p12 }
  0x1b   : > { %p1361_p3 = pneg %p1360_p0 }
  0x1d   : > { %p1366_p7 = pnand %p1364_p5, %p1361_p3 }
  0x1f   : > { %1369 = shalt.err (!%p1366_p7)
}
  0x20   : > { %s1370_s5 = scalar_lea.vmem %s144_s23, 2048  ;;  %p1378_p1 = scmp.lt.s32.totalorder %s144_s23, %s144_s23 }
  0x21   : > { %p1371_p9 = scmp.ne.s32.totalorder %s144_s23, %s1370_s5  ;;  %p1379_p4 = scmp.lt.s32.totalorder %s1370_s5, %s1370_s5 }
  0x23   : > { %p1373_p10 = pnand %p1371_p9, %p1359_p13  ;;  %p1380_p8 = por %p1379_p4, %p1378_p1 }
  0x25   : > { %p1374_p6 = pneg %p1373_p10 }
  0x27   : > { %p1381_p2 = pnand %p1380_p8, %p1374_p6 }
  0x29   : > { %1384 = shalt.err (!%p1381_p2)
}
  0x2a   : > { %s1504_s6 = smov 64   ;;  %s1505_s7 = smov 4  }
  0x2b   : > { %1225 = dma.hbm_to_vmem [thread:$0]  (!%p1590_p11), %s1820_s1, 2048, %s144_s23, [#allocation7], %s1504_s6, %s1504_s6, %s1505_s7  }
  0x2c   : > { %p40_p1 = scmp.ge.s32.totalorder %s38_s25, 2  ;;  %s47_s16 = sadd.s32 1, %s1489_s11 }
  0x2d   : > { %p54_p2 = scmp.ne.s32.totalorder %s1489_s11, %s1485_s10  ;;  %p55_p4 = scmp.eq.s32.totalorder %s1501_s14, 0 }
  0x2e   : > { %s1847_s25 = smov (%p40_p1, %s38_s25), 0  ;;  %p1833_p8 = scmp.ne.s32.totalorder %s1827_s18, 0 }
  0x2f   : > { %p1617_p6 = por %p55_p4, %p54_p2  ;;  %s42_s24 = ssub.s32 %s1497_s13, %s1847_s25 }
  0x30   : > { %p1623_p10 = por %p1833_p8, %p54_p2  ;;  %p1235_p12 = scmp.lt.s32.totalorder %s1501_s14, 2 }
  0x31   : > { %p45_p11 = scmp.eq.s32.totalorder %s42_s24, 0  ;;  %s157_s23 = sand.u32 1, %s1489_s11  }
  0x32   : > { %s1022_s27 = sshll.u32 %s157_s23, 8  ;;  %s1084_s29 = sshll.u32 %s1497_s13, 12 }
  0x33   : > { %s1632_s28 = scalar_select %p45_p11, %s1489_s11, %s47_s16  }
  0x34   : > { %s1638_s4 = scalar_lea.hbm %s1819_s0, %s1084_s29  ;;  %s161_s18 = scalar_lea.vmem [#allocation3], %s1022_s27 }
  0x35   : > { %s171_s5 = sshll.u32 %s161_s18, 4  ;;  %p1644_p13 = pnand %p1235_p12, %p1617_p6  ;;  %s1640_s5 = int_to_ptr.vmem [resolvable:$true] %s171_s5 }
  0x36   : > { %s1648_s7 = scalar_lea.sflag [#allocation4], %s157_s23  ;;  %s1385_s8 = scalar_lea.hbm %s1638_s4, 4096 }
  0x37   : > { %p1386_p0 = scmp.ne.s32.totalorder %s1638_s4, %s1385_s8  ;;  %p1387_p3 = pneg %p1644_p13 }
  0x38   : > { %s1390_s22 = scalar_lea.hbm %s1819_s0, 8192  ;;  %p1391_p9 = scmp.lt.u32.totalorder %s1638_s4, %s1819_s0 }
  0x39   : > { %p1388_p5 = pnand %p1387_p3, %p1386_p0  ;;  %p1392_p1 = scmp.lt.u32.totalorder %s1390_s22, %s1385_s8 }
  0x3a   : > { %p1394_p4 = scmp.lt.u32.totalorder %s1385_s8, %s1638_s4 }
  0x3b   : > { %p1389_p7 = pneg %p1388_p5  ;;  %p1393_p2 = por %p1392_p1, %p1391_p9 }
  0x3d   : > { %p1395_p6 = por %p1394_p4, %p1393_p2 }
  0x3f   : > { %p1396_p8 = pnand %p1395_p6, %p1389_p7 }
  0x41   : > { %1399 = shalt.err (!%p1396_p8)
}
  0x42   : > { %s1400_s23 = scalar_lea.vmem %s1640_s5, 4096  ;;  %s1506_s29 = smov [#allocation3]  }
  0x43   : > { %p1401_p12 = scmp.ne.s32.totalorder %s1640_s5, %s1400_s23  ;;  %s1405_s30 = sshll.u32 %s1506_s29, 4  ;;  %s1406_s30 = int_to_ptr.vmem [resolvable:$false] %s1405_s30 }
  0x44   : > { %s1407_s3 = scalar_lea.vmem %s1406_s30, 8192  ;;  %p1408_p5 = scmp.lt.s32.totalorder %s1640_s5, %s1406_s30 }
  0x45   : > { %p1403_p11 = pnand %p1401_p12, %p1387_p3  ;;  %p1409_p9 = scmp.lt.s32.totalorder %s1407_s3, %s1400_s23 }
  0x47   : > { %p1404_p0 = pneg %p1403_p11  ;;  %p1410_p1 = por %p1409_p9, %p1408_p5 }
  0x49   : > { %p1411_p2 = pnand %p1410_p1, %p1404_p0 }
  0x4b   : > { %1414 = shalt.err (!%p1411_p2)
}
  0x4c   : > { %s1507_s18 = smov 128   ;;  %s1508_s8 = smov 8  }
  0x4d   : > { %1229 = dma.hbm_to_vmem [thread:$0]  (!%p1644_p13), %s1638_s4, 4096, %s1640_s5, %s1648_s7, %s1507_s18, %s1507_s18, %s1508_s8  }
  0x4e   : > { %p1836_p3 = scmp.ne.s32.totalorder %s1830_s21, 0 }
  0x4f   : > { %s1679_s15 = sand.u32 (!%p1836_p3), 1, %s1485_s10   ;;  %p1837_p7 = scmp.ne.s32.totalorder (!%p1836_p3), %s1828_s19, 0 }
  0x50   : > { %183 = sbr.rel (%p1836_p3) target bundleno = 412 (0x19c), region = 28  ;;  %s1027_s16 = sshll.u32 (!%p1836_p3), %s1679_s15, 8 }
  0x51   : > { %s186_s22 = scalar_lea.sflag (!%p1836_p3), [#allocation4], %s1679_s15  ;;  %s1685_s24 = scalar_lea.vmem (!%p1836_p3), [#allocation3], %s1027_s16 }
  0x57   : > { %1468 = dma.done.wait (%p1837_p7), %s186_s22, 4096  }
  0x58   : > { %1470 = vsyncadd (%p1837_p7), %s186_s22, 4294963200  ;;  %p1838_p13 = scmp.ne.s32.totalorder %s1826_s17, 0 }
  0x5a   : > { %1472 = dma.done.wait (%p1838_p13), [#allocation7], 2048  }
  0x5b   : > { %1474 = vsyncadd (%p1838_p13), [#allocation7], 4294965248  ;;  %v1293_v0 = vld [vmem:[#allocation6 + $0x40] sm:$0xff]   ;;  %v1295_v2 = vld [vmem:[#allocation6 + $0x48] sm:$0xff]   ;;  %s1729_s17 = scalar_lea.vmem [#allocation8], %s1027_s16  ;;  %s1085_s19 = sshll.u32 %s1493_s12, 12 }
  0x5c   : > { %v1294_v1 = vld [vmem:[#allocation6] sm:$0xff]   ;;  %1086 = vmatprep.subr.bf16.mxu0 %v1293_v0  ;;  %1198 = vmatprep.subr.bf16.mxu1 %v1293_v0  ;;  %v1296_v3 = vld [vmem:[#allocation6 + $0x8] sm:$0xff]   ;;  %v1297_v4 = vld [vmem:[#allocation6 + $0x50] sm:$0xff]   ;;  %s914_s21 = sshll.u32 %s1729_s17, 4  ;;  %s1764_s6 = scalar_lea.hbm %s1821_s2, %s1085_s19  ;;  %s1766_s21 = int_to_ptr.vmem [resolvable:$true] %s914_s21 }
  0x5d   : > { %1087 = vmatpush3.bf16.msra.mxu0 %v1294_v1  ;;  %1206 = vmatpush3.bf16.msra.mxu1 %v1294_v1  ;;  %v1298_v5 = vld [vmem:[#allocation6 + $0x10] sm:$0xff]   ;;  %v1299_v6 = vld [vmem:[#allocation6 + $0x58] sm:$0xff]   ;;  %v1301_v8 = vld [vmem:[#allocation6 + $0x60] sm:$0xff]   ;;  %s900_s12 = scalar_lea.sflag [#allocation5], %s1679_s15  ;;  %s1415_s7 = scalar_lea.vmem %s1766_s21, 4096 }
  0x5e   : > { %1088 = vmatprep.subr.bf16.mxu0 %v1295_v2  ;;  %1199 = vmatprep.subr.bf16.mxu1 %v1295_v2  ;;  %v1300_v7 = vld [vmem:[#allocation6 + $0x18] sm:$0xff]   ;;  %v1302_v9 = vld [vmem:[#allocation6 + $0x20] sm:$0xff]   ;;  %v1303_v10 = vld [vmem:[#allocation6 + $0x68] sm:$0xff]   ;;  %p1416_p4 = scmp.ne.s32.totalorder %s1766_s21, %s1415_s7  ;;  %s1509_s27 = smov [#allocation8]  }
  0x5f   : > { %v1311_v11 = vld [vmem:[%s1685_s24 + $0x4] ss:$8 sps:$4 sm:$0xff]   ;;  %v1305_v14 = vld [vmem:[#allocation6 + $0x70] sm:$0xff]   ;;  %v1307_v16 = vld [vmem:[#allocation6 + $0x78] sm:$0xff]   ;;  %s1419_s23 = sshll.u32 %s1509_s27, 4  ;;  %s1420_s23 = int_to_ptr.vmem [resolvable:$false] %s1419_s23 }
  0x60   : > { %v1314_v12 = vld [vmem:[%s1685_s24 + $0x84] ss:$8 sps:$4 sm:$0xff]   ;;  %639 = vmatprep.mubr.bf16.mxu0 %v1311_v11  ;;  %v1306_v15 = vld [vmem:[#allocation6 + $0x30] sm:$0xff]   ;;  %v1308_v17 = vld [vmem:[#allocation6 + $0x38] sm:$0xff]   ;;  %p1417_p6 = pnand %p1416_p4, %p1623_p10  ;;  %s1421_s29 = scalar_lea.vmem %s1420_s23, 8192 }
  0x61   : > { %1089 = vmatpush3.bf16.msra.mxu0 %v1296_v3  ;;  %1207 = vmatpush3.bf16.msra.mxu1 %v1296_v3  ;;  %v1304_v13 = vld [vmem:[#allocation6 + $0x28] sm:$0xff]   ;;  %v1315_v20 = vld [vmem:[%s1685_s24 + $0x14] ss:$8 sps:$4 sm:$0xff]   ;;  %v1319_v22 = vld [vmem:[%s1685_s24 + $0x10] ss:$8 sps:$4 sm:$0xff]   ;;  %p1422_p12 = scmp.lt.s32.totalorder %s1766_s21, %s1420_s23  ;;  %p1423_p11 = scmp.lt.s32.totalorder %s1421_s29, %s1415_s7 }
  0x62   : > { %1090 = vmatprep.subr.bf16.mxu0 %v1297_v4  ;;  %1200 = vmatprep.subr.bf16.mxu1 %v1297_v4  ;;  %v1309_v18 = vld [vmem:[%s1685_s24] ss:$8 sps:$4 sm:$0xff]   ;;  %v1317_v21 = vld [vmem:[%s1685_s24 + $0x94] ss:$8 sps:$4 sm:$0xff]   ;;  %v1320_v23 = vld [vmem:[%s1685_s24 + $0x90] ss:$8 sps:$4 sm:$0xff]   ;;  %p1418_p8 = pneg %p1417_p6 }
  0x63   : > { %703 = vmatprep.mubr.bf16.mxu1 %v1314_v12  ;;  %v1312_v19 = vld [vmem:[%s1685_s24 + $0x80] ss:$8 sps:$4 sm:$0xff]   ;;  %v1321_v24 = vld [vmem:[%s1685_s24 + $0x24] ss:$8 sps:$4 sm:$0xff]   ;;  %v1327_v28 = vld [vmem:[%s1685_s24 + $0x34] ss:$8 sps:$4 sm:$0xff]   ;;  %p1424_p0 = por %p1423_p11, %p1422_p12 }
  0x64   : > { %v1323_v25 = vld [vmem:[%s1685_s24 + $0xa4] ss:$8 sps:$4 sm:$0xff]   ;;  %v1325_v26 = vld [vmem:[%s1685_s24 + $0x20] ss:$8 sps:$4 sm:$0xff]   ;;  %v1329_v29 = vld [vmem:[%s1685_s24 + $0xb4] ss:$8 sps:$4 sm:$0xff]  }
  0x65   : > { %1091 = vmatpush3.bf16.msra.mxu0 %v1298_v5  ;;  %1208 = vmatpush3.bf16.msra.mxu1 %v1298_v5  ;;  %v1326_v27 = vld [vmem:[%s1685_s24 + $0xa0] ss:$8 sps:$4 sm:$0xff]   ;;  %v1331_v30 = vld [vmem:[%s1685_s24 + $0x30] ss:$8 sps:$4 sm:$0xff]   ;;  %v1333_v32 = vld [vmem:[%s1685_s24 + $0x44] ss:$8 sps:$4 sm:$0xff]   ;;  %p1425_p5 = pnand %p1424_p0, %p1418_p8 }
  0x66   : > { %1092 = vmatprep.subr.bf16.mxu0 %v1299_v6  ;;  %1201 = vmatprep.subr.bf16.mxu1 %v1299_v6  ;;  %v1332_v31 = vld [vmem:[%s1685_s24 + $0xb0] ss:$8 sps:$4 sm:$0xff]   ;;  %v1335_v33 = vld [vmem:[%s1685_s24 + $0xc4] ss:$8 sps:$4 sm:$0xff]   ;;  %v1337_v34 = vld [vmem:[%s1685_s24 + $0x40] ss:$8 sps:$4 sm:$0xff]  }
  0x67   : > { %v1338_v35 = vld [vmem:[%s1685_s24 + $0xc0] ss:$8 sps:$4 sm:$0xff]   ;;  %v1339_v36 = vld [vmem:[%s1685_s24 + $0x54] ss:$8 sps:$4 sm:$0xff]   ;;  %v1343_v38 = vld [vmem:[%s1685_s24 + $0x50] ss:$8 sps:$4 sm:$0xff]  }
  0x68   : > { %v1341_v37 = vld [vmem:[%s1685_s24 + $0xd4] ss:$8 sps:$4 sm:$0xff]   ;;  %v1344_v39 = vld [vmem:[%s1685_s24 + $0xd0] ss:$8 sps:$4 sm:$0xff]   ;;  %v1345_v40 = vld [vmem:[%s1685_s24 + $0x64] ss:$8 sps:$4 sm:$0xff]  }
  0x69   : > { %1093 = vmatpush3.bf16.msra.mxu0 %v1300_v7  ;;  %1209 = vmatpush3.bf16.msra.mxu1 %v1300_v7  ;;  %v1347_v41 = vld [vmem:[%s1685_s24 + $0xe4] ss:$8 sps:$4 sm:$0xff]   ;;  %v1349_v42 = vld [vmem:[%s1685_s24 + $0x60] ss:$8 sps:$4 sm:$0xff]   ;;  %v1351_v44 = vld [vmem:[%s1685_s24 + $0x74] ss:$8 sps:$4 sm:$0xff]  }
  0x6a   : > { %1094 = vmatprep.subr.bf16.mxu0 %v1301_v8  ;;  %1202 = vmatprep.subr.bf16.mxu1 %v1301_v8  ;;  %v1350_v43 = vld [vmem:[%s1685_s24 + $0xe0] ss:$8 sps:$4 sm:$0xff]   ;;  %v1353_v45 = vld [vmem:[%s1685_s24 + $0xf4] ss:$8 sps:$4 sm:$0xff]   ;;  %v1355_v46 = vld [vmem:[%s1685_s24 + $0x70] ss:$8 sps:$4 sm:$0xff]  }
  0x6b   : > { %v1356_v47 = vld [vmem:[%s1685_s24 + $0xf0] ss:$8 sps:$4 sm:$0xff]  }
  0x6d   : > { %1095 = vmatpush3.bf16.msra.mxu0 %v1302_v9  ;;  %1210 = vmatpush3.bf16.msra.mxu1 %v1302_v9 }
  0x6e   : > { %1096 = vmatprep.subr.bf16.mxu0 %v1303_v10  ;;  %1203 = vmatprep.subr.bf16.mxu1 %v1303_v10 }
  0x71   : > { %1097 = vmatpush3.bf16.msra.mxu0 %v1304_v13  ;;  %1211 = vmatpush3.bf16.msra.mxu1 %v1304_v13 }
  0x72   : > { %1098 = vmatprep.subr.bf16.mxu0 %v1305_v14  ;;  %1204 = vmatprep.subr.bf16.mxu1 %v1305_v14 }
  0x75   : > { %1099 = vmatpush3.bf16.msra.mxu0 %v1306_v15  ;;  %1212 = vmatpush3.bf16.msra.mxu1 %v1306_v15 }
  0x76   : > { %1100 = vmatprep.subr.bf16.mxu0 %v1307_v16  ;;  %1205 = vmatprep.subr.bf16.mxu1 %v1307_v16 }
  0x79   : > { %1101 = vmatpush3.bf16.msra.mxu0 %v1308_v17  ;;  %1213 = vmatpush3.bf16.msra.mxu1 %v1308_v17 }
  0x7c   : > { %640 = vmatmul.mubr.bf16.vlgmr.msra.gmra.mrb[0].mxu0 %v1309_v18  ;;  %704 = vmatmul.mubr.bf16.vlgmr.msra.gmra.mrb[0].mxu1 %v1312_v19 }
  0x7d   : > { %647 = vmatprep.mubr.bf16.mxu0 %v1315_v20  ;;  %711 = vmatprep.mubr.bf16.mxu1 %v1317_v21 }
  0x84   : > { %648 = vmatmul.mubr.bf16.gmra.mrb[4].mxu0 %v1319_v22  ;;  %712 = vmatmul.mubr.bf16.gmra.mrb[4].mxu1 %v1320_v23 }
  0x85   : > { %655 = vmatprep.mubr.bf16.mxu0 %v1321_v24  ;;  %719 = vmatprep.mubr.bf16.mxu1 %v1323_v25 }
  0x8c   : > { %656 = vmatmul.mubr.bf16.gmra.mrb[8].mxu0 %v1325_v26  ;;  %720 = vmatmul.mubr.bf16.gmra.mrb[8].mxu1 %v1326_v27 }
  0x8d   : > { %663 = vmatprep.mubr.bf16.mxu0 %v1327_v28  ;;  %727 = vmatprep.mubr.bf16.mxu1 %v1329_v29 }
  0x94   : > { %664 = vmatmul.mubr.bf16.gmra.mrb[12].mxu0 %v1331_v30  ;;  %728 = vmatmul.mubr.bf16.gmra.mrb[12].mxu1 %v1332_v31 }
  0x95   : > { %671 = vmatprep.mubr.bf16.mxu0 %v1333_v32  ;;  %735 = vmatprep.mubr.bf16.mxu1 %v1335_v33 }
  0x9c   : > { %672 = vmatmul.mubr.bf16.gmra.mrb[16].mxu0 %v1337_v34  ;;  %736 = vmatmul.mubr.bf16.gmra.mrb[16].mxu1 %v1338_v35 }
  0x9d   : > { %679 = vmatprep.mubr.bf16.mxu0 %v1339_v36  ;;  %743 = vmatprep.mubr.bf16.mxu1 %v1341_v37 }
  0xa4   : > { %680 = vmatmul.mubr.bf16.gmra.mrb[20].mxu0 %v1343_v38  ;;  %744 = vmatmul.mubr.bf16.gmra.mrb[20].mxu1 %v1344_v39 }
  0xa5   : > { %687 = vmatprep.mubr.bf16.mxu0 %v1345_v40  ;;  %751 = vmatprep.mubr.bf16.mxu1 %v1347_v41 }
  0xac   : > { %688 = vmatmul.mubr.bf16.gmra.mrb[24].mxu0 %v1349_v42  ;;  %752 = vmatmul.mubr.bf16.gmra.mrb[24].mxu1 %v1350_v43 }
  0xad   : > { %695 = vmatprep.mubr.bf16.mxu0 %v1351_v44  ;;  %759 = vmatprep.mubr.bf16.mxu1 %v1353_v45 }
  0xb4   : > { %696 = vmatmul.mubr.bf16.gmra.mrb[28].mxu0 %v1355_v46  ;;  %760 = vmatmul.mubr.bf16.gmra.mrb[28].mxu1 %v1356_v47 }
 0x14f   : > { %v1102_v48 = vpop.f32.mrb[0].mxu0  ;;  %v1150_v49 = vpop.f32.mrb[0].mxu1 }
 0x150   : > { %v1103_v50 = vpop.f32.mrb[1].mxu0  ;;  %v1151_v51 = vpop.f32.mrb[1].mxu1 }
 0x151   : > { %v1104_v52 = vadd.f32 %v1103_v50, %v1102_v48  ;;  %v1152_v53 = vadd.f32 %v1151_v51, %v1150_v49  ;;  %v1105_v54 = vpop.f32.mrb[2].mxu0  ;;  %v1153_v55 = vpop.f32.mrb[2].mxu1 }
 0x152   : > { %v1106_v56 = vpop.f32.mrb[3].mxu0  ;;  %v1154_v57 = vpop.f32.mrb[3].mxu1 }
 0x153   : > { %867 = vst [vmem:[%s1729_s17] sm:$0xff] %v1104_v52  ;;  %883 = vst [vmem:[%s1729_s17 + $0x80] sm:$0xff] %v1152_v53  ;;  %v1107_v58 = vadd.f32 %v1106_v56, %v1105_v54  ;;  %v1155_v59 = vadd.f32 %v1154_v57, %v1153_v55 }
 0x155   : > { %868 = vst [vmem:[%s1729_s17 + $0x8] sm:$0xff] %v1107_v58  ;;  %884 = vst [vmem:[%s1729_s17 + $0x88] sm:$0xff] %v1155_v59 }
 0x157   : > { %v1108_v60 = vpop.f32.mrb[4].mxu0  ;;  %v1156_v61 = vpop.f32.mrb[4].mxu1 }
 0x158   : > { %v1109_v62 = vpop.f32.mrb[5].mxu0  ;;  %v1157_v63 = vpop.f32.mrb[5].mxu1 }
 0x159   : > { %v1110_v0 = vadd.f32 %v1109_v62, %v1108_v60  ;;  %v1158_v1 = vadd.f32 %v1157_v63, %v1156_v61  ;;  %v1111_v2 = vpop.f32.mrb[6].mxu0  ;;  %v1159_v3 = vpop.f32.mrb[6].mxu1 }
 0x15a   : > { %v1112_v4 = vpop.f32.mrb[7].mxu0  ;;  %v1160_v5 = vpop.f32.mrb[7].mxu1 }
 0x15b   : > { %869 = vst [vmem:[%s1729_s17 + $0x10] sm:$0xff] %v1110_v0  ;;  %885 = vst [vmem:[%s1729_s17 + $0x90] sm:$0xff] %v1158_v1  ;;  %v1113_v6 = vadd.f32 %v1112_v4, %v1111_v2  ;;  %v1161_v7 = vadd.f32 %v1160_v5, %v1159_v3 }
 0x15d   : > { %870 = vst [vmem:[%s1729_s17 + $0x18] sm:$0xff] %v1113_v6  ;;  %886 = vst [vmem:[%s1729_s17 + $0x98] sm:$0xff] %v1161_v7 }
 0x15f   : > { %v1114_v8 = vpop.f32.mrb[8].mxu0  ;;  %v1162_v9 = vpop.f32.mrb[8].mxu1 }
 0x160   : > { %v1115_v10 = vpop.f32.mrb[9].mxu0  ;;  %v1163_v11 = vpop.f32.mrb[9].mxu1 }
 0x161   : > { %v1116_v12 = vadd.f32 %v1115_v10, %v1114_v8  ;;  %v1164_v13 = vadd.f32 %v1163_v11, %v1162_v9  ;;  %v1117_v14 = vpop.f32.mrb[10].mxu0  ;;  %v1165_v15 = vpop.f32.mrb[10].mxu1 }
 0x162   : > { %v1118_v16 = vpop.f32.mrb[11].mxu0  ;;  %v1166_v17 = vpop.f32.mrb[11].mxu1 }
 0x163   : > { %871 = vst [vmem:[%s1729_s17 + $0x20] sm:$0xff] %v1116_v12  ;;  %887 = vst [vmem:[%s1729_s17 + $0xa0] sm:$0xff] %v1164_v13  ;;  %v1119_v18 = vadd.f32 %v1118_v16, %v1117_v14  ;;  %v1167_v19 = vadd.f32 %v1166_v17, %v1165_v15 }
 0x165   : > { %872 = vst [vmem:[%s1729_s17 + $0x28] sm:$0xff] %v1119_v18  ;;  %888 = vst [vmem:[%s1729_s17 + $0xa8] sm:$0xff] %v1167_v19 }
 0x167   : > { %v1120_v20 = vpop.f32.mrb[12].mxu0  ;;  %v1168_v21 = vpop.f32.mrb[12].mxu1 }
 0x168   : > { %v1121_v22 = vpop.f32.mrb[13].mxu0  ;;  %v1169_v23 = vpop.f32.mrb[13].mxu1 }
 0x169   : > { %v1122_v24 = vadd.f32 %v1121_v22, %v1120_v20  ;;  %v1170_v25 = vadd.f32 %v1169_v23, %v1168_v21  ;;  %v1123_v26 = vpop.f32.mrb[14].mxu0  ;;  %v1171_v27 = vpop.f32.mrb[14].mxu1 }
 0x16a   : > { %v1124_v28 = vpop.f32.mrb[15].mxu0  ;;  %v1172_v29 = vpop.f32.mrb[15].mxu1 }
 0x16b   : > { %873 = vst [vmem:[%s1729_s17 + $0x30] sm:$0xff] %v1122_v24  ;;  %889 = vst [vmem:[%s1729_s17 + $0xb0] sm:$0xff] %v1170_v25  ;;  %v1125_v30 = vadd.f32 %v1124_v28, %v1123_v26  ;;  %v1173_v31 = vadd.f32 %v1172_v29, %v1171_v27 }
 0x16d   : > { %874 = vst [vmem:[%s1729_s17 + $0x38] sm:$0xff] %v1125_v30  ;;  %890 = vst [vmem:[%s1729_s17 + $0xb8] sm:$0xff] %v1173_v31 }
 0x16f   : > { %v1126_v32 = vpop.f32.mrb[16].mxu0  ;;  %v1174_v33 = vpop.f32.mrb[16].mxu1 }
 0x170   : > { %v1127_v34 = vpop.f32.mrb[17].mxu0  ;;  %v1175_v35 = vpop.f32.mrb[17].mxu1 }
 0x171   : > { %v1128_v36 = vadd.f32 %v1127_v34, %v1126_v32  ;;  %v1176_v37 = vadd.f32 %v1175_v35, %v1174_v33  ;;  %v1129_v38 = vpop.f32.mrb[18].mxu0  ;;  %v1177_v39 = vpop.f32.mrb[18].mxu1 }
 0x172   : > { %v1130_v40 = vpop.f32.mrb[19].mxu0  ;;  %v1178_v41 = vpop.f32.mrb[19].mxu1 }
 0x173   : > { %875 = vst [vmem:[%s1729_s17 + $0x40] sm:$0xff] %v1128_v36  ;;  %891 = vst [vmem:[%s1729_s17 + $0xc0] sm:$0xff] %v1176_v37  ;;  %v1131_v42 = vadd.f32 %v1130_v40, %v1129_v38  ;;  %v1179_v43 = vadd.f32 %v1178_v41, %v1177_v39 }
 0x175   : > { %876 = vst [vmem:[%s1729_s17 + $0x48] sm:$0xff] %v1131_v42  ;;  %892 = vst [vmem:[%s1729_s17 + $0xc8] sm:$0xff] %v1179_v43 }
 0x177   : > { %v1132_v44 = vpop.f32.mrb[20].mxu0  ;;  %v1180_v45 = vpop.f32.mrb[20].mxu1 }
 0x178   : > { %v1133_v46 = vpop.f32.mrb[21].mxu0  ;;  %v1181_v47 = vpop.f32.mrb[21].mxu1 }
 0x179   : > { %v1134_v48 = vadd.f32 %v1133_v46, %v1132_v44  ;;  %v1182_v49 = vadd.f32 %v1181_v47, %v1180_v45  ;;  %v1135_v50 = vpop.f32.mrb[22].mxu0  ;;  %v1183_v51 = vpop.f32.mrb[22].mxu1 }
 0x17a   : > { %v1136_v52 = vpop.f32.mrb[23].mxu0  ;;  %v1184_v53 = vpop.f32.mrb[23].mxu1 }
 0x17b   : > { %877 = vst [vmem:[%s1729_s17 + $0x50] sm:$0xff] %v1134_v48  ;;  %893 = vst [vmem:[%s1729_s17 + $0xd0] sm:$0xff] %v1182_v49  ;;  %v1137_v54 = vadd.f32 %v1136_v52, %v1135_v50  ;;  %v1185_v55 = vadd.f32 %v1184_v53, %v1183_v51 }
 0x17d   : > { %878 = vst [vmem:[%s1729_s17 + $0x58] sm:$0xff] %v1137_v54  ;;  %894 = vst [vmem:[%s1729_s17 + $0xd8] sm:$0xff] %v1185_v55 }
 0x17f   : > { %v1138_v56 = vpop.f32.mrb[24].mxu0  ;;  %v1186_v57 = vpop.f32.mrb[24].mxu1 }
 0x180   : > { %v1139_v58 = vpop.f32.mrb[25].mxu0  ;;  %v1187_v59 = vpop.f32.mrb[25].mxu1 }
 0x181   : > { %v1140_v60 = vadd.f32 %v1139_v58, %v1138_v56  ;;  %v1188_v61 = vadd.f32 %v1187_v59, %v1186_v57  ;;  %v1141_v62 = vpop.f32.mrb[26].mxu0  ;;  %v1189_v63 = vpop.f32.mrb[26].mxu1 }
 0x182   : > { %v1142_v0 = vpop.f32.mrb[27].mxu0  ;;  %v1190_v1 = vpop.f32.mrb[27].mxu1 }
 0x183   : > { %879 = vst [vmem:[%s1729_s17 + $0x60] sm:$0xff] %v1140_v60  ;;  %895 = vst [vmem:[%s1729_s17 + $0xe0] sm:$0xff] %v1188_v61  ;;  %v1143_v2 = vadd.f32 %v1142_v0, %v1141_v62  ;;  %v1191_v3 = vadd.f32 %v1190_v1, %v1189_v63 }
 0x185   : > { %880 = vst [vmem:[%s1729_s17 + $0x68] sm:$0xff] %v1143_v2  ;;  %896 = vst [vmem:[%s1729_s17 + $0xe8] sm:$0xff] %v1191_v3 }
 0x187   : > { %v1144_v4 = vpop.f32.mrb[28].mxu0  ;;  %v1192_v5 = vpop.f32.mrb[28].mxu1 }
 0x188   : > { %v1145_v6 = vpop.f32.mrb[29].mxu0  ;;  %v1193_v7 = vpop.f32.mrb[29].mxu1 }
 0x189   : > { %v1146_v8 = vadd.f32 %v1145_v6, %v1144_v4  ;;  %v1194_v9 = vadd.f32 %v1193_v7, %v1192_v5  ;;  %v1147_v10 = vpop.f32.mrb[30].mxu0  ;;  %v1195_v11 = vpop.f32.mrb[30].mxu1 }
 0x18a   : > { %v1148_v12 = vpop.f32.mrb[31].mxu0  ;;  %v1196_v13 = vpop.f32.mrb[31].mxu1 }
 0x18b   : > { %881 = vst [vmem:[%s1729_s17 + $0x70] sm:$0xff] %v1146_v8  ;;  %897 = vst [vmem:[%s1729_s17 + $0xf0] sm:$0xff] %v1194_v9  ;;  %v1149_v14 = vadd.f32 %v1148_v12, %v1147_v10  ;;  %v1197_v15 = vadd.f32 %v1196_v13, %v1195_v11 }
 0x18d   : > { %882 = vst [vmem:[%s1729_s17 + $0x78] sm:$0xff] %v1149_v14  ;;  %898 = vst [vmem:[%s1729_s17 + $0xf8] sm:$0xff] %v1197_v15 }
 0x18e   : > { %1428 = shalt.err (!%p1425_p5)
}
 0x18f   : > { %s1429_s30 = scalar_lea.hbm %s1764_s6, 4096  ;;  %s1433_s8 = scalar_lea.hbm %s1821_s2, 8192 }
 0x190   : > { %p1430_p9 = scmp.ne.s32.totalorder %s1764_s6, %s1429_s30  ;;  %p1434_p3 = scmp.lt.u32.totalorder %s1764_s6, %s1821_s2 }
 0x191   : > { %p1435_p7 = scmp.lt.u32.totalorder %s1433_s8, %s1429_s30  ;;  %p1437_p4 = scmp.lt.u32.totalorder %s1429_s30, %s1764_s6 }
 0x192   : > { %p1431_p1 = pnand %p1430_p9, %p1623_p10 }
 0x193   : > { %p1436_p13 = por %p1435_p7, %p1434_p3 }
 0x194   : > { %p1432_p2 = pneg %p1431_p1 }
 0x195   : > { %p1438_p6 = por %p1437_p4, %p1436_p13 }
 0x197   : > { %p1439_p8 = pnand %p1438_p6, %p1432_p2 }
 0x199   : > { %1442 = shalt.err (!%p1439_p8)
}
 0x19a   : > { %s1510_s24 = smov 128   ;;  %s1511_s17 = smov 8  }
 0x19b   : > { %1220 = dma.vmem_to_hbm [thread:$0]  (%p1623_p10), %s1766_s21, 4096, %s1764_s6, %s900_s12, %s1510_s24, %s1510_s24, %s1511_s17  }
 0x19c PF: > { %s929_s19 = sand.u32 1, %s1481_s9   ;;  %p1839_p12 = scmp.ne.s32.totalorder %s1829_s20, 0 }
 0x19d   : > { %p1840_p11 = scmp.ge.s32.totalorder %s1501_s14, 2  ;;  %s930_s4 = scalar_lea.sflag [#allocation5], %s929_s19 }
 0x19f   : > { %p1231_p0 = pnand %p1840_p11, %p1839_p12 }
 0x1a1   : > { %1476 = dma.done.wait (!%p1231_p0), %s930_s4, 4096  }
 0x1a2   : > { %1478 = vsyncadd (!%p1231_p0), %s930_s4, 4294963200  ;;  %s19_s14 = sadd.s32 1, %s1501_s14   ;;  %s1841_s9 = smov %s1485_s10 }
 0x1a3   : > { %p16_p5 = scmp.ge.s32.totalorder %s19_s14, 4   ;;  %s1842_s10 = smov %s1489_s11 }
 0x1a4   : > { %s1843_s11 = smov %s1632_s28  ;;  %s1844_s12 = smov %s1497_s13 }
 0x1a5   : > { %s1845_s13 = smov %s1847_s25  ;;  %18 = sbr.rel (!%p16_p5) target bundleno = 7 (0x7), region = 86 }
 0x1ac   :  { %935 = vsyncpa [#allocation4], 1 }
 0x1ad   :  { %937 = vsyncpa [#allocation4 + $0x1], 1 }
 0x1ae   :  { %938 = vsyncpa [#allocation7], 1 }
 0x1af   :  { %939 = vsyncpa [#allocation5], 1 }
 0x1b0   :  { %941 = vsyncpa [#allocation5 + $0x1], 1 }

// kernel: forward.29
= control target key start
LH: loop header
LB: loop body
LE: loop exit
PB: predicated region body
PF: predicated region fallthrough
CT: control target
= control target key end

     0   :  { %8 = vsyncpa [#allocation3], 0  ;;  %s957_s0 = inlined_call_operand.hbm [shape: f32[2,64,128], index: 0, kind: input, shape index: {}]   ;;  %s958_s1 = inlined_call_operand.hbm [shape: f32[1,1,128], index: 1, kind: input, shape index: {}]   ;;  %s959_s2 = inlined_call_operand.hbm [shape: f32[1,1,128], index: 2, kind: input, shape index: {}]   ;;  %s960_s3 = inlined_call_operand.hbm [shape: f32[2,64,128], index: 3, kind: output, shape index: {}]  }
   0x1   :  { %10 = vsyncpa [#allocation3 + $0x1], 0 }
   0x2   :  { %11 = vsyncpa [#allocation6], 0 }
   0x3   :  { %12 = vsyncpa [#allocation4], 0 }
   0x4   :  { %14 = vsyncpa [#allocation4 + $0x1], 0  ;;  %s710_s12 = smov 0   ;;  %s712_s13 = smov 0  }
   0x5   :  { %s714_s14 = smov 0   ;;  %s716_s15 = smov 0  }
   0x6 LB: > { %s731_s16 = sadd.s32 4294967295, %s680_s15   ;;  %s429_s17 = sadd.s32 4294967294, %s680_s15   ;;  %s680_s15 = sphi %s716_s15, %s985_s15   ;;  %s676_s14 = sphi %s714_s14, %s984_s14   ;;  %s672_s13 = sphi %s712_s13, %s983_s13   ;;  %s668_s12 = sphi %s710_s12, %s982_s12  }
   0x7   : > { %s735_s18 = sadd.s32 1, %s680_s15   ;;  %s27_s19 = sadd.s32 1, %s676_s14 }
   0x8   : > { %s24_s20 = ssub.s32 %s680_s15, %s735_s18  ;;  %p34_p0 = scmp.ne.s32.totalorder %s676_s14, %s672_s13 }
   0x9   : > { %p25_p1 = scmp.eq.s32.totalorder %s24_s20, 0  ;;  %p35_p2 = scmp.eq.s32.totalorder %s680_s15, 0 }
   0xa   : > { %p40_p3 = scmp.ne.s32.totalorder %s672_s13, %s668_s12  ;;  %p961_p4 = scmp.eq.s32.totalorder %s731_s16, 0 }
   0xb   : > { %s747_s21 = scalar_select %p25_p1, %s676_s14, %s27_s19  }
   0xc   : > { %p749_p5 = por %p35_p2, %p34_p0  ;;  %p755_p6 = por %p961_p4, %p40_p3 }
   0xd   : > { %p106_p7 = scmp.eq.s32.totalorder %s731_s16, 1  ;;  %p112_p8 = scmp.eq.s32.totalorder %s429_s17, 1 }
   0xe   : > { %s967_s23 = scalar_select %p755_p6, 1, 0 }
   0xf   : > { %p430_p9 = scmp.ge.s32.totalorder %s680_s15, 1  ;;  %p119_p10 = scmp.lt.s32.totalorder %s680_s15, 3 }
  0x10   : > { %p762_p11 = por %p106_p7, %p34_p0  ;;  %p766_p12 = por %p112_p8, %p40_p3 }
  0x11   : > { %p770_p13 = pnand %p430_p9, %p119_p10  ;;  %s682_s27 = smov [#allocation5]  }
  0x12   : > { %s968_s24 = scalar_select %p762_p11, 1, 0 }
  0x13   : > { %s969_s25 = scalar_select %p766_p12, 1, 0 }
  0x14   : > { %s970_s26 = scalar_select %p770_p13, 1, 0 }
  0x15   : > { %p463_p2 = pneg %p770_p13  ;;  %s132_s28 = sshll.u32 %s682_s27, 4  ;;  %s133_s28 = int_to_ptr.vmem [resolvable:$true] %s132_s28 }
  0x16   : > { %p480_p4 = scmp.lt.s32.totalorder %s680_s15, 2  ;;  %p971_p0 = scmp.eq.s32.totalorder %s731_s16, 0 }
  0x17   : > { %s683_s4 = smov [#allocation7]   ;;  %s524_s8 = scalar_lea.hbm %s958_s1, 16 }
  0x18   : > { %p780_p7 = pnand %p463_p2, %p971_p0  ;;  %p786_p3 = pnand %p480_p4, %p749_p5 }
  0x19   : > { %s143_s5 = sshll.u32 %s683_s4, 4  ;;  %p525_p8 = scmp.ne.s32.totalorder %s958_s1, %s524_s8  ;;  %s790_s5 = int_to_ptr.vmem [resolvable:$true] %s143_s5 }
  0x1a   : > { %s973_s30 = scalar_select %p786_p3, 1, 0 }
  0x1b   : > { %p526_p9 = pneg %p780_p7  ;;  %p531_p10 = scmp.lt.u32.totalorder %s524_s8, %s958_s1 }
  0x1d   : > { %p527_p4 = pnand %p526_p9, %p525_p8 }
  0x1f   : > { %p528_p5 = pneg %p527_p4 }
  0x21   : > { %p533_p2 = pnand %p531_p10, %p528_p5 }
  0x23   : > { %536 = shalt.err (!%p533_p2)
}
  0x24   : > { %s537_s19 = scalar_lea.vmem %s133_s28, 16  ;;  %s544_s20 = scalar_lea.vmem %s133_s28, 32 }
  0x25   : > { %p538_p0 = scmp.ne.s32.totalorder %s133_s28, %s537_s19  ;;  %p545_p11 = scmp.lt.s32.totalorder %s133_s28, %s133_s28 }
  0x26   : > { %p546_p6 = scmp.lt.s32.totalorder %s544_s20, %s537_s19 }
  0x27   : > { %p540_p1 = pnand %p538_p0, %p526_p9 }
  0x28   : > { %p547_p13 = por %p546_p6, %p545_p11 }
  0x29   : > { %p541_p12 = pneg %p540_p1 }
  0x2b   : > { %p548_p3 = pnand %p547_p13, %p541_p12 }
  0x2d   : > { %551 = shalt.err (!%p548_p3)
}
  0x2e   : > { %466 = dma.hbm_to_vmem [thread:$0]  (!%p780_p7), %s958_s1, 16, %s133_s28, [#allocation6]  }
  0x2f   : > { %s154_s4 = sand.u32 1, %s676_s14   ;;  %s552_s8 = scalar_lea.hbm %s959_s2, 16 }
  0x30   : > { %p553_p1 = scmp.ne.s32.totalorder %s959_s2, %s552_s8  ;;  %p559_p12 = scmp.lt.u32.totalorder %s552_s8, %s959_s2 }
  0x32   : > { %p555_p6 = pnand %p553_p1, %p526_p9 }
  0x34   : > { %p556_p11 = pneg %p555_p6 }
  0x36   : > { %p561_p13 = pnand %p559_p12, %p556_p11 }
  0x38   : > { %564 = shalt.err (!%p561_p13)
}
  0x39   : > { %s565_s28 = scalar_lea.vmem %s790_s5, 16  ;;  %s572_s19 = scalar_lea.vmem %s790_s5, 32 }
  0x3a   : > { %p566_p3 = scmp.ne.s32.totalorder %s790_s5, %s565_s28  ;;  %p573_p5 = scmp.lt.s32.totalorder %s790_s5, %s790_s5 }
  0x3b   : > { %p574_p10 = scmp.lt.s32.totalorder %s572_s19, %s565_s28 }
  0x3c   : > { %p568_p8 = pnand %p566_p3, %p526_p9 }
  0x3d   : > { %p575_p2 = por %p574_p10, %p573_p5 }
  0x3e   : > { %p569_p4 = pneg %p568_p8 }
  0x40   : > { %p576_p0 = pnand %p575_p2, %p569_p4 }
  0x42   : > { %579 = shalt.err (!%p576_p0)
}
  0x43   : > { %469 = dma.hbm_to_vmem [thread:$0]  (!%p780_p7), %s959_s2, 16, %s790_s5, [#allocation6]  }
  0x44   : > { %s434_s27 = sshll.u32 %s154_s4, 6  ;;  %s449_s6 = sshll.u32 %s680_s15, 10 }
  0x45   : > { %s845_s9 = scalar_lea.hbm %s957_s0, %s449_s6  ;;  %s158_s29 = scalar_lea.vmem [#allocation2], %s434_s27 }
  0x46   : > { %s165_s10 = sshll.u32 %s158_s29, 4  ;;  %s849_s11 = scalar_lea.sflag [#allocation3], %s154_s4  ;;  %s847_s10 = int_to_ptr.vmem [resolvable:$true] %s165_s10 }
  0x47   : > { %s580_s17 = scalar_lea.hbm %s845_s9, 1024  ;;  %p974_p7 = scmp.ne.s32.totalorder %s973_s30, 0 }
  0x48   : > { %p581_p9 = scmp.ne.s32.totalorder %s845_s9, %s580_s17  ;;  %s585_s19 = scalar_lea.hbm %s957_s0, 2048 }
  0x49   : > { %p582_p1 = pneg %p974_p7  ;;  %p586_p12 = scmp.lt.u32.totalorder %s845_s9, %s957_s0 }
  0x4a   : > { %p587_p13 = scmp.lt.u32.totalorder %s585_s19, %s580_s17  ;;  %p589_p8 = scmp.lt.u32.totalorder %s580_s17, %s845_s9 }
  0x4b   : > { %p583_p6 = pnand %p582_p1, %p581_p9 }
  0x4c   : > { %p588_p3 = por %p587_p13, %p586_p12 }
  0x4d   : > { %p584_p11 = pneg %p583_p6 }
  0x4e   : > { %p590_p4 = por %p589_p8, %p588_p3 }
  0x50   : > { %p591_p5 = pnand %p590_p4, %p584_p11 }
  0x52   : > { %594 = shalt.err (!%p591_p5)
}
  0x53   : > { %s595_s4 = scalar_lea.vmem %s847_s10, 1024  ;;  %s684_s27 = smov [#allocation2]  }
  0x54   : > { %p596_p10 = scmp.ne.s32.totalorder %s847_s10, %s595_s4  ;;  %s600_s6 = sshll.u32 %s684_s27, 4  ;;  %s601_s6 = int_to_ptr.vmem [resolvable:$false] %s600_s6 }
  0x55   : > { %s602_s7 = scalar_lea.vmem %s601_s6, 2048  ;;  %p603_p9 = scmp.lt.s32.totalorder %s847_s10, %s601_s6 }
  0x56   : > { %p598_p2 = pnand %p596_p10, %p582_p1  ;;  %p604_p6 = scmp.lt.s32.totalorder %s602_s7, %s595_s4 }
  0x58   : > { %p599_p0 = pneg %p598_p2  ;;  %p605_p12 = por %p604_p6, %p603_p9 }
  0x5a   : > { %p606_p13 = pnand %p605_p12, %p599_p0 }
  0x5c   : > { %609 = shalt.err (!%p606_p13)
}
  0x5d   : > { %s685_s8 = smov 128   ;;  %s686_s29 = smov 8  }
  0x5e   : > { %473 = dma.hbm_to_vmem [thread:$0]  (!%p974_p7), %s845_s9, 1024, %s847_s10, %s849_s11, %s685_s8, %s685_s8, %s686_s29  }
  0x5f   : > { %p975_p1 = scmp.ne.s32.totalorder %s970_s26, 0 }
  0x60   : > { %s880_s17 = sand.u32 (!%p975_p1), 1, %s672_s13   ;;  %p976_p11 = scmp.ne.s32.totalorder (!%p975_p1), %s967_s23, 0 }
  0x61   : > { %177 = sbr.rel (%p975_p1) target bundleno = 208 (0xd0), region = 32  ;;  %s438_s5 = sshll.u32 (!%p975_p1), %s880_s17, 6 }
  0x62   : > { %s180_s28 = scalar_lea.sflag (!%p975_p1), [#allocation3], %s880_s17  ;;  %s183_s19 = scalar_lea.vmem (!%p975_p1), [#allocation2], %s438_s5 }
  0x68   : > { %655 = dma.done.wait (%p976_p11), %s180_s28, 1024  }
  0x69   : > { %657 = vsyncadd (%p976_p11), %s180_s28, 4294966272  ;;  %p977_p7 = scmp.eq.s32.totalorder %s731_s16, 0 }
  0x6b   : > { %659 = dma.done.wait (%p977_p7), [#allocation6], 32   ;;  %p978_p3 = pmov %p977_p7 }
  0x6c   : > { %v214_v0 = vld [vmem:[%s183_s19] sm:$0xff]  ;;  %v215_v1 = vld [vmem:[%s183_s19 + $0x8] sm:$0xff]  ;;  %v216_v2 = vld [vmem:[%s183_s19 + $0x10] sm:$0xff]  ;;  %s896_s23 = scalar_lea.vmem [#allocation8], %s438_s5  ;;  %s450_s30 = sshll.u32 %s731_s16, 10 }
  0x6d   : > { %661 = vsyncadd (%p978_p3), [#allocation6], 4294967264  ;;  %v222_v3 = vadd.f32 %v215_v1, %v214_v0  ;;  %v217_v4 = vld [vmem:[%s183_s19 + $0x18] sm:$0xff]  ;;  %v218_v6 = vld [vmem:[%s183_s19 + $0x20] sm:$0xff]  ;;  %s337_s26 = sshll.u32 %s896_s23, 4  ;;  %s905_s10 = scalar_lea.hbm %s960_s3, %s450_s30  ;;  %s900_s26 = int_to_ptr.vmem [resolvable:$true] %s337_s26 }
  0x6e   : > { %v219_v8 = vld [vmem:[%s183_s19 + $0x28] sm:$0xff]  ;;  %v220_v10 = vld [vmem:[%s183_s19 + $0x30] sm:$0xff]  ;;  %v221_v12 = vld [vmem:[%s183_s19 + $0x38] sm:$0xff]  ;;  %s324_s11 = scalar_lea.sflag [#allocation4], %s880_s17  ;;  %s610_s20 = scalar_lea.vmem %s900_s26, 1024 }
  0x6f   : > { %v223_v5 = vadd.f32 %v222_v3, %v216_v2  ;;  %v442_v54 = vld [vmem:[#allocation5] ss:$0 sm:$0xff]  ;;  %v443_v59 = vld [vmem:[#allocation7] ss:$0 sm:$0xff]  ;;  %p611_p8 = scmp.ne.s32.totalorder %s900_s26, %s610_s20  ;;  %p979_p4 = scmp.ne.s32.totalorder %s968_s24, 0 }
  0x70   : > { %s687_s22 = smov [#allocation8]  }
  0x71   : > { %v224_v7 = vadd.f32 %v223_v5, %v217_v4  ;;  %p612_p5 = pnand %p611_p8, %p979_p4  ;;  %s614_s4 = sshll.u32 %s687_s22, 4  ;;  %s615_s4 = int_to_ptr.vmem [resolvable:$false] %s614_s4 }
  0x72   : > { %s616_s27 = scalar_lea.vmem %s615_s4, 2048  ;;  %p617_p2 = scmp.lt.s32.totalorder %s900_s26, %s615_s4 }
  0x73   : > { %v225_v9 = vadd.f32 %v224_v7, %v218_v6  ;;  %p613_p10 = pneg %p612_p5  ;;  %p618_p0 = scmp.lt.s32.totalorder %s616_s27, %s610_s20 }
  0x75   : > { %v226_v11 = vadd.f32 %v225_v9, %v219_v8  ;;  %p619_p9 = por %p618_p0, %p617_p2 }
  0x77   : > { %v227_v13 = vadd.f32 %v226_v11, %v220_v10  ;;  %p620_p6 = pnand %p619_p9, %p613_p10 }
  0x79   : > { %v228_v14 = vadd.f32 %v227_v13, %v221_v12 }
  0x7b   : > { %v229_v15 = vrot.slane %v228_v14, 4 }
  0x7d   : > { %v230_v16 = vadd.f32 %v229_v15, %v228_v14 }
  0x7f   : > { %v231_v17 = vrot.slane %v230_v16, 2 }
  0x81   : > { %v232_v18 = vadd.f32 %v231_v17, %v230_v16 }
  0x83   : > { %v233_v19 = vrot.slane %v232_v18, 1 }
  0x85   : > { %v234_v20 = vadd.f32 %v233_v19, %v232_v18 }
  0x87   : > { %v236_v21 = vmul.f32 0.015625, %v234_v20 }
  0x89   : > { %v237_v22 = vsub.f32 %v214_v0, %v236_v21  ;;  %v238_v23 = vsub.f32 %v215_v1, %v236_v21  ;;  %v239_v24 = vsub.f32 %v216_v2, %v236_v21  ;;  %v240_v25 = vsub.f32 %v217_v4, %v236_v21 }
  0x8a   : > { %v241_v26 = vsub.f32 %v218_v6, %v236_v21  ;;  %v242_v30 = vsub.f32 %v219_v8, %v236_v21  ;;  %v243_v33 = vsub.f32 %v220_v10, %v236_v21  ;;  %v244_v36 = vsub.f32 %v221_v12, %v236_v21 }
  0x8b   : > { %v245_v27 = vmul.f32 %v237_v22, %v237_v22  ;;  %v246_v28 = vmul.f32 %v238_v23, %v238_v23  ;;  %v247_v29 = vmul.f32 %v239_v24, %v239_v24  ;;  %v248_v31 = vmul.f32 %v240_v25, %v240_v25 }
  0x8c   : > { %v249_v34 = vmul.f32 %v241_v26, %v241_v26  ;;  %v250_v37 = vmul.f32 %v242_v30, %v242_v30  ;;  %v251_v39 = vmul.f32 %v243_v33, %v243_v33  ;;  %v252_v41 = vmul.f32 %v244_v36, %v244_v36 }
  0x8d   : > { %v253_v32 = vadd.f32 %v246_v28, %v245_v27 }
  0x8f   : > { %v254_v35 = vadd.f32 %v253_v32, %v247_v29 }
  0x91   : > { %v255_v38 = vadd.f32 %v254_v35, %v248_v31 }
  0x93   : > { %v256_v40 = vadd.f32 %v255_v38, %v249_v34 }
  0x95   : > { %v257_v42 = vadd.f32 %v256_v40, %v250_v37 }
  0x97   : > { %v258_v43 = vadd.f32 %v257_v42, %v251_v39 }
  0x99   : > { %v259_v44 = vadd.f32 %v258_v43, %v252_v41 }
  0x9b   : > { %v260_v45 = vrot.slane %v259_v44, 4 }
  0x9d   : > { %v261_v46 = vadd.f32 %v260_v45, %v259_v44 }
  0x9f   : > { %v262_v47 = vrot.slane %v261_v46, 2 }
  0xa1   : > { %v263_v48 = vadd.f32 %v262_v47, %v261_v46 }
  0xa3   : > { %v264_v49 = vrot.slane %v263_v48, 1 }
  0xa5   : > { %v265_v50 = vadd.f32 %v264_v49, %v263_v48 }
  0xa7   : > { %v266_v51 = vmul.f32 0.015625, %v265_v50 }
  0xa9   : > { %v267_v52 = vadd.f32 1e-05, %v266_v51 }
  0xab   : > { %522 = vrsqrt.f32 %v267_v52 }
  0xb5   : > { %v523_v53 = vpop.eup %522 }
  0xb6   : > { %v269_v55 = vmul.f32 %v523_v53, %v237_v22  ;;  %v270_v56 = vmul.f32 %v523_v53, %v238_v23  ;;  %v271_v57 = vmul.f32 %v523_v53, %v239_v24  ;;  %v272_v58 = vmul.f32 %v523_v53, %v240_v25 }
  0xb7   : > { %v273_v60 = vmul.f32 %v523_v53, %v241_v26  ;;  %v274_v61 = vmul.f32 %v523_v53, %v242_v30  ;;  %v275_v62 = vmul.f32 %v523_v53, %v243_v33  ;;  %v276_v63 = vmul.f32 %v523_v53, %v244_v36 }
  0xb8   : > { %v284_v0 = vmul.f32 %v442_v54, %v269_v55  ;;  %v285_v1 = vmul.f32 %v442_v54, %v270_v56  ;;  %v286_v2 = vmul.f32 %v442_v54, %v271_v57  ;;  %v287_v3 = vmul.f32 %v442_v54, %v272_v58 }
  0xb9   : > { %v288_v4 = vmul.f32 %v442_v54, %v273_v60  ;;  %v289_v5 = vmul.f32 %v442_v54, %v274_v61  ;;  %v290_v6 = vmul.f32 %v442_v54, %v275_v62  ;;  %v291_v7 = vmul.f32 %v442_v54, %v276_v63 }
  0xba   : > { %v299_v8 = vadd.f32 %v443_v59, %v284_v0  ;;  %v300_v9 = vadd.f32 %v443_v59, %v285_v1  ;;  %v301_v10 = vadd.f32 %v443_v59, %v286_v2  ;;  %v302_v11 = vadd.f32 %v443_v59, %v287_v3 }
  0xbb   : > { %v303_v12 = vadd.f32 %v443_v59, %v288_v4  ;;  %v304_v13 = vadd.f32 %v443_v59, %v289_v5  ;;  %v305_v14 = vadd.f32 %v443_v59, %v290_v6  ;;  %v306_v15 = vadd.f32 %v443_v59, %v291_v7 }
  0xbc   : > { %v307_v16 = vmax.f32 %v299_v8, 0.0  ;;  %v308_v17 = vmax.f32 %v300_v9, 0.0  ;;  %v309_v18 = vmax.f32 %v301_v10, 0.0  ;;  %v310_v19 = vmax.f32 %v302_v11, 0.0 }
  0xbd   : > { %v311_v20 = vmax.f32 %v303_v12, 0.0  ;;  %v312_v21 = vmax.f32 %v304_v13, 0.0  ;;  %v313_v22 = vmax.f32 %v305_v14, 0.0  ;;  %v314_v23 = vmax.f32 %v306_v15, 0.0 }
  0xbe   : > { %315 = vst [vmem:[%s896_s23] sm:$0xff] %v307_v16  ;;  %316 = vst [vmem:[%s896_s23 + $0x8] sm:$0xff] %v308_v17 }
  0xbf   : > { %317 = vst [vmem:[%s896_s23 + $0x10] sm:$0xff] %v309_v18  ;;  %318 = vst [vmem:[%s896_s23 + $0x18] sm:$0xff] %v310_v19 }
  0xc0   : > { %319 = vst [vmem:[%s896_s23 + $0x20] sm:$0xff] %v311_v20  ;;  %320 = vst [vmem:[%s896_s23 + $0x28] sm:$0xff] %v312_v21 }
  0xc1   : > { %321 = vst [vmem:[%s896_s23 + $0x30] sm:$0xff] %v313_v22  ;;  %322 = vst [vmem:[%s896_s23 + $0x38] sm:$0xff] %v314_v23 }
  0xc2   : > { %623 = shalt.err (!%p620_p6)
}
  0xc3   : > { %s624_s6 = scalar_lea.hbm %s905_s10, 1024  ;;  %s628_s29 = scalar_lea.hbm %s960_s3, 2048 }
  0xc4   : > { %p625_p12 = scmp.ne.s32.totalorder %s905_s10, %s624_s6  ;;  %p629_p11 = scmp.lt.u32.totalorder %s905_s10, %s960_s3 }
  0xc5   : > { %p630_p7 = scmp.lt.u32.totalorder %s628_s29, %s624_s6  ;;  %p632_p8 = scmp.lt.u32.totalorder %s624_s6, %s905_s10 }
  0xc6   : > { %p626_p13 = pnand %p625_p12, %p979_p4 }
  0xc7   : > { %p631_p3 = por %p630_p7, %p629_p11 }
  0xc8   : > { %p627_p1 = pneg %p626_p13 }
  0xc9   : > { %p633_p5 = por %p632_p8, %p631_p3 }
  0xcb   : > { %p634_p10 = pnand %p633_p5, %p627_p1 }
  0xcd   : > { %637 = shalt.err (!%p634_p10)
}
  0xce   : > { %s688_s19 = smov 128   ;;  %s689_s23 = smov 8  }
  0xcf   : > { %461 = dma.vmem_to_hbm [thread:$0]  (%p979_p4), %s900_s26, 1024, %s905_s10, %s324_s11, %s688_s19, %s688_s19, %s689_s23  }
  0xd0 PF: > { %s352_s30 = sand.u32 1, %s668_s12   ;;  %p980_p2 = scmp.ne.s32.totalorder %s969_s25, 0 }
  0xd1   : > { %p981_p0 = scmp.ge.s32.totalorder %s680_s15, 2  ;;  %s353_s16 = scalar_lea.sflag [#allocation4], %s352_s30 }
  0xd3   : > { %p475_p9 = pnand %p981_p0, %p980_p2 }
  0xd5   : > { %663 = dma.done.wait (!%p475_p9), %s353_s16, 1024  }
  0xd6   : > { %665 = vsyncadd (!%p475_p9), %s353_s16, 4294966272  ;;  %p17_p6 = scmp.ge.s32.totalorder %s735_s18, 4   ;;  %s982_s12 = smov %s672_s13 }
  0xd7   : > { %s983_s13 = smov %s676_s14  ;;  %s984_s14 = smov %s747_s21 }
  0xd8   : > { %s985_s15 = smov %s735_s18  ;;  %19 = sbr.rel (!%p17_p6) target bundleno = 6 (0x6), region = 85 }
  0xdf   :  { %358 = vsyncpa [#allocation3], 1 }
  0xe0   :  { %360 = vsyncpa [#allocation3 + $0x1], 1 }
  0xe1   :  { %361 = vsyncpa [#allocation6], 1 }
  0xe2   :  { %362 = vsyncpa [#allocation4], 1 }
  0xe3   :  { %364 = vsyncpa [#allocation4 + $0x1], 1 }

// kernel: forward.28
= control target key start
LH: loop header
LB: loop body
LE: loop exit
PB: predicated region body
PF: predicated region fallthrough
CT: control target
= control target key end

     0   :  { %7 = vsyncpa [#allocation4], 0  ;;  %s1248_s0 = inlined_call_operand.hbm [shape: bf16[128,1152], index: 0, kind: input, shape index: {}]   ;;  %s1249_s1 = inlined_call_operand.hbm [shape: bf16[1152,128], index: 1, kind: input, shape index: {}]   ;;  %s1250_s2 = inlined_call_operand.hbm [shape: f32[128,128], index: 2, kind: output, shape index: {}]  }
   0x1   :  { %9 = vsyncpa [#allocation4 + $0x1], 0 }
   0x2   :  { %10 = vsyncpa [#allocation7], 0 }
   0x3   :  { %12 = vsyncpa [#allocation7 + $0x1], 0 }
   0x4   :  { %13 = vsyncpa [#allocation5], 0  ;;  %s1019_s9 = smov 0   ;;  %s1021_s10 = smov 0  }
   0x5   :  { %s1023_s11 = smov 0   ;;  %s1025_s12 = smov 0  }
   0x6   :  { %s1027_s13 = smov 0   ;;  %s1029_s14 = smov 0  }
   0x7 LB: > { %s662_s15 = sadd.s32 4294967295, %s993_s14   ;;  %s31_s16 = sadd.s32 1, %s989_s13  ;;  %s993_s14 = sphi %s1029_s14, %s19_s14   ;;  %s989_s13 = sphi %s1027_s13, %s1263_s13   ;;  %s985_s12 = sphi %s1025_s12, %s1262_s12   ;;  %s981_s11 = sphi %s1023_s11, %s1261_s11   ;;  %s977_s10 = sphi %s1021_s10, %s1260_s10   ;;  %s973_s9 = sphi %s1019_s9, %s1259_s9  }
   0x8   : > { %p32_p0 = scmp.ge.s32.totalorder %s31_s16, 9  ;;  %s47_s17 = sadd.s32 1, %s981_s11 }
   0x9   : > { %p54_p1 = scmp.ne.s32.totalorder %s981_s11, %s977_s10  ;;  %p55_p2 = scmp.eq.s32.totalorder %s993_s14, 0 }
   0xa   : > { %s1265_s16 = smov (%p32_p0, %s31_s16), 0  ;;  %p60_p4 = scmp.ne.s32.totalorder %s977_s10, %s973_s9 }
   0xb   : > { %p1055_p3 = por %p55_p2, %p54_p1  ;;  %s43_s19 = ssub.s32 %s989_s13, %s1265_s16 }
   0xc   : > { %p61_p5 = scmp.eq.s32.totalorder %s662_s15, 0  ;;  %p45_p6 = scmp.eq.s32.totalorder %s43_s19, 0 }
   0xd   : > { %p775_p8 = scmp.lt.s32.totalorder %s993_s14, 9  ;;  %s1073_s22 = sand.u32 1, %s981_s11  }
   0xe   : > { %p1064_p7 = por %p61_p5, %p60_p4  ;;  %s666_s23 = sshll.u32 %s989_s13, 6 }
   0xf   : > { %s1070_s21 = scalar_select %p45_p6, %s981_s11, %s47_s17  }
  0x10   : > { %s1253_s20 = scalar_select %p1064_p7, 1, 0 }
  0x11   : > { %s665_s24 = sshll.u32 %s1073_s22, 6  ;;  %s1080_s27 = scalar_lea.hbm %s1248_s0, %s666_s23 }
  0x12   : > { %s144_s28 = scalar_lea.vmem [#allocation3], %s665_s24  ;;  %p1086_p9 = pnand %p775_p8, %p1055_p3 }
  0x13   : > { %s153_s29 = sshll.u32 %s144_s28, 4  ;;  %s141_s3 = scalar_lea.sflag [#allocation4], %s1073_s22  ;;  %s1090_s29 = int_to_ptr.vmem [resolvable:$true] %s153_s29 }
  0x14   : > { %s849_s4 = scalar_lea.hbm %s1080_s27, 1024  ;;  %p851_p12 = pneg %p1086_p9 }
  0x15   : > { %p850_p11 = scmp.ne.s32.totalorder %s1080_s27, %s849_s4  ;;  %s854_s7 = scalar_lea.hbm %s1248_s0, 9216 }
  0x16   : > { %p855_p1 = scmp.lt.u32.totalorder %s1080_s27, %s1248_s0  ;;  %p856_p2 = scmp.lt.u32.totalorder %s854_s7, %s849_s4 }
  0x17   : > { %p852_p13 = pnand %p851_p12, %p850_p11  ;;  %p858_p4 = scmp.lt.u32.totalorder %s849_s4, %s1080_s27 }
  0x18   : > { %p857_p3 = por %p856_p2, %p855_p1 }
  0x19   : > { %p853_p0 = pneg %p852_p13 }
  0x1a   : > { %p859_p5 = por %p858_p4, %p857_p3 }
  0x1c   : > { %p860_p6 = pnand %p859_p5, %p853_p0 }
  0x1e   : > { %863 = shalt.err (!%p860_p6)
}
  0x1f   : > { %s864_s17 = scalar_lea.vmem %s1090_s29, 1024  ;;  %s995_s18 = smov [#allocation3]  }
  0x20   : > { %p865_p8 = scmp.ne.s32.totalorder %s1090_s29, %s864_s17  ;;  %s869_s19 = sshll.u32 %s995_s18, 4  ;;  %s870_s19 = int_to_ptr.vmem [resolvable:$false] %s869_s19 }
  0x21   : > { %s871_s23 = scalar_lea.vmem %s870_s19, 2048  ;;  %p872_p10 = scmp.lt.s32.totalorder %s1090_s29, %s870_s19 }
  0x22   : > { %p867_p11 = pnand %p865_p8, %p851_p12  ;;  %p873_p1 = scmp.lt.s32.totalorder %s871_s23, %s864_s17 }
  0x24   : > { %p868_p13 = pneg %p867_p11  ;;  %p874_p2 = por %p873_p1, %p872_p10 }
  0x26   : > { %p875_p3 = pnand %p874_p2, %p868_p13 }
  0x28   : > { %878 = shalt.err (!%p875_p3)
}
  0x29   : > { %s996_s25 = smov 576   ;;  %s997_s26 = smov 64  }
  0x2a   : > { %s998_s28 = smov 4   ;;  %p183_p10 = scmp.lt.s32.totalorder %s993_s14, 10 }
  0x2b   : > { %771 = dma.hbm_to_vmem [thread:$0]  (!%p1086_p9), %s1080_s27, 1024, %s1090_s29, %s141_s3, %s996_s25, %s997_s26, %s998_s28  }
  0x2c   : > { %s695_s4 = sshll.u32 %s989_s13, 10  ;;  %p1255_p0 = scmp.ge.s32.totalorder %s993_s14, 1 }
  0x2d   : > { %s1134_s8 = scalar_lea.hbm %s1249_s1, %s695_s4  ;;  %s167_s9 = scalar_lea.vmem [#allocation6], %s665_s24 }
  0x2e   : > { %p1127_p4 = pnand %p1255_p0, %p183_p10  ;;  %s175_s17 = sshll.u32 %s167_s9, 4  ;;  %s1138_s17 = int_to_ptr.vmem [resolvable:$true] %s175_s17 }
  0x2f   : > { %s164_s27 = scalar_lea.sflag [#allocation7], %s1073_s22  ;;  %s879_s29 = scalar_lea.hbm %s1134_s8, 1024 }
  0x30   : > { %p880_p5 = scmp.ne.s32.totalorder %s1134_s8, %s879_s29  ;;  %s884_s19 = scalar_lea.hbm %s1249_s1, 9216 }
  0x31   : > { %p885_p11 = scmp.lt.u32.totalorder %s1134_s8, %s1249_s1  ;;  %p886_p13 = scmp.lt.u32.totalorder %s884_s19, %s879_s29 }
  0x32   : > { %p882_p6 = pnand %p880_p5, %p851_p12  ;;  %p888_p2 = scmp.lt.u32.totalorder %s879_s29, %s1134_s8 }
  0x33   : > { %p887_p1 = por %p886_p13, %p885_p11 }
  0x34   : > { %p883_p8 = pneg %p882_p6 }
  0x35   : > { %p889_p3 = por %p888_p2, %p887_p1 }
  0x37   : > { %p890_p10 = pnand %p889_p3, %p883_p8 }
  0x39   : > { %893 = shalt.err (!%p890_p10)
}
  0x3a   : > { %s894_s24 = scalar_lea.vmem %s1138_s17, 1024  ;;  %s999_s4 = smov [#allocation6]  }
  0x3b   : > { %p895_p0 = scmp.ne.s32.totalorder %s1138_s17, %s894_s24  ;;  %s899_s6 = sshll.u32 %s999_s4, 4  ;;  %s900_s6 = int_to_ptr.vmem [resolvable:$false] %s899_s6 }
  0x3c   : > { %s901_s7 = scalar_lea.vmem %s900_s6, 2048  ;;  %p902_p7 = scmp.lt.s32.totalorder %s1138_s17, %s900_s6 }
  0x3d   : > { %p897_p5 = pnand %p895_p0, %p851_p12  ;;  %p903_p11 = scmp.lt.s32.totalorder %s901_s7, %s894_s24 }
  0x3f   : > { %p898_p6 = pneg %p897_p5  ;;  %p904_p13 = por %p903_p11, %p902_p7 }
  0x41   : > { %p905_p1 = pnand %p904_p13, %p898_p6 }
  0x43   : > { %908 = shalt.err (!%p905_p1)
}
  0x44   : > { %774 = dma.hbm_to_vmem [thread:$0]  (!%p1086_p9), %s1134_s8, 1024, %s1138_s17, %s164_s27, %s997_s26, %s997_s26, %s998_s28  }
  0x45   : > { %187 = sbr.rel (%p1127_p4) target bundleno = 383 (0x17f), region = 28  ;;  %s189_s9 = sand.u32 (!%p1127_p4), 1, %s977_s10  }
  0x46   : > { %s671_s29 = sshll.u32 (!%p1127_p4), %s189_s9, 6  ;;  %s190_s3 = scalar_lea.sflag (!%p1127_p4), [#allocation4], %s189_s9 }
  0x47   : > { %s1172_s18 = scalar_lea.vmem (!%p1127_p4), [#allocation3], %s671_s29  ;;  %p1257_p7 = scmp.ne.s32.totalorder (!%p1127_p4), %s1253_s20, 0 }
  0x4c   : > { %960 = dma.done.wait (%p1257_p7), %s190_s3, 1024  }
  0x4d   : > { %962 = vsyncadd (%p1257_p7), %s190_s3, 4294966272  ;;  %s199_s22 = scalar_lea.sflag [#allocation7], %s189_s9  ;;  %s1178_s30 = scalar_lea.vmem [#allocation6], %s671_s29 }
  0x4e   : > { %964 = dma.done.wait (%p1257_p7), %s199_s22, 1024  }
  0x4f   : > { %966 = vsyncadd (%p1257_p7), %s199_s22, 4294966272  ;;  %p673_p9 = scmp.ne.s32.totalorder %s985_s12, 0 }
  0x50   : > { %v1000_v0 = vmov (!%p673_p9), 0.0  }
  0x51   : > { %230 = sbr.rel (%p673_p9) target bundleno = 89 (0x59), region = 40  ;;  %231 = vst [vmem:[#allocation2] sm:$0xff] (!%p673_p9), %v1000_v0  ;;  %232 = vst [vmem:[#allocation2 + $0x8] sm:$0xff] (!%p673_p9), %v1000_v0 }
  0x52   : > { %233 = vst [vmem:[#allocation2 + $0x10] sm:$0xff] (!%p673_p9), %v1000_v0  ;;  %234 = vst [vmem:[#allocation2 + $0x18] sm:$0xff] (!%p673_p9), %v1000_v0 }
  0x53   : > { %235 = vst [vmem:[#allocation2 + $0x20] sm:$0xff] (!%p673_p9), %v1000_v0  ;;  %236 = vst [vmem:[#allocation2 + $0x28] sm:$0xff] (!%p673_p9), %v1000_v0 }
  0x54   : > { %237 = vst [vmem:[#allocation2 + $0x30] sm:$0xff] (!%p673_p9), %v1000_v0  ;;  %238 = vst [vmem:[#allocation2 + $0x38] sm:$0xff] (!%p673_p9), %v1000_v0 }
  0x55   : > { %239 = vst [vmem:[#allocation2 + $0x40] sm:$0xff] (!%p673_p9), %v1000_v0  ;;  %240 = vst [vmem:[#allocation2 + $0x48] sm:$0xff] (!%p673_p9), %v1000_v0 }
  0x56   : > { %241 = vst [vmem:[#allocation2 + $0x50] sm:$0xff] (!%p673_p9), %v1000_v0  ;;  %242 = vst [vmem:[#allocation2 + $0x58] sm:$0xff] (!%p673_p9), %v1000_v0 }
  0x57   : > { %243 = vst [vmem:[#allocation2 + $0x60] sm:$0xff] (!%p673_p9), %v1000_v0  ;;  %244 = vst [vmem:[#allocation2 + $0x68] sm:$0xff] (!%p673_p9), %v1000_v0 }
  0x58   : > { %245 = vst [vmem:[#allocation2 + $0x70] sm:$0xff] %v1000_v0  ;;  %246 = vst [vmem:[#allocation2 + $0x78] sm:$0xff] %v1000_v0 }
  0x59 PF: > { %v833_v1 = vld [vmem:[%s1178_s30] sm:$0xff]   ;;  %v834_v2 = vld [vmem:[%s1178_s30 + $0x8] sm:$0xff]   ;;  %v835_v3 = vld [vmem:[%s1178_s30 + $0x10] sm:$0xff]   ;;  %p690_p12 = scmp.ne.s32.totalorder %s985_s12, 8 }
  0x5a   : > { %712 = vmatprep.subr.bf16.mxu0 %v833_v1  ;;  %744 = vmatprep.subr.bf16.mxu1 %v833_v1  ;;  %v836_v4 = vld [vmem:[%s1178_s30 + $0x18] sm:$0xff]   ;;  %v841_v5 = vld [vmem:[%s1172_s18] sm:$0xff]   ;;  %v838_v8 = vld [vmem:[%s1178_s30 + $0x28] sm:$0xff]  }
  0x5b   : > { %713 = vmatpush3.bf16.msra.mxu0 %v833_v1  ;;  %752 = vmatpush3.bf16.msra.mxu1 %v833_v1  ;;  %v842_v6 = vld [vmem:[%s1172_s18 + $0x20] sm:$0xff]   ;;  %v839_v9 = vld [vmem:[%s1178_s30 + $0x30] sm:$0xff]   ;;  %v840_v10 = vld [vmem:[%s1178_s30 + $0x38] sm:$0xff]  }
  0x5c   : > { %714 = vmatprep.subr.bf16.mxu0 %v834_v2  ;;  %745 = vmatprep.subr.bf16.mxu1 %v834_v2  ;;  %v837_v7 = vld [vmem:[%s1178_s30 + $0x20] sm:$0xff]   ;;  %v843_v11 = vld [vmem:[%s1172_s18 + $0x8] sm:$0xff]   ;;  %v845_v13 = vld [vmem:[%s1172_s18 + $0x10] sm:$0xff]  }
  0x5d   : > { %728 = vmatprep.mubr.bf16.mxu0 %v841_v5  ;;  %736 = vmatprep.mubr.bf16.mxu1 %v842_v6  ;;  %v844_v12 = vld [vmem:[%s1172_s18 + $0x28] sm:$0xff]   ;;  %v846_v14 = vld [vmem:[%s1172_s18 + $0x30] sm:$0xff]   ;;  %v847_v15 = vld [vmem:[%s1172_s18 + $0x18] sm:$0xff]  }
  0x5e   : > { %v848_v16 = vld [vmem:[%s1172_s18 + $0x38] sm:$0xff]   ;;  %v249_v17 = vld [vmem:[#allocation2 + $0x10] sm:$0xff]  ;;  %v247_v19 = vld [vmem:[#allocation2] sm:$0xff] }
  0x5f   : > { %715 = vmatpush3.bf16.msra.mxu0 %v834_v2  ;;  %753 = vmatpush3.bf16.msra.mxu1 %v834_v2  ;;  %v257_v18 = vld [vmem:[#allocation2 + $0x50] sm:$0xff]  ;;  %v255_v20 = vld [vmem:[#allocation2 + $0x40] sm:$0xff]  ;;  %v250_v23 = vld [vmem:[#allocation2 + $0x18] sm:$0xff] }
  0x60   : > { %716 = vmatprep.subr.bf16.mxu0 %v835_v3  ;;  %746 = vmatprep.subr.bf16.mxu1 %v835_v3  ;;  %v258_v24 = vld [vmem:[#allocation2 + $0x58] sm:$0xff]  ;;  %v248_v29 = vld [vmem:[#allocation2 + $0x8] sm:$0xff]  ;;  %v253_v41 = vld [vmem:[#allocation2 + $0x30] sm:$0xff] }
  0x61   : > { %v256_v30 = vld [vmem:[#allocation2 + $0x48] sm:$0xff]  ;;  %v261_v42 = vld [vmem:[#allocation2 + $0x70] sm:$0xff]  ;;  %v251_v43 = vld [vmem:[#allocation2 + $0x20] sm:$0xff] }
  0x62   : > { %v259_v44 = vld [vmem:[#allocation2 + $0x60] sm:$0xff]  ;;  %v254_v47 = vld [vmem:[#allocation2 + $0x38] sm:$0xff]  ;;  %v252_v53 = vld [vmem:[#allocation2 + $0x28] sm:$0xff] }
  0x63   : > { %717 = vmatpush3.bf16.msra.mxu0 %v835_v3  ;;  %754 = vmatpush3.bf16.msra.mxu1 %v835_v3  ;;  %v262_v48 = vld [vmem:[#allocation2 + $0x78] sm:$0xff]  ;;  %v260_v54 = vld [vmem:[#allocation2 + $0x68] sm:$0xff] }
  0x64   : > { %718 = vmatprep.subr.bf16.mxu0 %v836_v4  ;;  %747 = vmatprep.subr.bf16.mxu1 %v836_v4 }
  0x67   : > { %719 = vmatpush3.bf16.msra.mxu0 %v836_v4  ;;  %755 = vmatpush3.bf16.msra.mxu1 %v836_v4 }
  0x68   : > { %720 = vmatprep.subr.bf16.mxu0 %v837_v7  ;;  %748 = vmatprep.subr.bf16.mxu1 %v837_v7 }
  0x6b   : > { %721 = vmatpush3.bf16.msra.mxu0 %v837_v7  ;;  %756 = vmatpush3.bf16.msra.mxu1 %v837_v7 }
  0x6c   : > { %722 = vmatprep.subr.bf16.mxu0 %v838_v8  ;;  %749 = vmatprep.subr.bf16.mxu1 %v838_v8 }
  0x6f   : > { %723 = vmatpush3.bf16.msra.mxu0 %v838_v8  ;;  %757 = vmatpush3.bf16.msra.mxu1 %v838_v8 }
  0x70   : > { %724 = vmatprep.subr.bf16.mxu0 %v839_v9  ;;  %750 = vmatprep.subr.bf16.mxu1 %v839_v9 }
  0x73   : > { %725 = vmatpush3.bf16.msra.mxu0 %v839_v9  ;;  %758 = vmatpush3.bf16.msra.mxu1 %v839_v9 }
  0x74   : > { %726 = vmatprep.subr.bf16.mxu0 %v840_v10  ;;  %751 = vmatprep.subr.bf16.mxu1 %v840_v10 }
  0x77   : > { %727 = vmatpush3.bf16.msra.mxu0 %v840_v10  ;;  %759 = vmatpush3.bf16.msra.mxu1 %v840_v10 }
  0x7a   : > { %729 = vmatmul.mubr.bf16.vlgmr.msra.gmra.mrb[0].mxu0 %v843_v11  ;;  %737 = vmatmul.mubr.bf16.vlgmr.msra.gmra.mrb[0].mxu1 %v844_v12 }
  0x7b   : > { %732 = vmatprep.mubr.bf16.mxu0 %v845_v13  ;;  %740 = vmatprep.mubr.bf16.mxu1 %v846_v14 }
  0x82   : > { %733 = vmatmul.mubr.bf16.gmra.mrb[4].mxu0 %v847_v15  ;;  %741 = vmatmul.mubr.bf16.gmra.mrb[4].mxu1 %v848_v16 }
 0x14d   : > { %v730_v21 = vpop.f32.mrb[0].mxu0  ;;  %v738_v22 = vpop.f32.mrb[0].mxu1 }
 0x14e   : > { %v490_v25 = vadd.f32 %v730_v21, %v249_v17  ;;  %v498_v26 = vadd.f32 %v738_v22, %v257_v18  ;;  %v425_v27 = vpop.f32.mrb[1].mxu0  ;;  %v457_v28 = vpop.f32.mrb[1].mxu1 }
 0x14f   : > { %v488_v31 = vadd.f32 %v425_v27, %v247_v19  ;;  %v496_v32 = vadd.f32 %v457_v28, %v255_v20  ;;  %v731_v33 = vpop.f32.mrb[2].mxu0  ;;  %v739_v34 = vpop.f32.mrb[2].mxu1 }
 0x150   : > { %506 = vst [vmem:[#allocation2 + $0x10] sm:$0xff] %v490_v25  ;;  %514 = vst [vmem:[#allocation2 + $0x50] sm:$0xff] %v498_v26  ;;  %v491_v35 = vadd.f32 %v731_v33, %v250_v23  ;;  %v499_v36 = vadd.f32 %v739_v34, %v258_v24  ;;  %v428_v37 = vpop.f32.mrb[3].mxu0  ;;  %v460_v38 = vpop.f32.mrb[3].mxu1 }
 0x151   : > { %504 = vst [vmem:[#allocation2] sm:$0xff] %v488_v31  ;;  %512 = vst [vmem:[#allocation2 + $0x40] sm:$0xff] %v496_v32  ;;  %v489_v39 = vadd.f32 %v428_v37, %v248_v29  ;;  %v497_v40 = vadd.f32 %v460_v38, %v256_v30 }
 0x152   : > { %507 = vst [vmem:[#allocation2 + $0x18] sm:$0xff] %v491_v35  ;;  %515 = vst [vmem:[#allocation2 + $0x58] sm:$0xff] %v499_v36 }
 0x153   : > { %505 = vst [vmem:[#allocation2 + $0x8] sm:$0xff] %v489_v39  ;;  %513 = vst [vmem:[#allocation2 + $0x48] sm:$0xff] %v497_v40 }
 0x155   : > { %v734_v45 = vpop.f32.mrb[4].mxu0  ;;  %v742_v46 = vpop.f32.mrb[4].mxu1  ;;  %523 = sbr.rel (%p690_p12) target bundleno = 357 (0x165), region = 44 }
 0x156   : > { %v494_v49 = vadd.f32 %v734_v45, %v253_v41  ;;  %v502_v50 = vadd.f32 %v742_v46, %v261_v42  ;;  %v441_v51 = vpop.f32.mrb[5].mxu0  ;;  %v473_v52 = vpop.f32.mrb[5].mxu1 }
 0x157   : > { %v492_v55 = vadd.f32 %v441_v51, %v251_v43  ;;  %v500_v56 = vadd.f32 %v473_v52, %v259_v44  ;;  %v735_v57 = vpop.f32.mrb[6].mxu0  ;;  %v743_v58 = vpop.f32.mrb[6].mxu1  ;;  %v526_v3 = vld [vmem:[#allocation2 + $0x10] sm:$0xff] (!%p690_p12) }
 0x158   : > { %510 = vst [vmem:[#allocation2 + $0x30] sm:$0xff] %v494_v49  ;;  %518 = vst [vmem:[#allocation2 + $0x70] sm:$0xff] %v502_v50  ;;  %v495_v59 = vadd.f32 %v735_v57, %v254_v47  ;;  %v503_v60 = vadd.f32 %v743_v58, %v262_v48  ;;  %v444_v61 = vpop.f32.mrb[7].mxu0  ;;  %v476_v62 = vpop.f32.mrb[7].mxu1  ;;  %v524_v1 = vld [vmem:[#allocation2] sm:$0xff] (!%p690_p12)  ;;  %v534_v11 = vld [vmem:[#allocation2 + $0x50] sm:$0xff] (!%p690_p12) }
 0x159   : > { %508 = vst [vmem:[#allocation2 + $0x20] sm:$0xff] %v492_v55  ;;  %516 = vst [vmem:[#allocation2 + $0x60] sm:$0xff] %v500_v56  ;;  %v493_v63 = vadd.f32 %v444_v61, %v252_v53  ;;  %v501_v0 = vadd.f32 %v476_v62, %v260_v54  ;;  %v527_v4 = vld [vmem:[#allocation2 + $0x18] sm:$0xff] (!%p690_p12)  ;;  %v532_v9 = vld [vmem:[#allocation2 + $0x40] sm:$0xff] (!%p690_p12) }
 0x15a   : > { %511 = vst [vmem:[#allocation2 + $0x38] sm:$0xff] %v495_v59  ;;  %519 = vst [vmem:[#allocation2 + $0x78] sm:$0xff] %v503_v60  ;;  %v525_v2 = vld [vmem:[#allocation2 + $0x8] sm:$0xff] (!%p690_p12)  ;;  %v535_v12 = vld [vmem:[#allocation2 + $0x58] sm:$0xff] (!%p690_p12) }
 0x15b   : > { %509 = vst [vmem:[#allocation2 + $0x28] sm:$0xff] %v493_v63  ;;  %517 = vst [vmem:[#allocation2 + $0x68] sm:$0xff] %v501_v0  ;;  %v533_v10 = vld [vmem:[#allocation2 + $0x48] sm:$0xff] (!%p690_p12) }
 0x15c   : > { %540 = vst [vmem:[#allocation8] sm:$0xff] %v524_v1  ;;  %541 = vst [vmem:[#allocation8 + $0x8] sm:$0xff] %v525_v2 }
 0x15d   : > { %542 = vst [vmem:[#allocation8 + $0x10] sm:$0xff] %v526_v3  ;;  %543 = vst [vmem:[#allocation8 + $0x18] sm:$0xff] %v527_v4 }
 0x15e   : > { %548 = vst [vmem:[#allocation8 + $0x40] sm:$0xff] %v532_v9  ;;  %549 = vst [vmem:[#allocation8 + $0x48] sm:$0xff] %v533_v10 }
 0x15f   : > { %v530_v7 = vld [vmem:[#allocation2 + $0x30] sm:$0xff]  ;;  %550 = vst [vmem:[#allocation8 + $0x50] sm:$0xff] %v534_v11  ;;  %551 = vst [vmem:[#allocation8 + $0x58] sm:$0xff] %v535_v12 }
 0x160   : > { %v528_v5 = vld [vmem:[#allocation2 + $0x20] sm:$0xff]  ;;  %546 = vst [vmem:[#allocation8 + $0x30] sm:$0xff] %v530_v7  ;;  %v538_v15 = vld [vmem:[#allocation2 + $0x70] sm:$0xff] }
 0x161   : > { %544 = vst [vmem:[#allocation8 + $0x20] sm:$0xff] %v528_v5  ;;  %v531_v8 = vld [vmem:[#allocation2 + $0x38] sm:$0xff]  ;;  %v536_v13 = vld [vmem:[#allocation2 + $0x60] sm:$0xff]  ;;  %554 = vst [vmem:[#allocation8 + $0x70] sm:$0xff] %v538_v15 }
 0x162   : > { %v529_v6 = vld [vmem:[#allocation2 + $0x28] sm:$0xff]  ;;  %547 = vst [vmem:[#allocation8 + $0x38] sm:$0xff] %v531_v8  ;;  %552 = vst [vmem:[#allocation8 + $0x60] sm:$0xff] %v536_v13  ;;  %v539_v16 = vld [vmem:[#allocation2 + $0x78] sm:$0xff] }
 0x163   : > { %545 = vst [vmem:[#allocation8 + $0x28] sm:$0xff] %v529_v6  ;;  %v537_v14 = vld [vmem:[#allocation2 + $0x68] sm:$0xff]  ;;  %555 = vst [vmem:[#allocation8 + $0x78] sm:$0xff] %v539_v16 }
 0x164   : > { %553 = vst [vmem:[#allocation8 + $0x68] sm:$0xff] %v537_v14 }
 0x165 PF: > { %p1204_p4 = scmp.eq.s32.totalorder %s662_s15, 8  ;;  %s1001_s20 = smov [#allocation8]  }
 0x166   : > { %s566_s26 = sshll.u32 %s1001_s20, 4  ;;  %s567_s26 = int_to_ptr.vmem [resolvable:$true] %s566_s26 }
 0x167   : > { %s909_s28 = scalar_lea.vmem %s567_s26, 2048  ;;  %p916_p10 = scmp.lt.s32.totalorder %s567_s26, %s567_s26 }
 0x168   : > { %p910_p8 = scmp.ne.s32.totalorder %s567_s26, %s909_s28  ;;  %p917_p0 = scmp.lt.s32.totalorder %s909_s28, %s909_s28 }
 0x16a   : > { %p911_p2 = pnand %p910_p8, %p1204_p4  ;;  %p918_p5 = por %p917_p0, %p916_p10 }
 0x16c   : > { %p912_p3 = pneg %p911_p2 }
 0x16e   : > { %p919_p6 = pnand %p918_p5, %p912_p3 }
 0x170   : > { %922 = shalt.err (!%p919_p6)
}
 0x171   : > { %s923_s15 = scalar_lea.hbm %s1250_s2, 2048 }
 0x172   : > { %p924_p11 = scmp.ne.s32.totalorder %s1250_s2, %s923_s15  ;;  %p929_p7 = scmp.lt.u32.totalorder %s923_s15, %s1250_s2 }
 0x174   : > { %p925_p13 = pnand %p924_p11, %p1204_p4 }
 0x176   : > { %p926_p1 = pneg %p925_p13 }
 0x178   : > { %p931_p9 = pnand %p929_p7, %p926_p1 }
 0x17a   : > { %934 = shalt.err (!%p931_p9)
}
 0x17b   : > { %s1002_s25 = smov 128   ;;  %s1003_s24 = smov 8  }
 0x17c   : > { %765 = dma.vmem_to_hbm [thread:$0]  (%p1204_p4), %s567_s26, 2048, %s1250_s2, [#allocation5], %s1002_s25, %s1002_s25, %s1003_s24  }
 0x17d   : > { %968 = dma.done.wait (%p1204_p4), [#allocation5], 2048  }
 0x17e   : > { %970 = vsyncadd (%p1204_p4), [#allocation5], 4294965248 }
 0x17f PF: > { %s19_s14 = sadd.s32 1, %s993_s14   ;;  %s1259_s9 = smov %s977_s10 }
 0x180   : > { %p16_p12 = scmp.ge.s32.totalorder %s19_s14, 11   ;;  %s1260_s10 = smov %s981_s11 }
 0x181   : > { %s1261_s11 = smov %s1070_s21  ;;  %s1262_s12 = smov %s989_s13 }
 0x182   : > { %s1263_s13 = smov %s1265_s16  ;;  %18 = sbr.rel (!%p16_p12) target bundleno = 7 (0x7), region = 87 }
 0x189   :  { %582 = vsyncpa [#allocation4], 1 }
 0x18a   :  { %584 = vsyncpa [#allocation4 + $0x1], 1 }
 0x18b   :  { %585 = vsyncpa [#allocation7], 1 }
 0x18c   :  { %587 = vsyncpa [#allocation7 + $0x1], 1 }
 0x18d   :  { %588 = vsyncpa [#allocation5], 1 }
 0x18e   :  { %590 = vsyncpa [#allocation5 + $0x1], 1 }

// kernel: forward.31
= control target key start
LH: loop header
LB: loop body
LE: loop exit
PB: predicated region body
PF: predicated region fallthrough
CT: control target
= control target key end

     0   :  { %8 = vsyncpa [#allocation3], 0  ;;  %s886_s0 = inlined_call_operand.hbm [shape: f32[2,16,128], index: 0, kind: input, shape index: {}]   ;;  %s887_s1 = inlined_call_operand.hbm [shape: f32[1,1,128], index: 1, kind: input, shape index: {}]   ;;  %s888_s2 = inlined_call_operand.hbm [shape: f32[1,1,128], index: 2, kind: input, shape index: {}]   ;;  %s889_s3 = inlined_call_operand.hbm [shape: f32[2,16,128], index: 3, kind: output, shape index: {}]  }
   0x1   :  { %10 = vsyncpa [#allocation3 + $0x1], 0 }
   0x2   :  { %11 = vsyncpa [#allocation6], 0 }
   0x3   :  { %12 = vsyncpa [#allocation4], 0 }
   0x4   :  { %14 = vsyncpa [#allocation4 + $0x1], 0  ;;  %s650_s12 = smov 0   ;;  %s652_s13 = smov 0  }
   0x5   :  { %s654_s14 = smov 0   ;;  %s656_s15 = smov 0  }
   0x6 LB: > { %s671_s16 = sadd.s32 4294967295, %s620_s15   ;;  %s369_s17 = sadd.s32 4294967294, %s620_s15   ;;  %s620_s15 = sphi %s656_s15, %s914_s15   ;;  %s616_s14 = sphi %s654_s14, %s913_s14   ;;  %s612_s13 = sphi %s652_s13, %s912_s13   ;;  %s608_s12 = sphi %s650_s12, %s911_s12  }
   0x7   : > { %s675_s18 = sadd.s32 1, %s620_s15   ;;  %s27_s19 = sadd.s32 1, %s616_s14 }
   0x8   : > { %s24_s20 = ssub.s32 %s620_s15, %s675_s18  ;;  %p34_p0 = scmp.ne.s32.totalorder %s616_s14, %s612_s13 }
   0x9   : > { %p25_p1 = scmp.eq.s32.totalorder %s24_s20, 0  ;;  %p35_p2 = scmp.eq.s32.totalorder %s620_s15, 0 }
   0xa   : > { %p40_p3 = scmp.ne.s32.totalorder %s612_s13, %s608_s12  ;;  %p890_p4 = scmp.eq.s32.totalorder %s671_s16, 0 }
   0xb   : > { %s687_s21 = scalar_select %p25_p1, %s616_s14, %s27_s19  }
   0xc   : > { %p689_p5 = por %p35_p2, %p34_p0  ;;  %p695_p6 = por %p890_p4, %p40_p3 }
   0xd   : > { %p106_p7 = scmp.eq.s32.totalorder %s671_s16, 1  ;;  %p112_p8 = scmp.eq.s32.totalorder %s369_s17, 1 }
   0xe   : > { %s896_s23 = scalar_select %p695_p6, 1, 0 }
   0xf   : > { %p370_p9 = scmp.ge.s32.totalorder %s620_s15, 1  ;;  %p119_p10 = scmp.lt.s32.totalorder %s620_s15, 3 }
  0x10   : > { %p702_p11 = por %p106_p7, %p34_p0  ;;  %p706_p12 = por %p112_p8, %p40_p3 }
  0x11   : > { %p710_p13 = pnand %p370_p9, %p119_p10  ;;  %s622_s27 = smov [#allocation5]  }
  0x12   : > { %s897_s24 = scalar_select %p702_p11, 1, 0 }
  0x13   : > { %s898_s25 = scalar_select %p706_p12, 1, 0 }
  0x14   : > { %s899_s26 = scalar_select %p710_p13, 1, 0 }
  0x15   : > { %p403_p2 = pneg %p710_p13  ;;  %s132_s28 = sshll.u32 %s622_s27, 4  ;;  %s133_s28 = int_to_ptr.vmem [resolvable:$true] %s132_s28 }
  0x16   : > { %p420_p4 = scmp.lt.s32.totalorder %s620_s15, 2  ;;  %p900_p0 = scmp.eq.s32.totalorder %s671_s16, 0 }
  0x17   : > { %s623_s4 = smov [#allocation7]   ;;  %s464_s8 = scalar_lea.hbm %s887_s1, 16 }
  0x18   : > { %p720_p7 = pnand %p403_p2, %p900_p0  ;;  %p726_p3 = pnand %p420_p4, %p689_p5 }
  0x19   : > { %s143_s5 = sshll.u32 %s623_s4, 4  ;;  %p465_p8 = scmp.ne.s32.totalorder %s887_s1, %s464_s8  ;;  %s730_s5 = int_to_ptr.vmem [resolvable:$true] %s143_s5 }
  0x1a   : > { %s902_s30 = scalar_select %p726_p3, 1, 0 }
  0x1b   : > { %p466_p9 = pneg %p720_p7  ;;  %p471_p10 = scmp.lt.u32.totalorder %s464_s8, %s887_s1 }
  0x1d   : > { %p467_p4 = pnand %p466_p9, %p465_p8 }
  0x1f   : > { %p468_p5 = pneg %p467_p4 }
  0x21   : > { %p473_p2 = pnand %p471_p10, %p468_p5 }
  0x23   : > { %476 = shalt.err (!%p473_p2)
}
  0x24   : > { %s477_s19 = scalar_lea.vmem %s133_s28, 16  ;;  %s484_s20 = scalar_lea.vmem %s133_s28, 32 }
  0x25   : > { %p478_p0 = scmp.ne.s32.totalorder %s133_s28, %s477_s19  ;;  %p485_p11 = scmp.lt.s32.totalorder %s133_s28, %s133_s28 }
  0x26   : > { %p486_p6 = scmp.lt.s32.totalorder %s484_s20, %s477_s19 }
  0x27   : > { %p480_p1 = pnand %p478_p0, %p466_p9 }
  0x28   : > { %p487_p13 = por %p486_p6, %p485_p11 }
  0x29   : > { %p481_p12 = pneg %p480_p1 }
  0x2b   : > { %p488_p3 = pnand %p487_p13, %p481_p12 }
  0x2d   : > { %491 = shalt.err (!%p488_p3)
}
  0x2e   : > { %406 = dma.hbm_to_vmem [thread:$0]  (!%p720_p7), %s887_s1, 16, %s133_s28, [#allocation6]  }
  0x2f   : > { %s154_s4 = sand.u32 1, %s616_s14   ;;  %s492_s8 = scalar_lea.hbm %s888_s2, 16 }
  0x30   : > { %p493_p1 = scmp.ne.s32.totalorder %s888_s2, %s492_s8  ;;  %p499_p12 = scmp.lt.u32.totalorder %s492_s8, %s888_s2 }
  0x32   : > { %p495_p6 = pnand %p493_p1, %p466_p9 }
  0x34   : > { %p496_p11 = pneg %p495_p6 }
  0x36   : > { %p501_p13 = pnand %p499_p12, %p496_p11 }
  0x38   : > { %504 = shalt.err (!%p501_p13)
}
  0x39   : > { %s505_s28 = scalar_lea.vmem %s730_s5, 16  ;;  %s512_s19 = scalar_lea.vmem %s730_s5, 32 }
  0x3a   : > { %p506_p3 = scmp.ne.s32.totalorder %s730_s5, %s505_s28  ;;  %p513_p5 = scmp.lt.s32.totalorder %s730_s5, %s730_s5 }
  0x3b   : > { %p514_p10 = scmp.lt.s32.totalorder %s512_s19, %s505_s28 }
  0x3c   : > { %p508_p8 = pnand %p506_p3, %p466_p9 }
  0x3d   : > { %p515_p2 = por %p514_p10, %p513_p5 }
  0x3e   : > { %p509_p4 = pneg %p508_p8 }
  0x40   : > { %p516_p0 = pnand %p515_p2, %p509_p4 }
  0x42   : > { %519 = shalt.err (!%p516_p0)
}
  0x43   : > { %409 = dma.hbm_to_vmem [thread:$0]  (!%p720_p7), %s888_s2, 16, %s730_s5, [#allocation6]  }
  0x44   : > { %s374_s27 = sshll.u32 %s154_s4, 4  ;;  %s389_s6 = sshll.u32 %s620_s15, 8 }
  0x45   : > { %s785_s9 = scalar_lea.hbm %s886_s0, %s389_s6  ;;  %s158_s29 = scalar_lea.vmem [#allocation2], %s374_s27 }
  0x46   : > { %s165_s10 = sshll.u32 %s158_s29, 4  ;;  %s789_s11 = scalar_lea.sflag [#allocation3], %s154_s4  ;;  %s787_s10 = int_to_ptr.vmem [resolvable:$true] %s165_s10 }
  0x47   : > { %s520_s17 = scalar_lea.hbm %s785_s9, 256  ;;  %p903_p7 = scmp.ne.s32.totalorder %s902_s30, 0 }
  0x48   : > { %p521_p9 = scmp.ne.s32.totalorder %s785_s9, %s520_s17  ;;  %s525_s19 = scalar_lea.hbm %s886_s0, 512 }
  0x49   : > { %p522_p1 = pneg %p903_p7  ;;  %p526_p12 = scmp.lt.u32.totalorder %s785_s9, %s886_s0 }
  0x4a   : > { %p527_p13 = scmp.lt.u32.totalorder %s525_s19, %s520_s17  ;;  %p529_p8 = scmp.lt.u32.totalorder %s520_s17, %s785_s9 }
  0x4b   : > { %p523_p6 = pnand %p522_p1, %p521_p9 }
  0x4c   : > { %p528_p3 = por %p527_p13, %p526_p12 }
  0x4d   : > { %p524_p11 = pneg %p523_p6 }
  0x4e   : > { %p530_p4 = por %p529_p8, %p528_p3 }
  0x50   : > { %p531_p5 = pnand %p530_p4, %p524_p11 }
  0x52   : > { %534 = shalt.err (!%p531_p5)
}
  0x53   : > { %s535_s4 = scalar_lea.vmem %s787_s10, 256  ;;  %s624_s27 = smov [#allocation2]  }
  0x54   : > { %p536_p10 = scmp.ne.s32.totalorder %s787_s10, %s535_s4  ;;  %s540_s6 = sshll.u32 %s624_s27, 4  ;;  %s541_s6 = int_to_ptr.vmem [resolvable:$false] %s540_s6 }
  0x55   : > { %s542_s7 = scalar_lea.vmem %s541_s6, 512  ;;  %p543_p9 = scmp.lt.s32.totalorder %s787_s10, %s541_s6 }
  0x56   : > { %p538_p2 = pnand %p536_p10, %p522_p1  ;;  %p544_p6 = scmp.lt.s32.totalorder %s542_s7, %s535_s4 }
  0x58   : > { %p539_p0 = pneg %p538_p2  ;;  %p545_p12 = por %p544_p6, %p543_p9 }
  0x5a   : > { %p546_p13 = pnand %p545_p12, %p539_p0 }
  0x5c   : > { %549 = shalt.err (!%p546_p13)
}
  0x5d   : > { %s625_s8 = smov 128   ;;  %s626_s29 = smov 8  }
  0x5e   : > { %413 = dma.hbm_to_vmem [thread:$0]  (!%p903_p7), %s785_s9, 256, %s787_s10, %s789_s11, %s625_s8, %s625_s8, %s626_s29  }
  0x5f   : > { %p904_p1 = scmp.ne.s32.totalorder %s899_s26, 0 }
  0x60   : > { %s820_s17 = sand.u32 (!%p904_p1), 1, %s612_s13   ;;  %p905_p11 = scmp.ne.s32.totalorder (!%p904_p1), %s896_s23, 0 }
  0x61   : > { %177 = sbr.rel (%p904_p1) target bundleno = 181 (0xb5), region = 32  ;;  %s378_s5 = sshll.u32 (!%p904_p1), %s820_s17, 4 }
  0x62   : > { %s180_s28 = scalar_lea.sflag (!%p904_p1), [#allocation3], %s820_s17  ;;  %s183_s19 = scalar_lea.vmem (!%p904_p1), [#allocation2], %s378_s5 }
  0x68   : > { %595 = dma.done.wait (%p905_p11), %s180_s28, 256  }
  0x69   : > { %597 = vsyncadd (%p905_p11), %s180_s28, 4294967040  ;;  %p906_p7 = scmp.eq.s32.totalorder %s671_s16, 0 }
  0x6b   : > { %599 = dma.done.wait (%p906_p7), [#allocation6], 32   ;;  %p907_p3 = pmov %p906_p7 }
  0x6c   : > { %v214_v0 = vld [vmem:[%s183_s19] sm:$0xff]  ;;  %v215_v1 = vld [vmem:[%s183_s19 + $0x8] sm:$0xff]  ;;  %s213_s23 = scalar_lea.vmem [#allocation8], %s378_s5  ;;  %s390_s30 = sshll.u32 %s671_s16, 8 }
  0x6d   : > { %601 = vsyncadd (%p907_p3), [#allocation6], 4294967264  ;;  %v216_v2 = vadd.f32 %v215_v1, %v214_v0  ;;  %v382_v24 = vld [vmem:[#allocation5] ss:$0 sm:$0xff]  ;;  %v383_v27 = vld [vmem:[#allocation7] ss:$0 sm:$0xff]  ;;  %s842_s11 = scalar_lea.hbm %s889_s3, %s390_s30 }
  0x6e   : > { %s277_s26 = sshll.u32 %s213_s23, 4  ;;  %s264_s20 = scalar_lea.sflag [#allocation4], %s820_s17  ;;  %s837_s26 = int_to_ptr.vmem [resolvable:$true] %s277_s26 }
  0x6f   : > { %v217_v3 = vrot.slane %v216_v2, 4  ;;  %s550_s22 = scalar_lea.vmem %s837_s26, 256  ;;  %p908_p4 = scmp.ne.s32.totalorder %s897_s24, 0 }
  0x70   : > { %p551_p8 = scmp.ne.s32.totalorder %s837_s26, %s550_s22  ;;  %s627_s16 = smov [#allocation8]  }
  0x71   : > { %v218_v4 = vadd.f32 %v217_v3, %v216_v2  ;;  %s554_s4 = sshll.u32 %s627_s16, 4  ;;  %s555_s4 = int_to_ptr.vmem [resolvable:$false] %s554_s4 }
  0x72   : > { %p552_p5 = pnand %p551_p8, %p908_p4  ;;  %s556_s27 = scalar_lea.vmem %s555_s4, 512 }
  0x73   : > { %v219_v5 = vrot.slane %v218_v4, 2  ;;  %p557_p2 = scmp.lt.s32.totalorder %s837_s26, %s555_s4  ;;  %p558_p0 = scmp.lt.s32.totalorder %s556_s27, %s550_s22 }
  0x74   : > { %p553_p10 = pneg %p552_p5 }
  0x75   : > { %v220_v6 = vadd.f32 %v219_v5, %v218_v4  ;;  %p559_p9 = por %p558_p0, %p557_p2 }
  0x77   : > { %v221_v7 = vrot.slane %v220_v6, 1  ;;  %p560_p6 = pnand %p559_p9, %p553_p10 }
  0x79   : > { %v222_v8 = vadd.f32 %v221_v7, %v220_v6 }
  0x7b   : > { %v224_v9 = vmul.f32 0.0625, %v222_v8 }
  0x7d   : > { %v225_v10 = vsub.f32 %v214_v0, %v224_v9  ;;  %v226_v11 = vsub.f32 %v215_v1, %v224_v9 }
  0x7f   : > { %v227_v12 = vmul.f32 %v225_v10, %v225_v10  ;;  %v228_v13 = vmul.f32 %v226_v11, %v226_v11 }
  0x81   : > { %v229_v14 = vadd.f32 %v228_v13, %v227_v12 }
  0x83   : > { %v230_v15 = vrot.slane %v229_v14, 4 }
  0x85   : > { %v231_v16 = vadd.f32 %v230_v15, %v229_v14 }
  0x87   : > { %v232_v17 = vrot.slane %v231_v16, 2 }
  0x89   : > { %v233_v18 = vadd.f32 %v232_v17, %v231_v16 }
  0x8b   : > { %v234_v19 = vrot.slane %v233_v18, 1 }
  0x8d   : > { %v235_v20 = vadd.f32 %v234_v19, %v233_v18 }
  0x8f   : > { %v236_v21 = vmul.f32 0.0625, %v235_v20 }
  0x91   : > { %v237_v22 = vadd.f32 1e-05, %v236_v21 }
  0x93   : > { %462 = vrsqrt.f32 %v237_v22 }
  0x9d   : > { %v463_v23 = vpop.eup %462 }
  0x9e   : > { %v239_v25 = vmul.f32 %v463_v23, %v225_v10  ;;  %v240_v26 = vmul.f32 %v463_v23, %v226_v11 }
  0xa0   : > { %v248_v28 = vmul.f32 %v382_v24, %v239_v25  ;;  %v249_v29 = vmul.f32 %v382_v24, %v240_v26 }
  0xa2   : > { %v257_v30 = vadd.f32 %v383_v27, %v248_v28  ;;  %v258_v31 = vadd.f32 %v383_v27, %v249_v29 }
  0xa4   : > { %v259_v32 = vmax.f32 %v257_v30, 0.0  ;;  %v260_v33 = vmax.f32 %v258_v31, 0.0 }
  0xa6   : > { %261 = vst [vmem:[%s213_s23] sm:$0xff] %v259_v32  ;;  %262 = vst [vmem:[%s213_s23 + $0x8] sm:$0xff] %v260_v33 }
  0xa7   : > { %563 = shalt.err (!%p560_p6)
}
  0xa8   : > { %s564_s6 = scalar_lea.hbm %s842_s11, 256  ;;  %s568_s29 = scalar_lea.hbm %s889_s3, 512 }
  0xa9   : > { %p565_p12 = scmp.ne.s32.totalorder %s842_s11, %s564_s6  ;;  %p569_p11 = scmp.lt.u32.totalorder %s842_s11, %s889_s3 }
  0xaa   : > { %p570_p7 = scmp.lt.u32.totalorder %s568_s29, %s564_s6  ;;  %p572_p8 = scmp.lt.u32.totalorder %s564_s6, %s842_s11 }
  0xab   : > { %p566_p13 = pnand %p565_p12, %p908_p4 }
  0xac   : > { %p571_p3 = por %p570_p7, %p569_p11 }
  0xad   : > { %p567_p1 = pneg %p566_p13 }
  0xae   : > { %p573_p5 = por %p572_p8, %p571_p3 }
  0xb0   : > { %p574_p10 = pnand %p573_p5, %p567_p1 }
  0xb2   : > { %577 = shalt.err (!%p574_p10)
}
  0xb3   : > { %s628_s19 = smov 128   ;;  %s629_s23 = smov 8  }
  0xb4   : > { %401 = dma.vmem_to_hbm [thread:$0]  (%p908_p4), %s837_s26, 256, %s842_s11, %s264_s20, %s628_s19, %s628_s19, %s629_s23  }
  0xb5 PF: > { %s292_s30 = sand.u32 1, %s608_s12   ;;  %p909_p2 = scmp.ne.s32.totalorder %s898_s25, 0 }
  0xb6   : > { %p910_p0 = scmp.ge.s32.totalorder %s620_s15, 2  ;;  %s293_s9 = scalar_lea.sflag [#allocation4], %s292_s30 }
  0xb8   : > { %p415_p9 = pnand %p910_p0, %p909_p2 }
  0xba   : > { %603 = dma.done.wait (!%p415_p9), %s293_s9, 256  }
  0xbb   : > { %605 = vsyncadd (!%p415_p9), %s293_s9, 4294967040  ;;  %p17_p6 = scmp.ge.s32.totalorder %s675_s18, 4   ;;  %s911_s12 = smov %s612_s13 }
  0xbc   : > { %s912_s13 = smov %s616_s14  ;;  %s913_s14 = smov %s687_s21 }
  0xbd   : > { %s914_s15 = smov %s675_s18  ;;  %19 = sbr.rel (!%p17_p6) target bundleno = 6 (0x6), region = 85 }
  0xc4   :  { %298 = vsyncpa [#allocation3], 1 }
  0xc5   :  { %300 = vsyncpa [#allocation3 + $0x1], 1 }
  0xc6   :  { %301 = vsyncpa [#allocation6], 1 }
  0xc7   :  { %302 = vsyncpa [#allocation4], 1 }
  0xc8   :  { %304 = vsyncpa [#allocation4 + $0x1], 1 }

// kernel: forward.30
= control target key start
LH: loop header
LB: loop body
LE: loop exit
PB: predicated region body
PF: predicated region fallthrough
CT: control target
= control target key end

     0   :  { %7 = vsyncpa [#allocation4], 0  ;;  %s1025_s0 = inlined_call_operand.hbm [shape: bf16[32,1152], index: 0, kind: input, shape index: {}]   ;;  %s1026_s1 = inlined_call_operand.hbm [shape: bf16[1152,128], index: 1, kind: input, shape index: {}]   ;;  %s1027_s2 = inlined_call_operand.hbm [shape: f32[32,128], index: 2, kind: output, shape index: {}]  }
   0x1   :  { %9 = vsyncpa [#allocation4 + $0x1], 0 }
   0x2   :  { %10 = vsyncpa [#allocation7], 0 }
   0x3   :  { %12 = vsyncpa [#allocation7 + $0x1], 0 }
   0x4   :  { %13 = vsyncpa [#allocation5], 0  ;;  %s805_s9 = smov 0   ;;  %s807_s10 = smov 0  }
   0x5   :  { %s809_s11 = smov 0   ;;  %s811_s12 = smov 0  }
   0x6   :  { %s813_s13 = smov 0   ;;  %s815_s14 = smov 0  }
   0x7 LB: > { %s494_s15 = sadd.s32 4294967295, %s779_s14   ;;  %s31_s16 = sadd.s32 1, %s775_s13  ;;  %s779_s14 = sphi %s815_s14, %s19_s14   ;;  %s775_s13 = sphi %s813_s13, %s1040_s13   ;;  %s771_s12 = sphi %s811_s12, %s1039_s12   ;;  %s767_s11 = sphi %s809_s11, %s1038_s11   ;;  %s763_s10 = sphi %s807_s10, %s1037_s10   ;;  %s759_s9 = sphi %s805_s9, %s1036_s9  }
   0x8   : > { %p32_p0 = scmp.ge.s32.totalorder %s31_s16, 9  ;;  %s47_s17 = sadd.s32 1, %s767_s11 }
   0x9   : > { %p54_p1 = scmp.ne.s32.totalorder %s767_s11, %s763_s10  ;;  %p55_p2 = scmp.eq.s32.totalorder %s779_s14, 0 }
   0xa   : > { %s1042_s16 = smov (%p32_p0, %s31_s16), 0  ;;  %p60_p4 = scmp.ne.s32.totalorder %s763_s10, %s759_s9 }
   0xb   : > { %p841_p3 = por %p55_p2, %p54_p1  ;;  %s43_s19 = ssub.s32 %s775_s13, %s1042_s16 }
   0xc   : > { %p61_p5 = scmp.eq.s32.totalorder %s494_s15, 0  ;;  %p45_p6 = scmp.eq.s32.totalorder %s43_s19, 0 }
   0xd   : > { %p567_p8 = scmp.lt.s32.totalorder %s779_s14, 9  ;;  %s859_s22 = sand.u32 1, %s767_s11  }
   0xe   : > { %p850_p7 = por %p61_p5, %p60_p4  ;;  %s498_s23 = sshll.u32 %s775_s13, 6 }
   0xf   : > { %s856_s21 = scalar_select %p45_p6, %s767_s11, %s47_s17  }
  0x10   : > { %s1030_s20 = scalar_select %p850_p7, 1, 0 }
  0x11   : > { %s497_s24 = sshll.u32 %s859_s22, 4  ;;  %s866_s27 = scalar_lea.hbm %s1025_s0, %s498_s23 }
  0x12   : > { %s144_s28 = scalar_lea.vmem [#allocation3], %s497_s24  ;;  %p870_p9 = pnand %p567_p8, %p841_p3 }
  0x13   : > { %s153_s29 = sshll.u32 %s144_s28, 4  ;;  %s141_s3 = scalar_lea.sflag [#allocation4], %s859_s22  ;;  %s874_s29 = int_to_ptr.vmem [resolvable:$true] %s153_s29 }
  0x14   : > { %s635_s4 = scalar_lea.hbm %s866_s27, 256  ;;  %p637_p12 = pneg %p870_p9 }
  0x15   : > { %p636_p11 = scmp.ne.s32.totalorder %s866_s27, %s635_s4  ;;  %s640_s7 = scalar_lea.hbm %s1025_s0, 2304 }
  0x16   : > { %p641_p1 = scmp.lt.u32.totalorder %s866_s27, %s1025_s0  ;;  %p642_p2 = scmp.lt.u32.totalorder %s640_s7, %s635_s4 }
  0x17   : > { %p638_p13 = pnand %p637_p12, %p636_p11  ;;  %p644_p4 = scmp.lt.u32.totalorder %s635_s4, %s866_s27 }
  0x18   : > { %p643_p3 = por %p642_p2, %p641_p1 }
  0x19   : > { %p639_p0 = pneg %p638_p13 }
  0x1a   : > { %p645_p5 = por %p644_p4, %p643_p3 }
  0x1c   : > { %p646_p6 = pnand %p645_p5, %p639_p0 }
  0x1e   : > { %649 = shalt.err (!%p646_p6)
}
  0x1f   : > { %s650_s17 = scalar_lea.vmem %s874_s29, 256  ;;  %s781_s18 = smov [#allocation3]  }
  0x20   : > { %p651_p8 = scmp.ne.s32.totalorder %s874_s29, %s650_s17  ;;  %s655_s19 = sshll.u32 %s781_s18, 4  ;;  %s656_s19 = int_to_ptr.vmem [resolvable:$false] %s655_s19 }
  0x21   : > { %s657_s23 = scalar_lea.vmem %s656_s19, 512  ;;  %p658_p10 = scmp.lt.s32.totalorder %s874_s29, %s656_s19 }
  0x22   : > { %p653_p11 = pnand %p651_p8, %p637_p12  ;;  %p659_p1 = scmp.lt.s32.totalorder %s657_s23, %s650_s17 }
  0x24   : > { %p654_p13 = pneg %p653_p11  ;;  %p660_p2 = por %p659_p1, %p658_p10 }
  0x26   : > { %p661_p3 = pnand %p660_p2, %p654_p13 }
  0x28   : > { %664 = shalt.err (!%p661_p3)
}
  0x29   : > { %s782_s24 = smov 576   ;;  %s783_s25 = smov 64  }
  0x2a   : > { %s784_s26 = smov 4   ;;  %p183_p10 = scmp.lt.s32.totalorder %s779_s14, 10 }
  0x2b   : > { %563 = dma.hbm_to_vmem [thread:$0]  (!%p870_p9), %s866_s27, 256, %s874_s29, %s141_s3, %s782_s24, %s783_s25, %s784_s26  }
  0x2c   : > { %s499_s28 = sshll.u32 %s859_s22, 6  ;;  %s521_s4 = sshll.u32 %s775_s13, 10 }
  0x2d   : > { %p1032_p0 = scmp.ge.s32.totalorder %s779_s14, 1  ;;  %s919_s8 = scalar_lea.hbm %s1026_s1, %s521_s4 }
  0x2e   : > { %s167_s9 = scalar_lea.vmem [#allocation6], %s499_s28  ;;  %s164_s27 = scalar_lea.sflag [#allocation7], %s859_s22 }
  0x2f   : > { %p912_p4 = pnand %p1032_p0, %p183_p10  ;;  %s175_s17 = sshll.u32 %s167_s9, 4  ;;  %s921_s17 = int_to_ptr.vmem [resolvable:$true] %s175_s17 }
  0x30   : > { %s665_s29 = scalar_lea.hbm %s919_s8, 1024  ;;  %s670_s19 = scalar_lea.hbm %s1026_s1, 9216 }
  0x31   : > { %p666_p5 = scmp.ne.s32.totalorder %s919_s8, %s665_s29  ;;  %p671_p11 = scmp.lt.u32.totalorder %s919_s8, %s1026_s1 }
  0x32   : > { %p672_p13 = scmp.lt.u32.totalorder %s670_s19, %s665_s29  ;;  %p674_p2 = scmp.lt.u32.totalorder %s665_s29, %s919_s8 }
  0x33   : > { %p668_p6 = pnand %p666_p5, %p637_p12 }
  0x34   : > { %p673_p1 = por %p672_p13, %p671_p11 }
  0x35   : > { %p669_p8 = pneg %p668_p6 }
  0x36   : > { %p675_p3 = por %p674_p2, %p673_p1 }
  0x38   : > { %p676_p10 = pnand %p675_p3, %p669_p8 }
  0x3a   : > { %679 = shalt.err (!%p676_p10)
}
  0x3b   : > { %s680_s28 = scalar_lea.vmem %s921_s17, 1024  ;;  %s785_s4 = smov [#allocation6]  }
  0x3c   : > { %p681_p0 = scmp.ne.s32.totalorder %s921_s17, %s680_s28  ;;  %s685_s6 = sshll.u32 %s785_s4, 4  ;;  %s686_s6 = int_to_ptr.vmem [resolvable:$false] %s685_s6 }
  0x3d   : > { %s687_s7 = scalar_lea.vmem %s686_s6, 2048  ;;  %p688_p7 = scmp.lt.s32.totalorder %s921_s17, %s686_s6 }
  0x3e   : > { %p683_p5 = pnand %p681_p0, %p637_p12  ;;  %p689_p11 = scmp.lt.s32.totalorder %s687_s7, %s680_s28 }
  0x40   : > { %p684_p6 = pneg %p683_p5  ;;  %p690_p13 = por %p689_p11, %p688_p7 }
  0x42   : > { %p691_p1 = pnand %p690_p13, %p684_p6 }
  0x44   : > { %694 = shalt.err (!%p691_p1)
}
  0x45   : > { %566 = dma.hbm_to_vmem [thread:$0]  (!%p870_p9), %s919_s8, 1024, %s921_s17, %s164_s27, %s783_s25, %s783_s25, %s784_s26  }
  0x46   : > { %187 = sbr.rel (%p912_p4) target bundleno = 375 (0x177), region = 28  ;;  %s189_s9 = sand.u32 (!%p912_p4), 1, %s763_s10  }
  0x47   : > { %s503_s29 = sshll.u32 (!%p912_p4), %s189_s9, 4  ;;  %s190_s3 = scalar_lea.sflag (!%p912_p4), [#allocation4], %s189_s9 }
  0x48   : > { %s955_s18 = scalar_lea.vmem (!%p912_p4), [#allocation3], %s503_s29  ;;  %p1034_p7 = scmp.ne.s32.totalorder (!%p912_p4), %s1030_s20, 0 }
  0x4d   : > { %746 = dma.done.wait (%p1034_p7), %s190_s3, 256  }
  0x4e   : > { %748 = vsyncadd (%p1034_p7), %s190_s3, 4294967040  ;;  %s504_s22 = sshll.u32 %s189_s9, 6  ;;  %s199_s30 = scalar_lea.sflag [#allocation7], %s189_s9 }
  0x4f   : > { %s961_s19 = scalar_lea.vmem [#allocation6], %s504_s22 }
  0x50   : > { %750 = dma.done.wait (%p1034_p7), %s199_s30, 1024  }
  0x51   : > { %752 = vsyncadd (%p1034_p7), %s199_s30, 4294966272  ;;  %p505_p9 = scmp.ne.s32.totalorder %s771_s12, 0 }
  0x52   : > { %v786_v0 = vmov (!%p505_p9), 0.0  }
  0x53   : > { %230 = sbr.rel (%p505_p9) target bundleno = 90 (0x5a), region = 40  ;;  %231 = vst [vmem:[#allocation2] sm:$0xff] (!%p505_p9), %v786_v0  ;;  %232 = vst [vmem:[#allocation2 + $0x8] sm:$0xff] (!%p505_p9), %v786_v0 }
  0x54   : > { %233 = vst [vmem:[#allocation2 + $0x10] sm:$0xff] (!%p505_p9), %v786_v0  ;;  %234 = vst [vmem:[#allocation2 + $0x18] sm:$0xff] (!%p505_p9), %v786_v0 }
  0x5a PF: > { %v625_v1 = vld [vmem:[%s961_s19] sm:$0xff]   ;;  %v626_v2 = vld [vmem:[%s961_s19 + $0x8] sm:$0xff]   ;;  %v627_v3 = vld [vmem:[%s961_s19 + $0x10] sm:$0xff]   ;;  %p516_p12 = scmp.ne.s32.totalorder %s771_s12, 8 }
  0x5b   : > { %532 = vmatprep.subr.bf16.mxu0 %v625_v1  ;;  %v628_v4 = vld [vmem:[%s961_s19 + $0x18] sm:$0xff]   ;;  %v633_v5 = vld [vmem:[%s955_s18] sm:$0xff]   ;;  %v630_v7 = vld [vmem:[%s961_s19 + $0x28] sm:$0xff]  }
  0x5c   : > { %533 = vmatpush3.bf16.msra.mxu0 %v625_v1  ;;  %548 = vmatprep.mubr.bf16.mxu0 %v633_v5  ;;  %v629_v6 = vld [vmem:[%s961_s19 + $0x20] sm:$0xff]   ;;  %v631_v8 = vld [vmem:[%s961_s19 + $0x30] sm:$0xff]   ;;  %v632_v9 = vld [vmem:[%s961_s19 + $0x38] sm:$0xff]  }
  0x5d   : > { %534 = vmatprep.subr.bf16.mxu0 %v626_v2  ;;  %v634_v10 = vld [vmem:[%s955_s18 + $0x8] sm:$0xff]   ;;  %v237_v11 = vld [vmem:[#allocation2 + $0x10] sm:$0xff]  ;;  %v235_v12 = vld [vmem:[#allocation2] sm:$0xff] }
  0x5e   : > { %v238_v14 = vld [vmem:[#allocation2 + $0x18] sm:$0xff]  ;;  %v236_v17 = vld [vmem:[#allocation2 + $0x8] sm:$0xff] }
  0x60   : > { %535 = vmatpush3.bf16.msra.mxu0 %v626_v2 }
  0x61   : > { %536 = vmatprep.subr.bf16.mxu0 %v627_v3 }
  0x64   : > { %537 = vmatpush3.bf16.msra.mxu0 %v627_v3 }
  0x65   : > { %538 = vmatprep.subr.bf16.mxu0 %v628_v4 }
  0x68   : > { %539 = vmatpush3.bf16.msra.mxu0 %v628_v4 }
  0x69   : > { %540 = vmatprep.subr.bf16.mxu0 %v629_v6 }
  0x6c   : > { %541 = vmatpush3.bf16.msra.mxu0 %v629_v6 }
  0x6d   : > { %542 = vmatprep.subr.bf16.mxu0 %v630_v7 }
  0x70   : > { %543 = vmatpush3.bf16.msra.mxu0 %v630_v7 }
  0x71   : > { %544 = vmatprep.subr.bf16.mxu0 %v631_v8 }
  0x74   : > { %545 = vmatpush3.bf16.msra.mxu0 %v631_v8 }
  0x75   : > { %546 = vmatprep.subr.bf16.mxu0 %v632_v9 }
  0x78   : > { %547 = vmatpush3.bf16.msra.mxu0 %v632_v9 }
  0x7b   : > { %549 = vmatmul.mubr.bf16.vlgmr.msra.gmra.mrb[0].mxu0 %v634_v10 }
 0x14e   : > { %v550_v13 = vpop.f32.mrb[0].mxu0  ;;  %379 = sbr.rel (%p516_p12) target bundleno = 349 (0x15d), region = 44 }
 0x14f   : > { %v370_v15 = vadd.f32 %v550_v13, %v237_v11  ;;  %v353_v16 = vpop.f32.mrb[1].mxu0 }
 0x150   : > { %v368_v18 = vadd.f32 %v353_v16, %v235_v12  ;;  %v551_v19 = vpop.f32.mrb[2].mxu0 }
 0x151   : > { %374 = vst [vmem:[#allocation2 + $0x10] sm:$0xff] %v370_v15  ;;  %v371_v20 = vadd.f32 %v551_v19, %v238_v14  ;;  %v356_v21 = vpop.f32.mrb[3].mxu0 }
 0x152   : > { %372 = vst [vmem:[#allocation2] sm:$0xff] %v368_v18  ;;  %v369_v22 = vadd.f32 %v356_v21, %v236_v17 }
 0x153   : > { %375 = vst [vmem:[#allocation2 + $0x18] sm:$0xff] %v371_v20 }
 0x154   : > { %373 = vst [vmem:[#allocation2 + $0x8] sm:$0xff] %v369_v22 }
 0x158   : > { %v382_v25 = vld [vmem:[#allocation2 + $0x10] sm:$0xff] }
 0x159   : > { %v380_v23 = vld [vmem:[#allocation2] sm:$0xff]  ;;  %386 = vst [vmem:[#allocation8 + $0x10] sm:$0xff] %v382_v25 }
 0x15a   : > { %384 = vst [vmem:[#allocation8] sm:$0xff] %v380_v23  ;;  %v383_v26 = vld [vmem:[#allocation2 + $0x18] sm:$0xff] }
 0x15b   : > { %v381_v24 = vld [vmem:[#allocation2 + $0x8] sm:$0xff]  ;;  %387 = vst [vmem:[#allocation8 + $0x18] sm:$0xff] %v383_v26 }
 0x15c   : > { %385 = vst [vmem:[#allocation8 + $0x8] sm:$0xff] %v381_v24 }
 0x15d PF: > { %p981_p4 = scmp.eq.s32.totalorder %s494_s15, 8  ;;  %s787_s25 = smov [#allocation8]  }
 0x15e   : > { %s398_s26 = sshll.u32 %s787_s25, 4  ;;  %s399_s26 = int_to_ptr.vmem [resolvable:$true] %s398_s26 }
 0x15f   : > { %s695_s12 = scalar_lea.vmem %s399_s26, 512  ;;  %p702_p10 = scmp.lt.s32.totalorder %s399_s26, %s399_s26 }
 0x160   : > { %p696_p8 = scmp.ne.s32.totalorder %s399_s26, %s695_s12  ;;  %p703_p0 = scmp.lt.s32.totalorder %s695_s12, %s695_s12 }
 0x162   : > { %p697_p2 = pnand %p696_p8, %p981_p4  ;;  %p704_p5 = por %p703_p0, %p702_p10 }
 0x164   : > { %p698_p3 = pneg %p697_p2 }
 0x166   : > { %p705_p6 = pnand %p704_p5, %p698_p3 }
 0x168   : > { %708 = shalt.err (!%p705_p6)
}
 0x169   : > { %s709_s15 = scalar_lea.hbm %s1027_s2, 512 }
 0x16a   : > { %p710_p11 = scmp.ne.s32.totalorder %s1027_s2, %s709_s15  ;;  %p715_p7 = scmp.lt.u32.totalorder %s709_s15, %s1027_s2 }
 0x16c   : > { %p711_p13 = pnand %p710_p11, %p981_p4 }
 0x16e   : > { %p712_p1 = pneg %p711_p13 }
 0x170   : > { %p717_p9 = pnand %p715_p7, %p712_p1 }
 0x172   : > { %720 = shalt.err (!%p717_p9)
}
 0x173   : > { %s788_s28 = smov 128   ;;  %s789_s4 = smov 8  }
 0x174   : > { %557 = dma.vmem_to_hbm [thread:$0]  (%p981_p4), %s399_s26, 512, %s1027_s2, [#allocation5], %s788_s28, %s788_s28, %s789_s4  }
 0x175   : > { %754 = dma.done.wait (%p981_p4), [#allocation5], 512  }
 0x176   : > { %756 = vsyncadd (%p981_p4), [#allocation5], 4294966784 }
 0x177 PF: > { %s19_s14 = sadd.s32 1, %s779_s14   ;;  %s1036_s9 = smov %s763_s10 }
 0x178   : > { %p16_p12 = scmp.ge.s32.totalorder %s19_s14, 11   ;;  %s1037_s10 = smov %s767_s11 }
 0x179   : > { %s1038_s11 = smov %s856_s21  ;;  %s1039_s12 = smov %s775_s13 }
 0x17a   : > { %s1040_s13 = smov %s1042_s16  ;;  %18 = sbr.rel (!%p16_p12) target bundleno = 7 (0x7), region = 87 }
 0x181   :  { %414 = vsyncpa [#allocation4], 1 }
 0x182   :  { %416 = vsyncpa [#allocation4 + $0x1], 1 }
 0x183   :  { %417 = vsyncpa [#allocation7], 1 }
 0x184   :  { %419 = vsyncpa [#allocation7 + $0x1], 1 }
 0x185   :  { %420 = vsyncpa [#allocation5], 1 }
 0x186   :  { %422 = vsyncpa [#allocation5 + $0x1], 1 }

// kernel: forward.35
= control target key start
LH: loop header
LB: loop body
LE: loop exit
PB: predicated region body
PF: predicated region fallthrough
CT: control target
= control target key end

     0   :  { %s1088_s0 = inlined_call_operand.hbm [shape: f32[2,16,128], index: 0, kind: input, shape index: {}]   ;;  %s1089_s1 = inlined_call_operand.hbm [shape: f32[1,1,128], index: 1, kind: input, shape index: {}]   ;;  %s1090_s2 = inlined_call_operand.hbm [shape: f32[1,1,128], index: 2, kind: input, shape index: {}]   ;;  %s1091_s3 = inlined_call_operand.hbm [shape: f32[2,16,128], index: 3, kind: input, shape index: {}]   ;;  %s1092_s4 = inlined_call_operand.hbm [shape: f32[2,16,128], index: 4, kind: output, shape index: {}]  }
   0x1   :  { %1098 = sst [smem:[#allocation15_spill]] %s1088_s0 }
   0x2   :  { %9 = vsyncpa [#allocation3], 0 }
   0x3   :  { %11 = vsyncpa [#allocation3 + $0x1], 0 }
   0x4   :  { %12 = vsyncpa [#allocation6], 0 }
   0x5   :  { %13 = vsyncpa [#allocation9], 0 }
   0x6   :  { %15 = vsyncpa [#allocation9 + $0x1], 0 }
   0x7   :  { %16 = vsyncpa [#allocation4], 0 }
   0x8   :  { %18 = vsyncpa [#allocation4 + $0x1], 0  ;;  %s792_s15 = smov 0   ;;  %s794_s16 = smov 0  }
   0x9   :  { %s796_s17 = smov 0   ;;  %s798_s18 = smov 0  }
   0xa LB: > { %s813_s19 = sadd.s32 4294967295, %s756_s18   ;;  %s461_s20 = sadd.s32 4294967294, %s756_s18   ;;  %s756_s18 = sphi %s798_s18, %s1119_s18   ;;  %s752_s17 = sphi %s796_s17, %s1118_s17   ;;  %s748_s16 = sphi %s794_s16, %s1117_s16   ;;  %s744_s15 = sphi %s792_s15, %s1116_s15  }
   0xb   : > { %s817_s21 = sadd.s32 1, %s756_s18   ;;  %s31_s22 = sadd.s32 1, %s752_s17 }
   0xc   : > { %s28_s23 = ssub.s32 %s756_s18, %s817_s21  ;;  %p38_p0 = scmp.ne.s32.totalorder %s752_s17, %s748_s16 }
   0xd   : > { %p29_p1 = scmp.eq.s32.totalorder %s28_s23, 0  ;;  %p39_p2 = scmp.eq.s32.totalorder %s756_s18, 0 }
   0xe   : > { %p44_p3 = scmp.ne.s32.totalorder %s748_s16, %s744_s15  ;;  %p1093_p4 = scmp.eq.s32.totalorder %s813_s19, 0 }
   0xf   : > { %s829_s24 = scalar_select %p29_p1, %s752_s17, %s31_s22  }
  0x10   : > { %p831_p5 = por %p39_p2, %p38_p0  ;;  %p837_p6 = por %p1093_p4, %p44_p3 }
  0x11   : > { %p136_p7 = scmp.eq.s32.totalorder %s813_s19, 1  ;;  %p142_p8 = scmp.eq.s32.totalorder %s461_s20, 1 }
  0x12   : > { %s1100_s26 = scalar_select %p837_p6, 1, 0 }
  0x13   : > { %p462_p9 = scmp.ge.s32.totalorder %s756_s18, 1  ;;  %p149_p10 = scmp.lt.s32.totalorder %s756_s18, 3 }
  0x14   : > { %p844_p11 = por %p136_p7, %p38_p0  ;;  %p848_p12 = por %p142_p8, %p44_p3 }
  0x15   : > { %p852_p13 = pnand %p462_p9, %p149_p10  ;;  %s758_s30 = smov [#allocation5]  }
  0x16   : > { %s1101_s27 = scalar_select %p844_p11, 1, 0 }
  0x17   : > { %s1102_s28 = scalar_select %p848_p12, 1, 0 }
  0x18   : > { %s1103_s29 = scalar_select %p852_p13, 1, 0 }
  0x19   : > { %p502_p2 = pneg %p852_p13  ;;  %s162_s5 = sshll.u32 %s758_s30, 4  ;;  %s163_s5 = int_to_ptr.vmem [resolvable:$true] %s162_s5 }
  0x1a   : > { %p522_p4 = scmp.lt.s32.totalorder %s756_s18, 2  ;;  %p1104_p0 = scmp.eq.s32.totalorder %s813_s19, 0 }
  0x1b   : > { %s759_s8 = smov [#allocation7]   ;;  %s566_s12 = scalar_lea.hbm %s1089_s1, 16 }
  0x1c   : > { %p862_p7 = pnand %p502_p2, %p1104_p0  ;;  %p868_p3 = pnand %p522_p4, %p831_p5 }
  0x1d   : > { %s173_s9 = sshll.u32 %s759_s8, 4  ;;  %p567_p8 = scmp.ne.s32.totalorder %s1089_s1, %s566_s12  ;;  %s872_s9 = int_to_ptr.vmem [resolvable:$true] %s173_s9 }
  0x1e   : > { %s1106_s7 = scalar_select %p868_p3, 1, 0 }
  0x1f   : > { %p568_p9 = pneg %p862_p7  ;;  %p573_p10 = scmp.lt.u32.totalorder %s566_s12, %s1089_s1 }
  0x21   : > { %p569_p4 = pnand %p568_p9, %p567_p8 }
  0x23   : > { %p570_p5 = pneg %p569_p4 }
  0x25   : > { %p575_p2 = pnand %p573_p10, %p570_p5 }
  0x27   : > { %578 = shalt.err (!%p575_p2)
}
  0x28   : > { %s579_s23 = scalar_lea.vmem %s163_s5, 16  ;;  %s586_s25 = scalar_lea.vmem %s163_s5, 32 }
  0x29   : > { %p580_p0 = scmp.ne.s32.totalorder %s163_s5, %s579_s23  ;;  %p587_p11 = scmp.lt.s32.totalorder %s163_s5, %s163_s5 }
  0x2a   : > { %p588_p6 = scmp.lt.s32.totalorder %s586_s25, %s579_s23 }
  0x2b   : > { %p582_p1 = pnand %p580_p0, %p568_p9 }
  0x2c   : > { %p589_p13 = por %p588_p6, %p587_p11 }
  0x2d   : > { %p583_p12 = pneg %p582_p1 }
  0x2f   : > { %p590_p3 = pnand %p589_p13, %p583_p12 }
  0x31   : > { %593 = shalt.err (!%p590_p3)
}
  0x32   : > { %505 = dma.hbm_to_vmem [thread:$0]  (!%p862_p7), %s1089_s1, 16, %s163_s5, [#allocation6]  }
  0x33   : > { %s897_s10 = sand.u32 1, %s752_s17   ;;  %s594_s13 = scalar_lea.hbm %s1090_s2, 16 }
  0x34   : > { %p595_p6 = scmp.ne.s32.totalorder %s1090_s2, %s594_s13  ;;  %p601_p13 = scmp.lt.u32.totalorder %s594_s13, %s1090_s2 }
  0x36   : > { %p597_p11 = pnand %p595_p6, %p568_p9 }
  0x38   : > { %p598_p12 = pneg %p597_p11 }
  0x3a   : > { %p603_p1 = pnand %p601_p13, %p598_p12 }
  0x3c   : > { %606 = shalt.err (!%p603_p1)
}
  0x3d   : > { %s607_s5 = scalar_lea.vmem %s872_s9, 16  ;;  %s614_s25 = scalar_lea.vmem %s872_s9, 32 }
  0x3e   : > { %p608_p3 = scmp.ne.s32.totalorder %s872_s9, %s607_s5  ;;  %p615_p5 = scmp.lt.s32.totalorder %s872_s9, %s872_s9 }
  0x3f   : > { %p616_p10 = scmp.lt.s32.totalorder %s614_s25, %s607_s5 }
  0x40   : > { %p610_p8 = pnand %p608_p3, %p568_p9 }
  0x41   : > { %p617_p2 = por %p616_p10, %p615_p5 }
  0x42   : > { %p611_p4 = pneg %p610_p8 }
  0x44   : > { %p618_p0 = pnand %p617_p2, %p611_p4 }
  0x46   : > { %621 = shalt.err (!%p618_p0)
}
  0x47   : > { %508 = dma.hbm_to_vmem [thread:$0]  (!%p862_p7), %s1090_s2, 16, %s872_s9, [#allocation6]  }
  0x48   : > { %s466_s11 = sshll.u32 %s897_s10, 4  ;;  %s485_s12 = sshll.u32 %s756_s18, 8 }
  0x49   : > { %s1107_s0 = sld [smem:[#allocation15_spill]]  ;;  %s188_s6 = scalar_lea.vmem [#allocation2], %s466_s11 }
  0x4a   : > { %s195_s22 = sshll.u32 %s188_s6, 4  ;;  %s185_s23 = scalar_lea.sflag [#allocation3], %s897_s10  ;;  %s936_s22 = int_to_ptr.vmem [resolvable:$true] %s195_s22 }
  0x4b   : > { %p1108_p9 = scmp.ne.s32.totalorder %s1106_s7, 0 }
  0x4d   : > { %p624_p6 = pneg %p1108_p9 }
  0x4f   : > { %s932_s20 = scalar_lea.hbm %s1107_s0, %s485_s12  ;;  %s627_s30 = scalar_lea.hbm %s1107_s0, 512 }
  0x50   : > { %s622_s5 = scalar_lea.hbm %s932_s20, 256  ;;  %p628_p13 = scmp.lt.u32.totalorder %s932_s20, %s1107_s0 }
  0x51   : > { %p623_p7 = scmp.ne.s32.totalorder %s932_s20, %s622_s5  ;;  %p629_p1 = scmp.lt.u32.totalorder %s627_s30, %s622_s5 }
  0x52   : > { %p631_p8 = scmp.lt.u32.totalorder %s622_s5, %s932_s20 }
  0x53   : > { %p625_p11 = pnand %p624_p6, %p623_p7  ;;  %p630_p3 = por %p629_p1, %p628_p13 }
  0x55   : > { %p626_p12 = pneg %p625_p11  ;;  %p632_p4 = por %p631_p8, %p630_p3 }
  0x57   : > { %p633_p5 = pnand %p632_p4, %p626_p12 }
  0x59   : > { %636 = shalt.err (!%p633_p5)
}
  0x5a   : > { %s637_s14 = scalar_lea.vmem %s936_s22, 256  ;;  %s760_s6 = smov [#allocation2]  }
  0x5b   : > { %p638_p10 = scmp.ne.s32.totalorder %s936_s22, %s637_s14  ;;  %s642_s9 = sshll.u32 %s760_s6, 4  ;;  %s643_s9 = int_to_ptr.vmem [resolvable:$false] %s642_s9 }
  0x5c   : > { %s644_s25 = scalar_lea.vmem %s643_s9, 512  ;;  %p645_p7 = scmp.lt.s32.totalorder %s936_s22, %s643_s9 }
  0x5d   : > { %p640_p2 = pnand %p638_p10, %p624_p6  ;;  %p646_p11 = scmp.lt.s32.totalorder %s644_s25, %s637_s14 }
  0x5f   : > { %p641_p0 = pneg %p640_p2  ;;  %p647_p13 = por %p646_p11, %p645_p7 }
  0x61   : > { %p648_p1 = pnand %p647_p13, %p641_p0 }
  0x63   : > { %651 = shalt.err (!%p648_p1)
}
  0x64   : > { %s761_s5 = smov 128   ;;  %s762_s30 = smov 8  }
  0x65   : > { %512 = dma.hbm_to_vmem [thread:$0]  (!%p1108_p9), %s932_s20, 256, %s936_s22, %s185_s23, %s761_s5, %s761_s5, %s762_s30  }
  0x66   : > { %s974_s14 = scalar_lea.hbm %s1091_s3, %s485_s12  ;;  %s209_s6 = scalar_lea.vmem [#allocation8], %s466_s11 }
  0x67   : > { %s216_s9 = sshll.u32 %s209_s6, 4  ;;  %s206_s25 = scalar_lea.sflag [#allocation9], %s897_s10  ;;  %s978_s9 = int_to_ptr.vmem [resolvable:$true] %s216_s9 }
  0x68   : > { %s652_s0 = scalar_lea.hbm %s974_s14, 256  ;;  %s657_s12 = scalar_lea.hbm %s1091_s3, 512 }
  0x69   : > { %p653_p12 = scmp.ne.s32.totalorder %s974_s14, %s652_s0  ;;  %p658_p4 = scmp.lt.u32.totalorder %s974_s14, %s1091_s3 }
  0x6a   : > { %p659_p5 = scmp.lt.u32.totalorder %s657_s12, %s652_s0  ;;  %p661_p2 = scmp.lt.u32.totalorder %s652_s0, %s974_s14 }
  0x6b   : > { %p655_p3 = pnand %p653_p12, %p624_p6 }
  0x6c   : > { %p660_p10 = por %p659_p5, %p658_p4 }
  0x6d   : > { %p656_p8 = pneg %p655_p3 }
  0x6e   : > { %p662_p0 = por %p661_p2, %p660_p10 }
  0x70   : > { %p663_p7 = pnand %p662_p0, %p656_p8 }
  0x72   : > { %666 = shalt.err (!%p663_p7)
}
  0x73   : > { %s667_s11 = scalar_lea.vmem %s978_s9, 256  ;;  %s763_s13 = smov [#allocation8]  }
  0x74   : > { %p668_p11 = scmp.ne.s32.totalorder %s978_s9, %s667_s11  ;;  %s672_s6 = sshll.u32 %s763_s13, 4  ;;  %s673_s6 = int_to_ptr.vmem [resolvable:$false] %s672_s6 }
  0x75   : > { %s674_s20 = scalar_lea.vmem %s673_s6, 512  ;;  %p675_p12 = scmp.lt.s32.totalorder %s978_s9, %s673_s6 }
  0x76   : > { %p670_p13 = pnand %p668_p11, %p624_p6  ;;  %p676_p3 = scmp.lt.s32.totalorder %s674_s20, %s667_s11 }
  0x78   : > { %p671_p1 = pneg %p670_p13  ;;  %p677_p4 = por %p676_p3, %p675_p12 }
  0x7a   : > { %p678_p5 = pnand %p677_p4, %p671_p1 }
  0x7c   : > { %681 = shalt.err (!%p678_p5)
}
  0x7d   : > { %515 = dma.hbm_to_vmem [thread:$0]  (!%p1108_p9), %s974_s14, 256, %s978_s9, %s206_s25, %s761_s5, %s761_s5, %s762_s30  }
  0x7e   : > { %p1109_p6 = scmp.ne.s32.totalorder %s1103_s29, 0 }
  0x7f   : > { %s1012_s0 = sand.u32 (!%p1109_p6), 1, %s748_s16   ;;  %p1110_p8 = scmp.ne.s32.totalorder (!%p1109_p6), %s1100_s26, 0 }
  0x80   : > { %228 = sbr.rel (%p1109_p6) target bundleno = 215 (0xd7), region = 36  ;;  %s1015_s22 = sshll.u32 (!%p1109_p6), %s1012_s0, 4 }
  0x81   : > { %s231_s7 = scalar_lea.sflag (!%p1109_p6), [#allocation3], %s1012_s0  ;;  %s234_s12 = scalar_lea.vmem (!%p1109_p6), [#allocation2], %s1015_s22 }
  0x87   : > { %727 = dma.done.wait (%p1110_p8), %s231_s7, 256  }
  0x88   : > { %729 = vsyncadd (%p1110_p8), %s231_s7, 4294967040  ;;  %p1111_p9 = scmp.eq.s32.totalorder %s813_s19, 0 }
  0x8a   : > { %731 = dma.done.wait (%p1111_p9), [#allocation6], 32   ;;  %p1112_p10 = pmov %p1111_p9 }
  0x8b   : > { %s248_s29 = scalar_lea.sflag [#allocation9], %s1012_s0  ;;  %s251_s10 = scalar_lea.vmem [#allocation8], %s1015_s22 }
  0x8c   : > { %733 = vsyncadd (%p1112_p10), [#allocation6], 4294967264 }
  0x8d   : > { %735 = dma.done.wait (%p1110_p8), %s248_s29, 256  }
  0x8e   : > { %737 = vsyncadd (%p1110_p8), %s248_s29, 4294967040  ;;  %v281_v0 = vld [vmem:[%s234_s12] sm:$0xff]  ;;  %v282_v1 = vld [vmem:[%s234_s12 + $0x8] sm:$0xff]  ;;  %s280_s26 = scalar_lea.vmem [#allocation10], %s1015_s22  ;;  %s487_s30 = sshll.u32 %s813_s19, 8 }
  0x8f   : > { %v283_v2 = vadd.f32 %v282_v1, %v281_v0  ;;  %v478_v24 = vld [vmem:[#allocation5] ss:$0 sm:$0xff]  ;;  %v479_v27 = vld [vmem:[#allocation7] ss:$0 sm:$0xff]  ;;  %s346_s5 = sshll.u32 %s280_s26, 4  ;;  %v326_v30 = vld [vmem:[%s251_s10] sm:$0xff]  ;;  %s1044_s25 = scalar_lea.hbm %s1092_s4, %s487_s30  ;;  %s1039_s5 = int_to_ptr.vmem [resolvable:$true] %s346_s5 }
  0x90   : > { %v327_v31 = vld [vmem:[%s251_s10 + $0x8] sm:$0xff]  ;;  %s333_s19 = scalar_lea.sflag [#allocation4], %s1012_s0  ;;  %s682_s23 = scalar_lea.vmem %s1039_s5, 256 }
  0x91   : > { %v284_v3 = vrot.slane %v283_v2, 4  ;;  %p683_p2 = scmp.ne.s32.totalorder %s1039_s5, %s682_s23  ;;  %p1113_p0 = scmp.ne.s32.totalorder %s1101_s27, 0 }
  0x92   : > { %s764_s8 = smov [#allocation10]  }
  0x93   : > { %v285_v4 = vadd.f32 %v284_v3, %v283_v2  ;;  %p684_p7 = pnand %p683_p2, %p1113_p0  ;;  %s686_s11 = sshll.u32 %s764_s8, 4  ;;  %s687_s11 = int_to_ptr.vmem [resolvable:$false] %s686_s11 }
  0x94   : > { %s688_s13 = scalar_lea.vmem %s687_s11, 512  ;;  %p689_p13 = scmp.lt.s32.totalorder %s1039_s5, %s687_s11 }
  0x95   : > { %v286_v5 = vrot.slane %v285_v4, 2  ;;  %p685_p11 = pneg %p684_p7  ;;  %p690_p1 = scmp.lt.s32.totalorder %s688_s13, %s682_s23 }
  0x97   : > { %v287_v6 = vadd.f32 %v286_v5, %v285_v4  ;;  %p691_p12 = por %p690_p1, %p689_p13 }
  0x99   : > { %v288_v7 = vrot.slane %v287_v6, 1  ;;  %p692_p3 = pnand %p691_p12, %p685_p11 }
  0x9b   : > { %v289_v8 = vadd.f32 %v288_v7, %v287_v6 }
  0x9d   : > { %v291_v9 = vmul.f32 0.0625, %v289_v8 }
  0x9f   : > { %v292_v10 = vsub.f32 %v281_v0, %v291_v9  ;;  %v293_v11 = vsub.f32 %v282_v1, %v291_v9 }
  0xa1   : > { %v294_v12 = vmul.f32 %v292_v10, %v292_v10  ;;  %v295_v13 = vmul.f32 %v293_v11, %v293_v11 }
  0xa3   : > { %v296_v14 = vadd.f32 %v295_v13, %v294_v12 }
  0xa5   : > { %v297_v15 = vrot.slane %v296_v14, 4 }
  0xa7   : > { %v298_v16 = vadd.f32 %v297_v15, %v296_v14 }
  0xa9   : > { %v299_v17 = vrot.slane %v298_v16, 2 }
  0xab   : > { %v300_v18 = vadd.f32 %v299_v17, %v298_v16 }
  0xad   : > { %v301_v19 = vrot.slane %v300_v18, 1 }
  0xaf   : > { %v302_v20 = vadd.f32 %v301_v19, %v300_v18 }
  0xb1   : > { %v303_v21 = vmul.f32 0.0625, %v302_v20 }
  0xb3   : > { %v304_v22 = vadd.f32 1e-05, %v303_v21 }
  0xb5   : > { %564 = vrsqrt.f32 %v304_v22 }
  0xbf   : > { %v565_v23 = vpop.eup %564 }
  0xc0   : > { %v306_v25 = vmul.f32 %v565_v23, %v292_v10  ;;  %v307_v26 = vmul.f32 %v565_v23, %v293_v11 }
  0xc2   : > { %v315_v28 = vmul.f32 %v478_v24, %v306_v25  ;;  %v316_v29 = vmul.f32 %v478_v24, %v307_v26 }
  0xc4   : > { %v324_v32 = vadd.f32 %v479_v27, %v315_v28  ;;  %v325_v33 = vadd.f32 %v479_v27, %v316_v29 }
  0xc6   : > { %v328_v34 = vadd.f32 %v326_v30, %v324_v32  ;;  %v329_v35 = vadd.f32 %v327_v31, %v325_v33 }
  0xc8   : > { %330 = vst [vmem:[%s280_s26] sm:$0xff] %v328_v34  ;;  %331 = vst [vmem:[%s280_s26 + $0x8] sm:$0xff] %v329_v35 }
  0xc9   : > { %695 = shalt.err (!%p692_p3)
}
  0xca   : > { %s696_s6 = scalar_lea.hbm %s1044_s25, 256  ;;  %s700_s7 = scalar_lea.hbm %s1092_s4, 512 }
  0xcb   : > { %p697_p4 = scmp.ne.s32.totalorder %s1044_s25, %s696_s6  ;;  %p701_p8 = scmp.lt.u32.totalorder %s1044_s25, %s1092_s4 }
  0xcc   : > { %p702_p9 = scmp.lt.u32.totalorder %s700_s7, %s696_s6  ;;  %p704_p2 = scmp.lt.u32.totalorder %s696_s6, %s1044_s25 }
  0xcd   : > { %p698_p5 = pnand %p697_p4, %p1113_p0 }
  0xce   : > { %p703_p10 = por %p702_p9, %p701_p8 }
  0xcf   : > { %p699_p6 = pneg %p698_p5 }
  0xd0   : > { %p705_p7 = por %p704_p2, %p703_p10 }
  0xd2   : > { %p706_p11 = pnand %p705_p7, %p699_p6 }
  0xd4   : > { %709 = shalt.err (!%p706_p11)
}
  0xd5   : > { %s765_s10 = smov 128   ;;  %s766_s26 = smov 8  }
  0xd6   : > { %500 = dma.vmem_to_hbm [thread:$0]  (%p1113_p0), %s1039_s5, 256, %s1044_s25, %s333_s19, %s765_s10, %s765_s10, %s766_s26  }
  0xd7 PF: > { %s361_s30 = sand.u32 1, %s744_s15   ;;  %p1114_p13 = scmp.ne.s32.totalorder %s1102_s28, 0 }
  0xd8   : > { %p1115_p1 = scmp.ge.s32.totalorder %s756_s18, 2  ;;  %s362_s14 = scalar_lea.sflag [#allocation4], %s361_s30 }
  0xda   : > { %p517_p12 = pnand %p1115_p1, %p1114_p13 }
  0xdc   : > { %739 = dma.done.wait (!%p517_p12), %s362_s14, 256  }
  0xdd   : > { %741 = vsyncadd (!%p517_p12), %s362_s14, 4294967040  ;;  %p21_p3 = scmp.ge.s32.totalorder %s817_s21, 4   ;;  %s1116_s15 = smov %s748_s16 }
  0xde   : > { %s1117_s16 = smov %s752_s17  ;;  %s1118_s17 = smov %s829_s24 }
  0xdf   : > { %s1119_s18 = smov %s817_s21  ;;  %23 = sbr.rel (!%p21_p3) target bundleno = 10 (0xa), region = 102 }
  0xe6   :  { %367 = vsyncpa [#allocation3], 1 }
  0xe7   :  { %369 = vsyncpa [#allocation3 + $0x1], 1 }
  0xe8   :  { %370 = vsyncpa [#allocation6], 1 }
  0xe9   :  { %371 = vsyncpa [#allocation9], 1 }
  0xea   :  { %373 = vsyncpa [#allocation9 + $0x1], 1 }
  0xeb   :  { %374 = vsyncpa [#allocation4], 1 }
  0xec   :  { %376 = vsyncpa [#allocation4 + $0x1], 1 }

</bundles_post_ra>
